<compile_context>
chip_gen: v7x
topology: tpu7x:2x2x1
jax: 0.10.0
libtpu: 0.0.40
codegen_flags: <defaults>
</compile_context>

<pallas_src>
import functools
import math

import jax
import jax.numpy as jnp
from jax.experimental import pallas as pl
from jax.experimental.pallas import tpu as pltpu


_K = 5  # both convs: kernel == stride == 5, padding == 0


# ------------------------------ fused kernel -------------------------------

def _dqn_fused_kernel(p_ref, w1_ref, w2_ref, b2_ref, wh_ref, bh_ref,
                      wz_ref, bz_ref, o_ref,
                      h1_scr, h1cat_scr, hfc_scr,
                      *, bp, n_pos, n_tap, oc1, oc2, action_space, atoms, log):
    f32 = jnp.float32
    gp9 = n_pos * bp                       # rows per conv2 tap: (ij, b)

    # --- conv1 (5x5/s5) + ReLU: ONE big matmul over all taps/positions/batch.
    #     Bias rides in the trailing ones-lane of the patch matrix (folded).
    h1_scr[...] = jnp.maximum(
        jnp.dot(p_ref[...], w1_ref[...], preferred_element_type=f32), 0.0)

    # --- relayout (tap, ij, b) rows -> (ij, b) rows x (tap, oc1) lanes so that
    #     conv2 becomes a single long-K contraction (no serial accumulator).
    for t in range(n_tap):
        h1cat_scr[:, t * oc1:(t + 1) * oc1] = h1_scr[t * gp9:(t + 1) * gp9, :]

    # --- conv2 (5x5/s5) + ReLU: ONE (gp9, 25*32) x (25*32, 64) matmul.
    h2 = jnp.maximum(
        jnp.dot(h1cat_scr[...], w2_ref[...], preferred_element_type=f32)
        + b2_ref[...], 0.0)                                  # (gp9, 64)

    # --- relayout (ij, b) rows -> batch-major flattened features (bp, 576).
    for ij in range(n_pos):
        hfc_scr[:, ij * oc2:(ij + 1) * oc2] = h2[ij * bp:(ij + 1) * bp, :]

    # --- fc_h_v | fc_h_a (stacked along N): ONE (bp, 576) x (576, 2H) matmul.
    hva = jnp.maximum(
        jnp.dot(hfc_scr[...], wh_ref[...], preferred_element_type=f32)
        + bh_ref[...], 0.0)                                  # (bp, 2H)

    # --- fc_z_v | fc_z_a as one block-diagonal matmul -> (bp, atoms + A*atoms)
    za = jnp.dot(hva, wz_ref[...], preferred_element_type=f32) + bz_ref[...]

    # --- dueling combine + (log-)softmax over atoms; ONE coalesced store.
    v = za[:, :atoms]
    a_parts = [za[:, atoms * (1 + k):atoms * (2 + k)]
               for k in range(action_space)]
    a_mean = a_parts[0]
    for k in range(1, action_space):
        a_mean = a_mean + a_parts[k]
    a_mean = a_mean * (1.0 / action_space)
    outs = []
    for k in range(action_space):
        q = v + a_parts[k] - a_mean
        m = jnp.max(q, axis=-1, keepdims=True)
        s = q - m
        e = jnp.exp(s)
        denom = jnp.sum(e, axis=-1, keepdims=True)
        if log:
            outs.append(s - jnp.log(denom))
        else:
            outs.append(e / denom)   # exact divide: probabilities sum to one
    o_ref[...] = jnp.concatenate(outs, axis=-1)              # (bp, A*atoms)


# ------------------------------- glue (JAX) --------------------------------

def _build_conv1_patches(x, bp):
    """im2col for conv1, rows ordered (kh2, kw2, i, j, b) with b padded to bp
    (multiple of 8) and a trailing ones-lane so the conv1 bias is folded into
    the weight matrix (the 100-lane K pads to 128 lanes anyway)."""
    B, C, H, W = x.shape
    oh2, ow2 = H // (_K * _K), W // (_K * _K)
    p = x.reshape(B, C, oh2, _K, _K, ow2, _K, _K)
    #              0  1   2    3   4    5   6   7
    p = p.transpose(3, 6, 2, 5, 0, 1, 4, 7)     # (kh2,kw2,i,j,b,c,kh1,kw1)
    p = p.reshape(_K * _K, oh2 * ow2, B, C * _K * _K)
    p = jnp.concatenate([p, jnp.ones_like(p[..., :1])], axis=-1)  # bias lane
    if bp > B:
        p = jnp.pad(p, ((0, 0), (0, 0), (0, bp - B), (0, 0)))
    return p.reshape(_K * _K * oh2 * ow2 * bp, C * _K * _K + 1)


def prepare_fused_params(params):
    """One-time repack of PyTorch-layout weights into kernel-ready layouts."""
    w1, b1 = params["conv1"]            # (32, C, 5, 5), (32,)
    w2, b2 = params["conv2"]            # (64, 32, 5, 5), (64,)
    whv, bhv = params["fc_h_v"]         # (576, H), (H,)
    wha, bha = params["fc_h_a"]
    wzv, bzv = params["fc_z_v"]         # (H, atoms), (atoms,)
    wza, bza = params["fc_z_a"]         # (H, A*atoms), (A*atoms,)

    oc1, oc2 = w1.shape[0], w2.shape[0]
    hidden = wzv.shape[0]
    atoms = wzv.shape[1]
    n_tap = w2.shape[2] * w2.shape[3]
    spatial = whv.shape[0] // oc2       # 9

    # conv1: (C*25 + 1, 32) with the bias folded as the last row.
    w1_k = jnp.concatenate([w1.reshape(oc1, -1).T, b1[None, :]], axis=0)

    # conv2 as a single K = 25*32 contraction; lanes ordered (tap, oc1).
    w2_k = w2.transpose(2, 3, 1, 0).reshape(n_tap * w2.shape[1], oc2)
    b2_k = b2[None, :]

    # fc_h_v | fc_h_a stacked along N; rows permuted (oc2, ij) -> (ij, oc2)
    # to match the batch-major flattened-feature lane order in the kernel.
    wh = jnp.concatenate([whv, wha], axis=1)                        # (576, 2H)
    wh_k = wh.reshape(oc2, spatial, 2 * hidden).transpose(1, 0, 2).reshape(
        spatial * oc2, 2 * hidden)
    bh_k = jnp.concatenate([bhv, bha])[None, :]                     # (1, 2H)

    # fc_z_v | fc_z_a as one block-diagonal matmul.
    nz = atoms + wza.shape[1]
    wz_k = jnp.zeros((2 * hidden, nz), jnp.float32)
    wz_k = wz_k.at[:hidden, :atoms].set(wzv)
    wz_k = wz_k.at[hidden:, atoms:].set(wza)                        # block-diag
    bz_k = jnp.concatenate([bzv, bza])[None, :]                     # (1, nz)

    return {"w1": w1_k, "w2": w2_k, "b2": b2_k,
            "wh": wh_k, "bh": bh_k, "wz": wz_k, "bz": bz_k}


def dqn_forward(prepared, x, *, action_space, atoms, log=False):
    B, C, H, W = x.shape
    bp = ((B + 7) // 8) * 8                      # sublane-aligned batch rows
    n_tap = _K * _K
    n_pos = (H // (_K * _K)) * (W // (_K * _K))  # 9 conv2 output positions
    gp9 = n_pos * bp
    oc1 = prepared["w1"].shape[1]                # 32
    oc2 = prepared["w2"].shape[1]                # 64

    p1 = _build_conv1_patches(x, bp)             # (25*9*bp, C*25 + 1)
    kern = functools.partial(
        _dqn_fused_kernel, bp=bp, n_pos=n_pos, n_tap=n_tap, oc1=oc1, oc2=oc2,
        action_space=action_space, atoms=atoms, log=log)
    out = pl.pallas_call(
        kern,
        out_shape=jax.ShapeDtypeStruct((bp, action_space * atoms), jnp.float32),
        scratch_shapes=[
            pltpu.VMEM((n_tap * gp9, oc1), jnp.float32),   # conv1 output
            pltpu.VMEM((gp9, n_tap * oc1), jnp.float32),   # lane-concat (K=800)
            pltpu.VMEM((bp, n_pos * oc2), jnp.float32),    # flattened features
        ],
    )(p1, prepared["w1"], prepared["w2"], prepared["b2"],
      prepared["wh"], prepared["bh"], prepared["wz"], prepared["bz"])
    return out[:B].reshape(B, action_space, atoms)


# ------------------------------ initialization ------------------------------

def init_noisy_linear(key, in_features, out_features, std_init=0.5):
    """Training-mode effective (W^T (in,out), b (out,)) like NoisyLinear."""
    k_wmu, k_bmu, k_ein, k_eout = jax.random.split(key, 4)
    mu_range = 1.0 / math.sqrt(in_features)
    weight_mu = jax.random.uniform(k_wmu, (out_features, in_features),
                                   jnp.float32, -mu_range, mu_range)
    weight_sigma = jnp.full((out_features, in_features),
                            std_init / math.sqrt(in_features), jnp.float32)
    bias_mu = jax.random.uniform(k_bmu, (out_features,),
                                 jnp.float32, -mu_range, mu_range)
    bias_sigma = jnp.full((out_features,),
                          std_init / math.sqrt(out_features), jnp.float32)

    def scale_noise(k, n):
        z = jax.random.normal(k, (n,), jnp.float32)
        return jnp.sign(z) * jnp.sqrt(jnp.abs(z))

    eps_in = scale_noise(k_ein, in_features)
    eps_out = scale_noise(k_eout, out_features)
    w_eff = weight_mu + weight_sigma * jnp.outer(eps_out, eps_in)   # (out, in)
    b_eff = bias_mu + bias_sigma * eps_out                          # (out,)
    return w_eff.T, b_eff                                           # (in, out)


def init_conv(key, in_c, out_c, k):
    kw, kb = jax.random.split(key)
    fan_in = in_c * k * k
    bound = 1.0 / math.sqrt(fan_in)
    w = jax.random.uniform(kw, (out_c, in_c, k, k), jnp.float32, -bound, bound)
    b = jax.random.uniform(kb, (out_c,), jnp.float32, -bound, bound)
    return w, b


def init_dqn_params(key, history_length, hidden_size, atoms, action_space,
                    noisy_std):
    ks = jax.random.split(key, 6)
    conv_output_size = 576   # data-efficient architecture
    return {
        "conv1": init_conv(ks[0], history_length, 32, 5),
        "conv2": init_conv(ks[1], 32, 64, 5),
        "fc_h_v": init_noisy_linear(ks[2], conv_output_size, hidden_size, noisy_std),
        "fc_h_a": init_noisy_linear(ks[3], conv_output_size, hidden_size, noisy_std),
        "fc_z_v": init_noisy_linear(ks[4], hidden_size, atoms, noisy_std),
        "fc_z_a": init_noisy_linear(ks[5], hidden_size, action_space * atoms, noisy_std),
    }


# ------------------------- pure-JAX reference check ------------------------

def reference_forward(params, x, action_space, atoms, log=False):
    hi = jax.lax.Precision.HIGHEST

    def conv(z, w, b, s):
        y = jax.lax.conv_general_dilated(
            z, w, (s, s), "VALID",
            dimension_numbers=("NCHW", "OIHW", "NCHW"), precision=hi)
        return jax.nn.relu(y + b[None, :, None, None])

    h = conv(x, *params["conv1"], 5)
    h = conv(h, *params["conv2"], 5)
    B = x.shape[0]
    feat = h.reshape(B, -1)

    def lin(z, w, b):
        return jnp.dot(z, w, precision=hi) + b

    hv = jax.nn.relu(lin(feat, *params["fc_h_v"]))
    ha = jax.nn.relu(lin(feat, *params["fc_h_a"]))
    v = lin(hv, *params["fc_z_v"]).reshape(B, 1, atoms)
    a = lin(ha, *params["fc_z_a"]).reshape(B, action_space, atoms)
    q = v + a - a.mean(1, keepdims=True)
    return jax.nn.log_softmax(q, axis=2) if log else jax.nn.softmax(q, axis=2)


# ---------------------------------- main ------------------------------------

if __name__ == "__main__":
    # "args": data-efficient architecture (conv_output_size = 576 -> 75x75 input)
    history_length = 4
    hidden_size = 32
    atoms = 8
    action_space = 5
    noisy_std = 0.5
    batch = 2

    key = jax.random.PRNGKey(0)
    k_params, k_x = jax.random.split(key)
    params = init_dqn_params(k_params, history_length, hidden_size, atoms,
                             action_space, noisy_std)
    x = jax.random.normal(k_x, (batch, history_length, 75, 75), jnp.float32)

    prepared = prepare_fused_params(params)

    fwd = jax.jit(functools.partial(dqn_forward, action_space=action_space,
                                    atoms=atoms, log=False))
    q = jax.block_until_ready(fwd(prepared, x))
    assert q.shape == (batch, action_space, atoms)

    q_ref = reference_forward(params, x, action_space, atoms, log=False)
    assert bool(jnp.allclose(q, q_ref, atol=5e-3)), "softmax mismatch vs reference"
    assert bool(jnp.allclose(q.sum(-1), 1.0, atol=1e-4))

    fwd_log = jax.jit(functools.partial(dqn_forward, action_space=action_space,
                                        atoms=atoms, log=True))
    ql = jax.block_until_ready(fwd_log(prepared, x))
    ql_ref = reference_forward(params, x, action_space, atoms, log=True)
    assert bool(jnp.allclose(ql, ql_ref, atol=1e-2)), "log_softmax mismatch vs reference"

    print("KERNEL_OK")
</pallas_src>

<mosaic_0001>
module attributes {stable_mosaic.version = 11 : i64} {
  func.func @_dqn_fused_kernel(%arg0: memref<1800x101xf32, #tpu.memory_space<vmem>>, %arg1: memref<101x32xf32, #tpu.memory_space<vmem>>, %arg2: memref<800x64xf32, #tpu.memory_space<vmem>>, %arg3: memref<1x64xf32, #tpu.memory_space<vmem>>, %arg4: memref<576x64xf32, #tpu.memory_space<vmem>>, %arg5: memref<1x64xf32, #tpu.memory_space<vmem>>, %arg6: memref<64x48xf32, #tpu.memory_space<vmem>>, %arg7: memref<1x48xf32, #tpu.memory_space<vmem>>, %arg8: memref<8x40xf32, #tpu.memory_space<vmem>>, %arg9: memref<1800x32xf32, #tpu.memory_space<vmem>>, %arg10: memref<72x800xf32, #tpu.memory_space<vmem>>, %arg11: memref<8x576xf32, #tpu.memory_space<vmem>>) attributes {dimension_semantics = [], scalar_prefetch = 0 : i64, scratch_operands = 3 : i64, tpu.core_type = #tpu.core_type<tc>} {
    %c0 = arith.constant 0 : index
    %c0_0 = arith.constant 0 : index
    %0 = vector.load %arg0[%c0, %c0_0] : memref<1800x101xf32, #tpu.memory_space<vmem>>, vector<1800x101xf32>
    %c0_1 = arith.constant 0 : index
    %c0_2 = arith.constant 0 : index
    %1 = vector.load %arg1[%c0_1, %c0_2] : memref<101x32xf32, #tpu.memory_space<vmem>>, vector<101x32xf32>
    %cst = arith.constant dense<0.000000e+00> : vector<1800x32xf32>
    %2 = tpu.matmul %0, %1, %cst {dimension_numbers = #tpu.dot_dimension_numbers<[1], [0], [0], [1], [0, 0, 1, 1], [], []>} : vector<1800x101xf32>, vector<101x32xf32>, vector<1800x32xf32> -> vector<1800x32xf32>
    %cst_3 = arith.constant 0.000000e+00 : f32
    %3 = vector.broadcast %cst_3 : f32 to vector<1800x32xf32>
    %4 = arith.maximumf %2, %3 : vector<1800x32xf32>
    %c0_4 = arith.constant 0 : index
    %c0_5 = arith.constant 0 : index
    %5 = vector.load %arg9[%c0_4, %c0_5] : memref<1800x32xf32, #tpu.memory_space<vmem>>, vector<1800x32xf32>
    tpu.vector_store %arg9[%c0_4, %c0_5], %4 {strides = array<i32>} : memref<1800x32xf32, #tpu.memory_space<vmem>>, vector<1800x32xf32>,
    %c0_6 = arith.constant 0 : index
    %c0_7 = arith.constant 0 : index
    %6 = vector.load %arg9[%c0_6, %c0_7] : memref<1800x32xf32, #tpu.memory_space<vmem>>, vector<72x32xf32>
    %c0_8 = arith.constant 0 : index
    %c0_9 = arith.constant 0 : index
    %7 = vector.load %arg10[%c0_8, %c0_9] : memref<72x800xf32, #tpu.memory_space<vmem>>, vector<72x32xf32>
    tpu.vector_store %arg10[%c0_8, %c0_9], %6 {strides = array<i32>} : memref<72x800xf32, #tpu.memory_space<vmem>>, vector<72x32xf32>,
    %c72 = arith.constant 72 : index
    %c0_10 = arith.constant 0 : index
    %8 = vector.load %arg9[%c72, %c0_10] : memref<1800x32xf32, #tpu.memory_space<vmem>>, vector<72x32xf32>
    %c0_11 = arith.constant 0 : index
    %c32 = arith.constant 32 : index
    %9 = vector.load %arg10[%c0_11, %c32] : memref<72x800xf32, #tpu.memory_space<vmem>>, vector<72x32xf32>
    tpu.vector_store %arg10[%c0_11, %c32], %8 {strides = array<i32>} : memref<72x800xf32, #tpu.memory_space<vmem>>, vector<72x32xf32>,
    %c144 = arith.constant 144 : index
    %c0_12 = arith.constant 0 : index
    %10 = vector.load %arg9[%c144, %c0_12] : memref<1800x32xf32, #tpu.memory_space<vmem>>, vector<72x32xf32>
    %c0_13 = arith.constant 0 : index
    %c64 = arith.constant 64 : index
    %11 = vector.load %arg10[%c0_13, %c64] : memref<72x800xf32, #tpu.memory_space<vmem>>, vector<72x32xf32>
    tpu.vector_store %arg10[%c0_13, %c64], %10 {strides = array<i32>} : memref<72x800xf32, #tpu.memory_space<vmem>>, vector<72x32xf32>,
    %c216 = arith.constant 216 : index
    %c0_14 = arith.constant 0 : index
    %12 = vector.load %arg9[%c216, %c0_14] : memref<1800x32xf32, #tpu.memory_space<vmem>>, vector<72x32xf32>
    %c0_15 = arith.constant 0 : index
    %c96 = arith.constant 96 : index
    %13 = vector.load %arg10[%c0_15, %c96] : memref<72x800xf32, #tpu.memory_space<vmem>>, vector<72x32xf32>
    tpu.vector_store %arg10[%c0_15, %c96], %12 {strides = array<i32>} : memref<72x800xf32, #tpu.memory_space<vmem>>, vector<72x32xf32>,
    %c288 = arith.constant 288 : index
    %c0_16 = arith.constant 0 : index
    %14 = vector.load %arg9[%c288, %c0_16] : memref<1800x32xf32, #tpu.memory_space<vmem>>, vector<72x32xf32>
    %c0_17 = arith.constant 0 : index
    %c128 = arith.constant 128 : index
    %15 = vector.load %arg10[%c0_17, %c128] : memref<72x800xf32, #tpu.memory_space<vmem>>, vector<72x32xf32>
    tpu.vector_store %arg10[%c0_17, %c128], %14 {strides = array<i32>} : memref<72x800xf32, #tpu.memory_space<vmem>>, vector<72x32xf32>,
    %c360 = arith.constant 360 : index
    %c0_18 = arith.constant 0 : index
    %16 = vector.load %arg9[%c360, %c0_18] : memref<1800x32xf32, #tpu.memory_space<vmem>>, vector<72x32xf32>
    %c0_19 = arith.constant 0 : index
    %c160 = arith.constant 160 : index
    %17 = vector.load %arg10[%c0_19, %c160] : memref<72x800xf32, #tpu.memory_space<vmem>>, vector<72x32xf32>
    tpu.vector_store %arg10[%c0_19, %c160], %16 {strides = array<i32>} : memref<72x800xf32, #tpu.memory_space<vmem>>, vector<72x32xf32>,
    %c432 = arith.constant 432 : index
    %c0_20 = arith.constant 0 : index
    %18 = vector.load %arg9[%c432, %c0_20] : memref<1800x32xf32, #tpu.memory_space<vmem>>, vector<72x32xf32>
    %c0_21 = arith.constant 0 : index
    %c192 = arith.constant 192 : index
    %19 = vector.load %arg10[%c0_21, %c192] : memref<72x800xf32, #tpu.memory_space<vmem>>, vector<72x32xf32>
    tpu.vector_store %arg10[%c0_21, %c192], %18 {strides = array<i32>} : memref<72x800xf32, #tpu.memory_space<vmem>>, vector<72x32xf32>,
    %c504 = arith.constant 504 : index
    %c0_22 = arith.constant 0 : index
    %20 = vector.load %arg9[%c504, %c0_22] : memref<1800x32xf32, #tpu.memory_space<vmem>>, vector<72x32xf32>
    %c0_23 = arith.constant 0 : index
    %c224 = arith.constant 224 : index
    %21 = vector.load %arg10[%c0_23, %c224] : memref<72x800xf32, #tpu.memory_space<vmem>>, vector<72x32xf32>
    tpu.vector_store %arg10[%c0_23, %c224], %20 {strides = array<i32>} : memref<72x800xf32, #tpu.memory_space<vmem>>, vector<72x32xf32>,
    %c576 = arith.constant 576 : index
    %c0_24 = arith.constant 0 : index
    %22 = vector.load %arg9[%c576, %c0_24] : memref<1800x32xf32, #tpu.memory_space<vmem>>, vector<72x32xf32>
    %c0_25 = arith.constant 0 : index
    %c256 = arith.constant 256 : index
    %23 = vector.load %arg10[%c0_25, %c256] : memref<72x800xf32, #tpu.memory_space<vmem>>, vector<72x32xf32>
    tpu.vector_store %arg10[%c0_25, %c256], %22 {strides = array<i32>} : memref<72x800xf32, #tpu.memory_space<vmem>>, vector<72x32xf32>,
    %c648 = arith.constant 648 : index
    %c0_26 = arith.constant 0 : index
    %24 = vector.load %arg9[%c648, %c0_26] : memref<1800x32xf32, #tpu.memory_space<vmem>>, vector<72x32xf32>
    %c0_27 = arith.constant 0 : index
    %c288_28 = arith.constant 288 : index
    %25 = vector.load %arg10[%c0_27, %c288_28] : memref<72x800xf32, #tpu.memory_space<vmem>>, vector<72x32xf32>
    tpu.vector_store %arg10[%c0_27, %c288_28], %24 {strides = array<i32>} : memref<72x800xf32, #tpu.memory_space<vmem>>, vector<72x32xf32>,
    %c720 = arith.constant 720 : index
    %c0_29 = arith.constant 0 : index
    %26 = vector.load %arg9[%c720, %c0_29] : memref<1800x32xf32, #tpu.memory_space<vmem>>, vector<72x32xf32>
    %c0_30 = arith.constant 0 : index
    %c320 = arith.constant 320 : index
    %27 = vector.load %arg10[%c0_30, %c320] : memref<72x800xf32, #tpu.memory_space<vmem>>, vector<72x32xf32>
    tpu.vector_store %arg10[%c0_30, %c320], %26 {strides = array<i32>} : memref<72x800xf32, #tpu.memory_space<vmem>>, vector<72x32xf32>,
    %c792 = arith.constant 792 : index
    %c0_31 = arith.constant 0 : index
    %28 = vector.load %arg9[%c792, %c0_31] : memref<1800x32xf32, #tpu.memory_space<vmem>>, vector<72x32xf32>
    %c0_32 = arith.constant 0 : index
    %c352 = arith.constant 352 : index
    %29 = vector.load %arg10[%c0_32, %c352] : memref<72x800xf32, #tpu.memory_space<vmem>>, vector<72x32xf32>
    tpu.vector_store %arg10[%c0_32, %c352], %28 {strides = array<i32>} : memref<72x800xf32, #tpu.memory_space<vmem>>, vector<72x32xf32>,
    %c864 = arith.constant 864 : index
    %c0_33 = arith.constant 0 : index
    %30 = vector.load %arg9[%c864, %c0_33] : memref<1800x32xf32, #tpu.memory_space<vmem>>, vector<72x32xf32>
    %c0_34 = arith.constant 0 : index
    %c384 = arith.constant 384 : index
    %31 = vector.load %arg10[%c0_34, %c384] : memref<72x800xf32, #tpu.memory_space<vmem>>, vector<72x32xf32>
    tpu.vector_store %arg10[%c0_34, %c384], %30 {strides = array<i32>} : memref<72x800xf32, #tpu.memory_space<vmem>>, vector<72x32xf32>,
    %c936 = arith.constant 936 : index
    %c0_35 = arith.constant 0 : index
    %32 = vector.load %arg9[%c936, %c0_35] : memref<1800x32xf32, #tpu.memory_space<vmem>>, vector<72x32xf32>
    %c0_36 = arith.constant 0 : index
    %c416 = arith.constant 416 : index
    %33 = vector.load %arg10[%c0_36, %c416] : memref<72x800xf32, #tpu.memory_space<vmem>>, vector<72x32xf32>
    tpu.vector_store %arg10[%c0_36, %c416], %32 {strides = array<i32>} : memref<72x800xf32, #tpu.memory_space<vmem>>, vector<72x32xf32>,
    %c1008 = arith.constant 1008 : index
    %c0_37 = arith.constant 0 : index
    %34 = vector.load %arg9[%c1008, %c0_37] : memref<1800x32xf32, #tpu.memory_space<vmem>>, vector<72x32xf32>
    %c0_38 = arith.constant 0 : index
    %c448 = arith.constant 448 : index
    %35 = vector.load %arg10[%c0_38, %c448] : memref<72x800xf32, #tpu.memory_space<vmem>>, vector<72x32xf32>
    tpu.vector_store %arg10[%c0_38, %c448], %34 {strides = array<i32>} : memref<72x800xf32, #tpu.memory_space<vmem>>, vector<72x32xf32>,
    %c1080 = arith.constant 1080 : index
    %c0_39 = arith.constant 0 : index
    %36 = vector.load %arg9[%c1080, %c0_39] : memref<1800x32xf32, #tpu.memory_space<vmem>>, vector<72x32xf32>
    %c0_40 = arith.constant 0 : index
    %c480 = arith.constant 480 : index
    %37 = vector.load %arg10[%c0_40, %c480] : memref<72x800xf32, #tpu.memory_space<vmem>>, vector<72x32xf32>
    tpu.vector_store %arg10[%c0_40, %c480], %36 {strides = array<i32>} : memref<72x800xf32, #tpu.memory_space<vmem>>, vector<72x32xf32>,
    %c1152 = arith.constant 1152 : index
    %c0_41 = arith.constant 0 : index
    %38 = vector.load %arg9[%c1152, %c0_41] : memref<1800x32xf32, #tpu.memory_space<vmem>>, vector<72x32xf32>
    %c0_42 = arith.constant 0 : index
    %c512 = arith.constant 512 : index
    %39 = vector.load %arg10[%c0_42, %c512] : memref<72x800xf32, #tpu.memory_space<vmem>>, vector<72x32xf32>
    tpu.vector_store %arg10[%c0_42, %c512], %38 {strides = array<i32>} : memref<72x800xf32, #tpu.memory_space<vmem>>, vector<72x32xf32>,
    %c1224 = arith.constant 1224 : index
    %c0_43 = arith.constant 0 : index
    %40 = vector.load %arg9[%c1224, %c0_43] : memref<1800x32xf32, #tpu.memory_space<vmem>>, vector<72x32xf32>
    %c0_44 = arith.constant 0 : index
    %c544 = arith.constant 544 : index
    %41 = vector.load %arg10[%c0_44, %c544] : memref<72x800xf32, #tpu.memory_space<vmem>>, vector<72x32xf32>
    tpu.vector_store %arg10[%c0_44, %c544], %40 {strides = array<i32>} : memref<72x800xf32, #tpu.memory_space<vmem>>, vector<72x32xf32>,
    %c1296 = arith.constant 1296 : index
    %c0_45 = arith.constant 0 : index
    %42 = vector.load %arg9[%c1296, %c0_45] : memref<1800x32xf32, #tpu.memory_space<vmem>>, vector<72x32xf32>
    %c0_46 = arith.constant 0 : index
    %c576_47 = arith.constant 576 : index
    %43 = vector.load %arg10[%c0_46, %c576_47] : memref<72x800xf32, #tpu.memory_space<vmem>>, vector<72x32xf32>
    tpu.vector_store %arg10[%c0_46, %c576_47], %42 {strides = array<i32>} : memref<72x800xf32, #tpu.memory_space<vmem>>, vector<72x32xf32>,
    %c1368 = arith.constant 1368 : index
    %c0_48 = arith.constant 0 : index
    %44 = vector.load %arg9[%c1368, %c0_48] : memref<1800x32xf32, #tpu.memory_space<vmem>>, vector<72x32xf32>
    %c0_49 = arith.constant 0 : index
    %c608 = arith.constant 608 : index
    %45 = vector.load %arg10[%c0_49, %c608] : memref<72x800xf32, #tpu.memory_space<vmem>>, vector<72x32xf32>
    tpu.vector_store %arg10[%c0_49, %c608], %44 {strides = array<i32>} : memref<72x800xf32, #tpu.memory_space<vmem>>, vector<72x32xf32>,
    %c1440 = arith.constant 1440 : index
    %c0_50 = arith.constant 0 : index
    %46 = vector.load %arg9[%c1440, %c0_50] : memref<1800x32xf32, #tpu.memory_space<vmem>>, vector<72x32xf32>
    %c0_51 = arith.constant 0 : index
    %c640 = arith.constant 640 : index
    %47 = vector.load %arg10[%c0_51, %c640] : memref<72x800xf32, #tpu.memory_space<vmem>>, vector<72x32xf32>
    tpu.vector_store %arg10[%c0_51, %c640], %46 {strides = array<i32>} : memref<72x800xf32, #tpu.memory_space<vmem>>, vector<72x32xf32>,
    %c1512 = arith.constant 1512 : index
    %c0_52 = arith.constant 0 : index
    %48 = vector.load %arg9[%c1512, %c0_52] : memref<1800x32xf32, #tpu.memory_space<vmem>>, vector<72x32xf32>
    %c0_53 = arith.constant 0 : index
    %c672 = arith.constant 672 : index
    %49 = vector.load %arg10[%c0_53, %c672] : memref<72x800xf32, #tpu.memory_space<vmem>>, vector<72x32xf32>
    tpu.vector_store %arg10[%c0_53, %c672], %48 {strides = array<i32>} : memref<72x800xf32, #tpu.memory_space<vmem>>, vector<72x32xf32>,
    %c1584 = arith.constant 1584 : index
    %c0_54 = arith.constant 0 : index
    %50 = vector.load %arg9[%c1584, %c0_54] : memref<1800x32xf32, #tpu.memory_space<vmem>>, vector<72x32xf32>
    %c0_55 = arith.constant 0 : index
    %c704 = arith.constant 704 : index
    %51 = vector.load %arg10[%c0_55, %c704] : memref<72x800xf32, #tpu.memory_space<vmem>>, vector<72x32xf32>
    tpu.vector_store %arg10[%c0_55, %c704], %50 {strides = array<i32>} : memref<72x800xf32, #tpu.memory_space<vmem>>, vector<72x32xf32>,
    %c1656 = arith.constant 1656 : index
    %c0_56 = arith.constant 0 : index
    %52 = vector.load %arg9[%c1656, %c0_56] : memref<1800x32xf32, #tpu.memory_space<vmem>>, vector<72x32xf32>
    %c0_57 = arith.constant 0 : index
    %c736 = arith.constant 736 : index
    %53 = vector.load %arg10[%c0_57, %c736] : memref<72x800xf32, #tpu.memory_space<vmem>>, vector<72x32xf32>
    tpu.vector_store %arg10[%c0_57, %c736], %52 {strides = array<i32>} : memref<72x800xf32, #tpu.memory_space<vmem>>, vector<72x32xf32>,
    %c1728 = arith.constant 1728 : index
    %c0_58 = arith.constant 0 : index
    %54 = vector.load %arg9[%c1728, %c0_58] : memref<1800x32xf32, #tpu.memory_space<vmem>>, vector<72x32xf32>
    %c0_59 = arith.constant 0 : index
    %c768 = arith.constant 768 : index
    %55 = vector.load %arg10[%c0_59, %c768] : memref<72x800xf32, #tpu.memory_space<vmem>>, vector<72x32xf32>
    tpu.vector_store %arg10[%c0_59, %c768], %54 {strides = array<i32>} : memref<72x800xf32, #tpu.memory_space<vmem>>, vector<72x32xf32>,
    %c0_60 = arith.constant 0 : index
    %c0_61 = arith.constant 0 : index
    %56 = vector.load %arg10[%c0_60, %c0_61] : memref<72x800xf32, #tpu.memory_space<vmem>>, vector<72x800xf32>
    %c0_62 = arith.constant 0 : index
    %c0_63 = arith.constant 0 : index
    %57 = vector.load %arg2[%c0_62, %c0_63] : memref<800x64xf32, #tpu.memory_space<vmem>>, vector<800x64xf32>
    %cst_64 = arith.constant dense<0.000000e+00> : vector<72x64xf32>
    %58 = tpu.matmul %56, %57, %cst_64 {dimension_numbers = #tpu.dot_dimension_numbers<[1], [0], [0], [1], [0, 0, 1, 1], [], []>} : vector<72x800xf32>, vector<800x64xf32>, vector<72x64xf32> -> vector<72x64xf32>
    %c0_65 = arith.constant 0 : index
    %c0_66 = arith.constant 0 : index
    %59 = vector.load %arg3[%c0_65, %c0_66] : memref<1x64xf32, #tpu.memory_space<vmem>>, vector<1x64xf32>
    %60 = vector.broadcast %59 : vector<1x64xf32> to vector<72x64xf32>
    %61 = arith.addf %58, %60 : vector<72x64xf32>
    %cst_67 = arith.constant 0.000000e+00 : f32
    %62 = vector.broadcast %cst_67 : f32 to vector<72x64xf32>
    %63 = arith.maximumf %61, %62 : vector<72x64xf32>
    %64 = vector.extract_strided_slice %63 {offsets = [0, 0], sizes = [8, 64], strides = [1, 1]} : vector<72x64xf32> to vector<8x64xf32>
    %c0_68 = arith.constant 0 : index
    %c0_69 = arith.constant 0 : index
    %65 = vector.load %arg11[%c0_68, %c0_69] : memref<8x576xf32, #tpu.memory_space<vmem>>, vector<8x64xf32>
    tpu.vector_store %arg11[%c0_68, %c0_69], %64 {strides = array<i32>} : memref<8x576xf32, #tpu.memory_space<vmem>>, vector<8x64xf32>,
    %66 = vector.extract_strided_slice %63 {offsets = [8, 0], sizes = [8, 64], strides = [1, 1]} : vector<72x64xf32> to vector<8x64xf32>
    %c0_70 = arith.constant 0 : index
    %c64_71 = arith.constant 64 : index
    %67 = vector.load %arg11[%c0_70, %c64_71] : memref<8x576xf32, #tpu.memory_space<vmem>>, vector<8x64xf32>
    tpu.vector_store %arg11[%c0_70, %c64_71], %66 {strides = array<i32>} : memref<8x576xf32, #tpu.memory_space<vmem>>, vector<8x64xf32>,
    %68 = vector.extract_strided_slice %63 {offsets = [16, 0], sizes = [8, 64], strides = [1, 1]} : vector<72x64xf32> to vector<8x64xf32>
    %c0_72 = arith.constant 0 : index
    %c128_73 = arith.constant 128 : index
    %69 = vector.load %arg11[%c0_72, %c128_73] : memref<8x576xf32, #tpu.memory_space<vmem>>, vector<8x64xf32>
    tpu.vector_store %arg11[%c0_72, %c128_73], %68 {strides = array<i32>} : memref<8x576xf32, #tpu.memory_space<vmem>>, vector<8x64xf32>,
    %70 = vector.extract_strided_slice %63 {offsets = [24, 0], sizes = [8, 64], strides = [1, 1]} : vector<72x64xf32> to vector<8x64xf32>
    %c0_74 = arith.constant 0 : index
    %c192_75 = arith.constant 192 : index
    %71 = vector.load %arg11[%c0_74, %c192_75] : memref<8x576xf32, #tpu.memory_space<vmem>>, vector<8x64xf32>
    tpu.vector_store %arg11[%c0_74, %c192_75], %70 {strides = array<i32>} : memref<8x576xf32, #tpu.memory_space<vmem>>, vector<8x64xf32>,
    %72 = vector.extract_strided_slice %63 {offsets = [32, 0], sizes = [8, 64], strides = [1, 1]} : vector<72x64xf32> to vector<8x64xf32>
    %c0_76 = arith.constant 0 : index
    %c256_77 = arith.constant 256 : index
    %73 = vector.load %arg11[%c0_76, %c256_77] : memref<8x576xf32, #tpu.memory_space<vmem>>, vector<8x64xf32>
    tpu.vector_store %arg11[%c0_76, %c256_77], %72 {strides = array<i32>} : memref<8x576xf32, #tpu.memory_space<vmem>>, vector<8x64xf32>,
    %74 = vector.extract_strided_slice %63 {offsets = [40, 0], sizes = [8, 64], strides = [1, 1]} : vector<72x64xf32> to vector<8x64xf32>
    %c0_78 = arith.constant 0 : index
    %c320_79 = arith.constant 320 : index
    %75 = vector.load %arg11[%c0_78, %c320_79] : memref<8x576xf32, #tpu.memory_space<vmem>>, vector<8x64xf32>
    tpu.vector_store %arg11[%c0_78, %c320_79], %74 {strides = array<i32>} : memref<8x576xf32, #tpu.memory_space<vmem>>, vector<8x64xf32>,
    %76 = vector.extract_strided_slice %63 {offsets = [48, 0], sizes = [8, 64], strides = [1, 1]} : vector<72x64xf32> to vector<8x64xf32>
    %c0_80 = arith.constant 0 : index
    %c384_81 = arith.constant 384 : index
    %77 = vector.load %arg11[%c0_80, %c384_81] : memref<8x576xf32, #tpu.memory_space<vmem>>, vector<8x64xf32>
    tpu.vector_store %arg11[%c0_80, %c384_81], %76 {strides = array<i32>} : memref<8x576xf32, #tpu.memory_space<vmem>>, vector<8x64xf32>,
    %78 = vector.extract_strided_slice %63 {offsets = [56, 0], sizes = [8, 64], strides = [1, 1]} : vector<72x64xf32> to vector<8x64xf32>
    %c0_82 = arith.constant 0 : index
    %c448_83 = arith.constant 448 : index
    %79 = vector.load %arg11[%c0_82, %c448_83] : memref<8x576xf32, #tpu.memory_space<vmem>>, vector<8x64xf32>
    tpu.vector_store %arg11[%c0_82, %c448_83], %78 {strides = array<i32>} : memref<8x576xf32, #tpu.memory_space<vmem>>, vector<8x64xf32>,
    %80 = vector.extract_strided_slice %63 {offsets = [64, 0], sizes = [8, 64], strides = [1, 1]} : vector<72x64xf32> to vector<8x64xf32>
    %c0_84 = arith.constant 0 : index
    %c512_85 = arith.constant 512 : index
    %81 = vector.load %arg11[%c0_84, %c512_85] : memref<8x576xf32, #tpu.memory_space<vmem>>, vector<8x64xf32>
    tpu.vector_store %arg11[%c0_84, %c512_85], %80 {strides = array<i32>} : memref<8x576xf32, #tpu.memory_space<vmem>>, vector<8x64xf32>,
    %c0_86 = arith.constant 0 : index
    %c0_87 = arith.constant 0 : index
    %82 = vector.load %arg11[%c0_86, %c0_87] : memref<8x576xf32, #tpu.memory_space<vmem>>, vector<8x576xf32>
    %c0_88 = arith.constant 0 : index
    %c0_89 = arith.constant 0 : index
    %83 = vector.load %arg4[%c0_88, %c0_89] : memref<576x64xf32, #tpu.memory_space<vmem>>, vector<576x64xf32>
    %cst_90 = arith.constant dense<0.000000e+00> : vector<8x64xf32>
    %84 = tpu.matmul %82, %83, %cst_90 {dimension_numbers = #tpu.dot_dimension_numbers<[1], [0], [0], [1], [0, 0, 1, 1], [], []>} : vector<8x576xf32>, vector<576x64xf32>, vector<8x64xf32> -> vector<8x64xf32>
    %c0_91 = arith.constant 0 : index
    %c0_92 = arith.constant 0 : index
    %85 = vector.load %arg5[%c0_91, %c0_92] : memref<1x64xf32, #tpu.memory_space<vmem>>, vector<1x64xf32>
    %86 = vector.broadcast %85 : vector<1x64xf32> to vector<8x64xf32>
    %87 = arith.addf %84, %86 : vector<8x64xf32>
    %cst_93 = arith.constant 0.000000e+00 : f32
    %88 = vector.broadcast %cst_93 : f32 to vector<8x64xf32>
    %89 = arith.maximumf %87, %88 : vector<8x64xf32>
    %c0_94 = arith.constant 0 : index
    %c0_95 = arith.constant 0 : index
    %90 = vector.load %arg6[%c0_94, %c0_95] : memref<64x48xf32, #tpu.memory_space<vmem>>, vector<64x48xf32>
    %cst_96 = arith.constant dense<0.000000e+00> : vector<8x48xf32>
    %91 = tpu.matmul %89, %90, %cst_96 {dimension_numbers = #tpu.dot_dimension_numbers<[1], [0], [0], [1], [0, 0, 1, 1], [], []>} : vector<8x64xf32>, vector<64x48xf32>, vector<8x48xf32> -> vector<8x48xf32>
    %c0_97 = arith.constant 0 : index
    %c0_98 = arith.constant 0 : index
    %92 = vector.load %arg7[%c0_97, %c0_98] : memref<1x48xf32, #tpu.memory_space<vmem>>, vector<1x48xf32>
    %93 = vector.broadcast %92 : vector<1x48xf32> to vector<8x48xf32>
    %94 = arith.addf %91, %93 : vector<8x48xf32>
    %95 = vector.extract_strided_slice %94 {offsets = [0, 0], sizes = [8, 8], strides = [1, 1]} : vector<8x48xf32> to vector<8x8xf32>
    %96 = vector.extract_strided_slice %94 {offsets = [0, 8], sizes = [8, 8], strides = [1, 1]} : vector<8x48xf32> to vector<8x8xf32>
    %97 = vector.extract_strided_slice %94 {offsets = [0, 16], sizes = [8, 8], strides = [1, 1]} : vector<8x48xf32> to vector<8x8xf32>
    %98 = vector.extract_strided_slice %94 {offsets = [0, 24], sizes = [8, 8], strides = [1, 1]} : vector<8x48xf32> to vector<8x8xf32>
    %99 = vector.extract_strided_slice %94 {offsets = [0, 32], sizes = [8, 8], strides = [1, 1]} : vector<8x48xf32> to vector<8x8xf32>
    %100 = vector.extract_strided_slice %94 {offsets = [0, 40], sizes = [8, 8], strides = [1, 1]} : vector<8x48xf32> to vector<8x8xf32>
    %101 = arith.addf %96, %97 : vector<8x8xf32>
    %102 = arith.addf %101, %98 : vector<8x8xf32>
    %103 = arith.addf %102, %99 : vector<8x8xf32>
    %104 = arith.addf %103, %100 : vector<8x8xf32>
    %cst_99 = arith.constant 2.000000e-01 : f32
    %105 = vector.broadcast %cst_99 : f32 to vector<8x8xf32>
    %106 = arith.mulf %104, %105 : vector<8x8xf32>
    %107 = arith.addf %95, %96 : vector<8x8xf32>
    %108 = arith.subf %107, %106 : vector<8x8xf32>
    %cst_100 = arith.constant dense<0xFF800000> : vector<8xf32>
    %109 = vector.multi_reduction <maximumf>, %108, %cst_100 [1] : vector<8x8xf32> to vector<8xf32>
    %110 = vector.shape_cast %109 : vector<8xf32> to vector<8x1xf32>
    %111 = vector.broadcast %110 : vector<8x1xf32> to vector<8x8xf32>
    %112 = arith.subf %108, %111 : vector<8x8xf32>
    %113 = math.exp %112 : vector<8x8xf32>
    %cst_101 = arith.constant dense<0.000000e+00> : vector<8xf32>
    %114 = vector.multi_reduction <add>, %113, %cst_101 [1] : vector<8x8xf32> to vector<8xf32>
    %115 = vector.shape_cast %114 : vector<8xf32> to vector<8x1xf32>
    %116 = vector.broadcast %115 : vector<8x1xf32> to vector<8x8xf32>
    %117 = arith.divf %113, %116 : vector<8x8xf32>
    %118 = arith.addf %95, %97 : vector<8x8xf32>
    %119 = arith.subf %118, %106 : vector<8x8xf32>
    %cst_102 = arith.constant dense<0xFF800000> : vector<8xf32>
    %120 = vector.multi_reduction <maximumf>, %119, %cst_102 [1] : vector<8x8xf32> to vector<8xf32>
    %121 = vector.shape_cast %120 : vector<8xf32> to vector<8x1xf32>
    %122 = vector.broadcast %121 : vector<8x1xf32> to vector<8x8xf32>
    %123 = arith.subf %119, %122 : vector<8x8xf32>
    %124 = math.exp %123 : vector<8x8xf32>
    %cst_103 = arith.constant dense<0.000000e+00> : vector<8xf32>
    %125 = vector.multi_reduction <add>, %124, %cst_103 [1] : vector<8x8xf32> to vector<8xf32>
    %126 = vector.shape_cast %125 : vector<8xf32> to vector<8x1xf32>
    %127 = vector.broadcast %126 : vector<8x1xf32> to vector<8x8xf32>
    %128 = arith.divf %124, %127 : vector<8x8xf32>
    %129 = arith.addf %95, %98 : vector<8x8xf32>
    %130 = arith.subf %129, %106 : vector<8x8xf32>
    %cst_104 = arith.constant dense<0xFF800000> : vector<8xf32>
    %131 = vector.multi_reduction <maximumf>, %130, %cst_104 [1] : vector<8x8xf32> to vector<8xf32>
    %132 = vector.shape_cast %131 : vector<8xf32> to vector<8x1xf32>
    %133 = vector.broadcast %132 : vector<8x1xf32> to vector<8x8xf32>
    %134 = arith.subf %130, %133 : vector<8x8xf32>
    %135 = math.exp %134 : vector<8x8xf32>
    %cst_105 = arith.constant dense<0.000000e+00> : vector<8xf32>
    %136 = vector.multi_reduction <add>, %135, %cst_105 [1] : vector<8x8xf32> to vector<8xf32>
    %137 = vector.shape_cast %136 : vector<8xf32> to vector<8x1xf32>
    %138 = vector.broadcast %137 : vector<8x1xf32> to vector<8x8xf32>
    %139 = arith.divf %135, %138 : vector<8x8xf32>
    %140 = arith.addf %95, %99 : vector<8x8xf32>
    %141 = arith.subf %140, %106 : vector<8x8xf32>
    %cst_106 = arith.constant dense<0xFF800000> : vector<8xf32>
    %142 = vector.multi_reduction <maximumf>, %141, %cst_106 [1] : vector<8x8xf32> to vector<8xf32>
    %143 = vector.shape_cast %142 : vector<8xf32> to vector<8x1xf32>
    %144 = vector.broadcast %143 : vector<8x1xf32> to vector<8x8xf32>
    %145 = arith.subf %141, %144 : vector<8x8xf32>
    %146 = math.exp %145 : vector<8x8xf32>
    %cst_107 = arith.constant dense<0.000000e+00> : vector<8xf32>
    %147 = vector.multi_reduction <add>, %146, %cst_107 [1] : vector<8x8xf32> to vector<8xf32>
    %148 = vector.shape_cast %147 : vector<8xf32> to vector<8x1xf32>
    %149 = vector.broadcast %148 : vector<8x1xf32> to vector<8x8xf32>
    %150 = arith.divf %146, %149 : vector<8x8xf32>
    %151 = arith.addf %95, %100 : vector<8x8xf32>
    %152 = arith.subf %151, %106 : vector<8x8xf32>
    %cst_108 = arith.constant dense<0xFF800000> : vector<8xf32>
    %153 = vector.multi_reduction <maximumf>, %152, %cst_108 [1] : vector<8x8xf32> to vector<8xf32>
    %154 = vector.shape_cast %153 : vector<8xf32> to vector<8x1xf32>
    %155 = vector.broadcast %154 : vector<8x1xf32> to vector<8x8xf32>
    %156 = arith.subf %152, %155 : vector<8x8xf32>
    %157 = math.exp %156 : vector<8x8xf32>
    %cst_109 = arith.constant dense<0.000000e+00> : vector<8xf32>
    %158 = vector.multi_reduction <add>, %157, %cst_109 [1] : vector<8x8xf32> to vector<8xf32>
    %159 = vector.shape_cast %158 : vector<8xf32> to vector<8x1xf32>
    %160 = vector.broadcast %159 : vector<8x1xf32> to vector<8x8xf32>
    %161 = arith.divf %157, %160 : vector<8x8xf32>
    %162 = tpu.concatenate %117, %128, %139, %150, %161 in 1 : vector<8x8xf32>, vector<8x8xf32>, vector<8x8xf32>, vector<8x8xf32>, vector<8x8xf32> -> vector<8x40xf32>
    %c0_110 = arith.constant 0 : index
    %c0_111 = arith.constant 0 : index
    %163 = vector.load %arg8[%c0_110, %c0_111] : memref<8x40xf32, #tpu.memory_space<vmem>>, vector<8x40xf32>
    tpu.vector_store %arg8[%c0_110, %c0_111], %162 {strides = array<i32>} : memref<8x40xf32, #tpu.memory_space<vmem>>, vector<8x40xf32>,
    return
  }
}

</mosaic_0001>

<bundles_post_ra>
// kernel: dqn_forward.1
= control target key start
LH: loop header
LB: loop body
LE: loop exit
PB: predicated region body
PF: predicated region fallthrough
CT: control target
= control target key end

     0   :  { %v6651_v0 = vmov 0.0|0.0   ;;  %vm6652_vm0 = vmmov 0   ;;  %v6653_v6 = vmov 0.0   ;;  %vm943_vm1 = vcmask 1044480   ;;  %s6654_s29 = smov 96   ;;  %s6655_s21 = smov 32   ;;  %s9403_s1 = inlined_call_operand.vmem [shape: f32[101,32], index: 1, kind: input, shape index: {}]   ;;  %s9404_s0 = inlined_call_operand.vmem [shape: f32[1800,101], index: 0, kind: input, shape index: {}]   ;;  %s9405_s2 = inlined_call_operand.vmem [shape: f32[800,64], index: 2, kind: input, shape index: {}]   ;;  %s9406_s4 = inlined_call_operand.vmem [shape: f32[576,64], index: 4, kind: input, shape index: {}]   ;;  %s9407_s3 = inlined_call_operand.vmem [shape: f32[1,64], index: 3, kind: input, shape index: {}]   ;;  %s9408_s6 = inlined_call_operand.vmem [shape: f32[64,48], index: 6, kind: input, shape index: {}]   ;;  %s9409_s5 = inlined_call_operand.vmem [shape: f32[1,64], index: 5, kind: input, shape index: {}]   ;;  %s9410_s7 = inlined_call_operand.vmem [shape: f32[1,48], index: 7, kind: input, shape index: {}]   ;;  %s9411_s8 = inlined_call_operand.vmem [shape: f32[8,40], index: 8, kind: output, shape index: {}]  }
   0x1   :  { %6396 = vmatprep.subr.bf16.mxu0 %v6651_v0  ;;  %v254_v1 = vld [vmem:[%s9403_s1] sm:$0xff]  ;;  %v255_v2 = vld [vmem:[%s9403_s1 + $0x8] sm:$0xff]  ;;  %6604 = vmatprep.subr.bf16.mxu1 %v6651_v0  ;;  %v256_v3 = vld [vmem:[%s9403_s1 + $0x10] sm:$0xff]  ;;  %vm267_vm2 = vcmask 826368   ;;  %vm2362_vm3 = vcmask 261120   ;;  %s6656_s15 = smov 64  }
   0x2   :  { %v6397_v4 = vpack.c.bf16 %v255_v2, %v254_v1  ;;  %v257_v5 = vld [vmem:[%s9403_s1 + $0x18] sm:$0xff]  ;;  %5648 = vmatprep.mubr.msk.f32.mxu0 %vm6652_vm0, %v6653_v6  ;;  %6065 = vmatprep.mubr.msk.f32.mxu1 %vm6652_vm0, %v6653_v6  ;;  %v258_v8 = vld [vmem:[%s9403_s1 + $0x20] sm:$0xff]  ;;  %v259_v9 = vld [vmem:[%s9403_s1 + $0x28] sm:$0xff]  ;;  %vm2651_vm4 = vcmask 523520   ;;  %vm2706_vm5 = vcmask 785920   ;;  %vm2761_vm6 = vcmask 1048320  }
   0x3   :  { %v6400_v7 = vpack.c.bf16 %v257_v5, %v256_v3  ;;  %v6403_v10 = vpack.c.bf16 %v259_v9, %v258_v8  ;;  %v260_v11 = vld [vmem:[%s9403_s1 + $0x30] sm:$0xff]  ;;  %v261_v12 = vld [vmem:[%s9403_s1 + $0x38] sm:$0xff]  ;;  %v262_v14 = vld [vmem:[%s9403_s1 + $0x40] sm:$0xff]  ;;  %vm4335_vm7 = vcmask 523264   ;;  %vm4341_vm8 = vcmask 1048064   ;;  %s6659_s19 = smov 104  }
   0x4   :  { %6398 = vmatpush3.bf16.msra.mxu0 %v6397_v4  ;;  %6611 = vmatpush3.bf16.msra.mxu1 %v6397_v4  ;;  %v6406_v13 = vpack.c.bf16 %v261_v12, %v260_v11  ;;  %v263_v15 = vld [vmem:[%s9403_s1 + $0x48] sm:$0xff]  ;;  %v264_v17 = vld [vmem:[%s9403_s1 + $0x50] sm:$0xff]  ;;  %v265_v18 = vld [vmem:[%s9403_s1 + $0x58] sm:$0xff]  ;;  %s6660_s20 = smov 88   ;;  %vm4771_vm9 = vcmask 64512   ;;  %s6663_s22 = smov 24  }
   0x5   :  { %6399 = vmatprep.subr.bf16.mxu0 %v6651_v0  ;;  %6605 = vmatprep.subr.bf16.mxu1 %v6651_v0  ;;  %v6409_v16 = vpack.c.bf16 %v263_v15, %v262_v14  ;;  %v6412_v19 = vpack.c.bf16 %v265_v18, %v264_v17  ;;  %v266_v20 = vld [vmem:[%s9403_s1 + $0x60] sm:$0x1f]  ;;  %v168_v22 = vld [vmem:[%s9404_s0 + $0x458] sm:$0xff]  ;;  %v30_v23 = vld [vmem:[%s9404_s0 + $0x8] sm:$0xff]  ;;  %vm4855_vm10 = vcmask 130048   ;;  %vm4857_vm11 = vcmask 195584  }
   0x6   :  { %v29_v21 = vld [vmem:[%s9404_s0] sm:$0xff]  ;;  %v31_v25 = vld [vmem:[%s9404_s0 + $0x10] sm:$0xff]  ;;  %v170_v26 = vld [vmem:[%s9404_s0 + $0x468] sm:$0xff]  ;;  %vm4860_vm12 = vcmask 326656  }
   0x7   :  { %v169_v24 = vld [vmem:[%s9404_s0 + $0x460] sm:$0xff]  ;;  %v32_v27 = vld [vmem:[%s9404_s0 + $0x18] sm:$0xff]  ;;  %v171_v28 = vld [vmem:[%s9404_s0 + $0x470] sm:$0xff] }
   0x8   :  { %6401 = vmatpush3.bf16.msra.mxu0 %v6400_v7  ;;  %6612 = vmatpush3.bf16.msra.mxu1 %v6400_v7  ;;  %v33_v29 = vld [vmem:[%s9404_s0 + $0x20] sm:$0xff]  ;;  %v172_v30 = vld [vmem:[%s9404_s0 + $0x478] sm:$0xff]  ;;  %v34_v31 = vld [vmem:[%s9404_s0 + $0x28] sm:$0xff] }
   0x9   :  { %6402 = vmatprep.subr.bf16.mxu0 %v6651_v0  ;;  %6606 = vmatprep.subr.bf16.mxu1 %v6651_v0  ;;  %v173_v32 = vld [vmem:[%s9404_s0 + $0x480] sm:$0xff]  ;;  %v35_v33 = vld [vmem:[%s9404_s0 + $0x30] sm:$0xff]  ;;  %v174_v34 = vld [vmem:[%s9404_s0 + $0x488] sm:$0xff] }
   0xa   :  { %v36_v35 = vld [vmem:[%s9404_s0 + $0x38] sm:$0xff]  ;;  %v175_v36 = vld [vmem:[%s9404_s0 + $0x490] sm:$0xff]  ;;  %v37_v37 = vld [vmem:[%s9404_s0 + $0x40] sm:$0xff] }
   0xb   :  { %v176_v38 = vld [vmem:[%s9404_s0 + $0x498] sm:$0xff]  ;;  %v38_v39 = vld [vmem:[%s9404_s0 + $0x48] sm:$0xff]  ;;  %v177_v40 = vld [vmem:[%s9404_s0 + $0x4a0] sm:$0xff] }
   0xc   :  { %6404 = vmatpush3.bf16.msra.mxu0 %v6403_v10  ;;  %6613 = vmatpush3.bf16.msra.mxu1 %v6403_v10  ;;  %v39_v41 = vld [vmem:[%s9404_s0 + $0x50] sm:$0xff]  ;;  %v178_v42 = vld [vmem:[%s9404_s0 + $0x4a8] sm:$0xff]  ;;  %v40_v43 = vld [vmem:[%s9404_s0 + $0x58] sm:$0xff] }
   0xd   :  { %6405 = vmatprep.subr.bf16.mxu0 %v6651_v0  ;;  %6607 = vmatprep.subr.bf16.mxu1 %v6651_v0  ;;  %v179_v44 = vld [vmem:[%s9404_s0 + $0x4b0] sm:$0xff]  ;;  %v41_v45 = vld [vmem:[%s9404_s0 + $0x60] sm:$0xff]  ;;  %v180_v46 = vld [vmem:[%s9404_s0 + $0x4b8] sm:$0xff] }
   0xe   :  { %v42_v47 = vld [vmem:[%s9404_s0 + $0x68] sm:$0xff]  ;;  %v181_v48 = vld [vmem:[%s9404_s0 + $0x4c0] sm:$0xff]  ;;  %v43_v49 = vld [vmem:[%s9404_s0 + $0x70] sm:$0xff] }
   0xf   :  { %v182_v50 = vld [vmem:[%s9404_s0 + $0x4c8] sm:$0xff]  ;;  %v44_v51 = vld [vmem:[%s9404_s0 + $0x78] sm:$0xff]  ;;  %v183_v52 = vld [vmem:[%s9404_s0 + $0x4d0] sm:$0xff] }
  0x10   :  { %6407 = vmatpush3.bf16.msra.mxu0 %v6406_v13  ;;  %6614 = vmatpush3.bf16.msra.mxu1 %v6406_v13  ;;  %v45_v53 = vld [vmem:[%s9404_s0 + $0x80] sm:$0xff]  ;;  %v184_v54 = vld [vmem:[%s9404_s0 + $0x4d8] sm:$0xff]  ;;  %v46_v55 = vld [vmem:[%s9404_s0 + $0x88] sm:$0xff] }
  0x11   :  { %6408 = vmatprep.subr.bf16.mxu0 %v6651_v0  ;;  %6608 = vmatprep.subr.bf16.mxu1 %v6651_v0  ;;  %v185_v56 = vld [vmem:[%s9404_s0 + $0x4e0] sm:$0xff]  ;;  %v47_v57 = vld [vmem:[%s9404_s0 + $0x90] sm:$0xff]  ;;  %v186_v58 = vld [vmem:[%s9404_s0 + $0x4e8] sm:$0xff] }
  0x12   :  { %v48_v59 = vld [vmem:[%s9404_s0 + $0x98] sm:$0xff]  ;;  %v187_v60 = vld [vmem:[%s9404_s0 + $0x4f0] sm:$0xff]  ;;  %v49_v61 = vld [vmem:[%s9404_s0 + $0xa0] sm:$0xff] }
  0x13   :  { %v188_v62 = vld [vmem:[%s9404_s0 + $0x4f8] sm:$0xff]  ;;  %v50_v63 = vld [vmem:[%s9404_s0 + $0xa8] sm:$0xff]  ;;  %v189_v1 = vld [vmem:[%s9404_s0 + $0x500] sm:$0xff] }
  0x14   :  { %6410 = vmatpush3.bf16.msra.mxu0 %v6409_v16  ;;  %6615 = vmatpush3.bf16.msra.mxu1 %v6409_v16  ;;  %v51_v2 = vld [vmem:[%s9404_s0 + $0xb0] sm:$0xff]  ;;  %v190_v3 = vld [vmem:[%s9404_s0 + $0x508] sm:$0xff]  ;;  %v52_v4 = vld [vmem:[%s9404_s0 + $0xb8] sm:$0xff] }
  0x15   :  { %6411 = vmatprep.subr.bf16.mxu0 %v6651_v0  ;;  %6609 = vmatprep.subr.bf16.mxu1 %v6651_v0  ;;  %v191_v5 = vld [vmem:[%s9404_s0 + $0x510] sm:$0xff]  ;;  %v53_v7 = vld [vmem:[%s9404_s0 + $0xc0] sm:$0xff]  ;;  %v192_v8 = vld [vmem:[%s9404_s0 + $0x518] sm:$0xff] }
  0x16   :  { %v54_v9 = vld [vmem:[%s9404_s0 + $0xc8] sm:$0xff]  ;;  %v193_v10 = vld [vmem:[%s9404_s0 + $0x520] sm:$0xff]  ;;  %v55_v11 = vld [vmem:[%s9404_s0 + $0xd0] sm:$0xff] }
  0x17   :  { %v194_v12 = vld [vmem:[%s9404_s0 + $0x528] sm:$0xff]  ;;  %v56_v13 = vld [vmem:[%s9404_s0 + $0xd8] sm:$0xff]  ;;  %v195_v14 = vld [vmem:[%s9404_s0 + $0x530] sm:$0xff] }
  0x18   :  { %6413 = vmatpush3.bf16.msra.mxu0 %v6412_v19  ;;  %6616 = vmatpush3.bf16.msra.mxu1 %v6412_v19  ;;  %v57_v15 = vld [vmem:[%s9404_s0 + $0xe0] sm:$0xff]  ;;  %v196_v16 = vld [vmem:[%s9404_s0 + $0x538] sm:$0xff]  ;;  %v58_v17 = vld [vmem:[%s9404_s0 + $0xe8] sm:$0xff] }
  0x19   :  { %5646 = vmatprep.subr.mxu0 %v6653_v6  ;;  %6610 = vmatprep.subr.mxu1 %v6653_v6  ;;  %v197_v18 = vld [vmem:[%s9404_s0 + $0x540] sm:$0xff]  ;;  %v59_v19 = vld [vmem:[%s9404_s0 + $0xf0] sm:$0xff] }
  0x1c   :  { %5647 = vmatpush3.msk.msra.mxu0 %vm943_vm1, %v266_v20  ;;  %6617 = vmatpush3.msk.msra.mxu1 %vm943_vm1, %v266_v20  ;;  %v198_v20 = vld [vmem:[%s9404_s0 + $0x548] sm:$0xff] }
  0x1d   :  { %5649 = vmatmul.mubr.msk.f32.vlgmr.msra.gmra.mrb[0].mxu0 %vm267_vm2, %v29_v21  ;;  %6066 = vmatmul.mubr.msk.f32.vlgmr.msra.gmra.mrb[0].mxu1 %vm267_vm2, %v168_v22  ;;  %v60_v21 = vld [vmem:[%s9404_s0 + $0xf8] sm:$0xff]  ;;  %v199_v22 = vld [vmem:[%s9404_s0 + $0x550] sm:$0xff] }
  0x1e   :  { %5651 = vmatprep.mubr.msk.f32.mxu0 %vm6652_vm0, %v6653_v6  ;;  %6068 = vmatprep.mubr.msk.f32.mxu1 %vm6652_vm0, %v6653_v6 }
  0x21   :  { %5652 = vmatmul.mubr.msk.f32.gmra.mrb[2].mxu0 %vm267_vm2, %v30_v23  ;;  %6069 = vmatmul.mubr.msk.f32.gmra.mrb[2].mxu1 %vm267_vm2, %v169_v24  ;;  %v61_v23 = vld [vmem:[%s9404_s0 + $0x100] sm:$0xff]  ;;  %v200_v24 = vld [vmem:[%s9404_s0 + $0x558] sm:$0xff] }
  0x22   :  { %5654 = vmatprep.mubr.msk.f32.mxu0 %vm6652_vm0, %v6653_v6  ;;  %6071 = vmatprep.mubr.msk.f32.mxu1 %vm6652_vm0, %v6653_v6 }
  0x25   :  { %5655 = vmatmul.mubr.msk.f32.gmra.mrb[4].mxu0 %vm267_vm2, %v31_v25  ;;  %6072 = vmatmul.mubr.msk.f32.gmra.mrb[4].mxu1 %vm267_vm2, %v170_v26  ;;  %v62_v25 = vld [vmem:[%s9404_s0 + $0x108] sm:$0xff]  ;;  %v201_v26 = vld [vmem:[%s9404_s0 + $0x560] sm:$0xff] }
  0x26   :  { %5657 = vmatprep.mubr.msk.f32.mxu0 %vm6652_vm0, %v6653_v6  ;;  %6074 = vmatprep.mubr.msk.f32.mxu1 %vm6652_vm0, %v6653_v6 }
  0x29   :  { %5658 = vmatmul.mubr.msk.f32.gmra.mrb[6].mxu0 %vm267_vm2, %v32_v27  ;;  %6075 = vmatmul.mubr.msk.f32.gmra.mrb[6].mxu1 %vm267_vm2, %v171_v28  ;;  %v63_v27 = vld [vmem:[%s9404_s0 + $0x110] sm:$0xff]  ;;  %v202_v28 = vld [vmem:[%s9404_s0 + $0x568] sm:$0xff] }
  0x2a   :  { %5660 = vmatprep.mubr.msk.f32.mxu0 %vm6652_vm0, %v6653_v6  ;;  %6077 = vmatprep.mubr.msk.f32.mxu1 %vm6652_vm0, %v6653_v6 }
  0x2d   :  { %5661 = vmatmul.mubr.msk.f32.gmra.mrb[8].mxu0 %vm267_vm2, %v33_v29  ;;  %6078 = vmatmul.mubr.msk.f32.gmra.mrb[8].mxu1 %vm267_vm2, %v172_v30  ;;  %v64_v29 = vld [vmem:[%s9404_s0 + $0x118] sm:$0xff]  ;;  %v203_v30 = vld [vmem:[%s9404_s0 + $0x570] sm:$0xff] }
  0x2e   :  { %5663 = vmatprep.mubr.msk.f32.mxu0 %vm6652_vm0, %v6653_v6  ;;  %6080 = vmatprep.mubr.msk.f32.mxu1 %vm6652_vm0, %v6653_v6 }
  0x31   :  { %5664 = vmatmul.mubr.msk.f32.gmra.mrb[10].mxu0 %vm267_vm2, %v34_v31  ;;  %6081 = vmatmul.mubr.msk.f32.gmra.mrb[10].mxu1 %vm267_vm2, %v173_v32  ;;  %v65_v31 = vld [vmem:[%s9404_s0 + $0x120] sm:$0xff]  ;;  %v204_v32 = vld [vmem:[%s9404_s0 + $0x578] sm:$0xff] }
  0x32   :  { %5666 = vmatprep.mubr.msk.f32.mxu0 %vm6652_vm0, %v6653_v6  ;;  %6083 = vmatprep.mubr.msk.f32.mxu1 %vm6652_vm0, %v6653_v6 }
  0x35   :  { %5667 = vmatmul.mubr.msk.f32.gmra.mrb[12].mxu0 %vm267_vm2, %v35_v33  ;;  %6084 = vmatmul.mubr.msk.f32.gmra.mrb[12].mxu1 %vm267_vm2, %v174_v34  ;;  %v66_v33 = vld [vmem:[%s9404_s0 + $0x128] sm:$0xff]  ;;  %v205_v34 = vld [vmem:[%s9404_s0 + $0x580] sm:$0xff] }
  0x36   :  { %5669 = vmatprep.mubr.msk.f32.mxu0 %vm6652_vm0, %v6653_v6  ;;  %6086 = vmatprep.mubr.msk.f32.mxu1 %vm6652_vm0, %v6653_v6 }
  0x39   :  { %5670 = vmatmul.mubr.msk.f32.gmra.mrb[14].mxu0 %vm267_vm2, %v36_v35  ;;  %6087 = vmatmul.mubr.msk.f32.gmra.mrb[14].mxu1 %vm267_vm2, %v175_v36  ;;  %v67_v35 = vld [vmem:[%s9404_s0 + $0x130] sm:$0xff]  ;;  %v206_v36 = vld [vmem:[%s9404_s0 + $0x588] sm:$0xff] }
  0x3a   :  { %5672 = vmatprep.mubr.msk.f32.mxu0 %vm6652_vm0, %v6653_v6  ;;  %6089 = vmatprep.mubr.msk.f32.mxu1 %vm6652_vm0, %v6653_v6 }
  0x3d   :  { %5673 = vmatmul.mubr.msk.f32.gmra.mrb[16].mxu0 %vm267_vm2, %v37_v37  ;;  %6090 = vmatmul.mubr.msk.f32.gmra.mrb[16].mxu1 %vm267_vm2, %v176_v38  ;;  %v68_v37 = vld [vmem:[%s9404_s0 + $0x138] sm:$0xff]  ;;  %v207_v38 = vld [vmem:[%s9404_s0 + $0x590] sm:$0xff] }
  0x3e   :  { %5675 = vmatprep.mubr.msk.f32.mxu0 %vm6652_vm0, %v6653_v6  ;;  %6092 = vmatprep.mubr.msk.f32.mxu1 %vm6652_vm0, %v6653_v6 }
  0x41   :  { %5676 = vmatmul.mubr.msk.f32.gmra.mrb[18].mxu0 %vm267_vm2, %v38_v39  ;;  %6093 = vmatmul.mubr.msk.f32.gmra.mrb[18].mxu1 %vm267_vm2, %v177_v40  ;;  %v69_v39 = vld [vmem:[%s9404_s0 + $0x140] sm:$0xff]  ;;  %v208_v40 = vld [vmem:[%s9404_s0 + $0x598] sm:$0xff] }
  0x42   :  { %5678 = vmatprep.mubr.msk.f32.mxu0 %vm6652_vm0, %v6653_v6  ;;  %6095 = vmatprep.mubr.msk.f32.mxu1 %vm6652_vm0, %v6653_v6 }
  0x45   :  { %5679 = vmatmul.mubr.msk.f32.gmra.mrb[20].mxu0 %vm267_vm2, %v39_v41  ;;  %6096 = vmatmul.mubr.msk.f32.gmra.mrb[20].mxu1 %vm267_vm2, %v178_v42  ;;  %v70_v41 = vld [vmem:[%s9404_s0 + $0x148] sm:$0xff]  ;;  %v209_v42 = vld [vmem:[%s9404_s0 + $0x5a0] sm:$0xff] }
  0x46   :  { %5681 = vmatprep.mubr.msk.f32.mxu0 %vm6652_vm0, %v6653_v6  ;;  %6098 = vmatprep.mubr.msk.f32.mxu1 %vm6652_vm0, %v6653_v6 }
  0x49   :  { %5682 = vmatmul.mubr.msk.f32.gmra.mrb[22].mxu0 %vm267_vm2, %v40_v43  ;;  %6099 = vmatmul.mubr.msk.f32.gmra.mrb[22].mxu1 %vm267_vm2, %v179_v44  ;;  %v71_v43 = vld [vmem:[%s9404_s0 + $0x150] sm:$0xff]  ;;  %v210_v44 = vld [vmem:[%s9404_s0 + $0x5a8] sm:$0xff] }
  0x4a   :  { %5684 = vmatprep.mubr.msk.f32.mxu0 %vm6652_vm0, %v6653_v6  ;;  %6101 = vmatprep.mubr.msk.f32.mxu1 %vm6652_vm0, %v6653_v6 }
  0x4d   :  { %5685 = vmatmul.mubr.msk.f32.gmra.mrb[24].mxu0 %vm267_vm2, %v41_v45  ;;  %6102 = vmatmul.mubr.msk.f32.gmra.mrb[24].mxu1 %vm267_vm2, %v180_v46  ;;  %v72_v45 = vld [vmem:[%s9404_s0 + $0x158] sm:$0xff]  ;;  %v211_v46 = vld [vmem:[%s9404_s0 + $0x5b0] sm:$0xff] }
  0x4e   :  { %5687 = vmatprep.mubr.msk.f32.mxu0 %vm6652_vm0, %v6653_v6  ;;  %6104 = vmatprep.mubr.msk.f32.mxu1 %vm6652_vm0, %v6653_v6 }
  0x51   :  { %5688 = vmatmul.mubr.msk.f32.gmra.mrb[26].mxu0 %vm267_vm2, %v42_v47  ;;  %6105 = vmatmul.mubr.msk.f32.gmra.mrb[26].mxu1 %vm267_vm2, %v181_v48  ;;  %v73_v47 = vld [vmem:[%s9404_s0 + $0x160] sm:$0xff]  ;;  %v212_v48 = vld [vmem:[%s9404_s0 + $0x5b8] sm:$0xff] }
  0x52   :  { %5690 = vmatprep.mubr.msk.f32.mxu0 %vm6652_vm0, %v6653_v6  ;;  %6107 = vmatprep.mubr.msk.f32.mxu1 %vm6652_vm0, %v6653_v6 }
  0x55   :  { %5691 = vmatmul.mubr.msk.f32.gmra.mrb[28].mxu0 %vm267_vm2, %v43_v49  ;;  %6108 = vmatmul.mubr.msk.f32.gmra.mrb[28].mxu1 %vm267_vm2, %v182_v50  ;;  %v74_v49 = vld [vmem:[%s9404_s0 + $0x168] sm:$0xff]  ;;  %v213_v50 = vld [vmem:[%s9404_s0 + $0x5c0] sm:$0xff] }
  0x56   :  { %5693 = vmatprep.mubr.msk.f32.mxu0 %vm6652_vm0, %v6653_v6  ;;  %6110 = vmatprep.mubr.msk.f32.mxu1 %vm6652_vm0, %v6653_v6 }
  0x59   :  { %5694 = vmatmul.mubr.msk.f32.gmra.mrb[30].mxu0 %vm267_vm2, %v44_v51  ;;  %6111 = vmatmul.mubr.msk.f32.gmra.mrb[30].mxu1 %vm267_vm2, %v183_v52  ;;  %v75_v51 = vld [vmem:[%s9404_s0 + $0x170] sm:$0xff]  ;;  %v214_v52 = vld [vmem:[%s9404_s0 + $0x5c8] sm:$0xff] }
  0x5a   :  { %5696 = vmatprep.mubr.msk.f32.mxu0 %vm6652_vm0, %v6653_v6  ;;  %6113 = vmatprep.mubr.msk.f32.mxu1 %vm6652_vm0, %v6653_v6 }
  0x5d   :  { %5697 = vmatmul.mubr.msk.f32.gmra.mrb[32].mxu0 %vm267_vm2, %v45_v53  ;;  %6114 = vmatmul.mubr.msk.f32.gmra.mrb[32].mxu1 %vm267_vm2, %v184_v54  ;;  %v76_v53 = vld [vmem:[%s9404_s0 + $0x178] sm:$0xff]  ;;  %v215_v54 = vld [vmem:[%s9404_s0 + $0x5d0] sm:$0xff] }
  0x5e   :  { %5699 = vmatprep.mubr.msk.f32.mxu0 %vm6652_vm0, %v6653_v6  ;;  %6116 = vmatprep.mubr.msk.f32.mxu1 %vm6652_vm0, %v6653_v6 }
  0x61   :  { %5700 = vmatmul.mubr.msk.f32.gmra.mrb[34].mxu0 %vm267_vm2, %v46_v55  ;;  %6117 = vmatmul.mubr.msk.f32.gmra.mrb[34].mxu1 %vm267_vm2, %v185_v56  ;;  %v77_v55 = vld [vmem:[%s9404_s0 + $0x180] sm:$0xff]  ;;  %v216_v56 = vld [vmem:[%s9404_s0 + $0x5d8] sm:$0xff] }
  0x62   :  { %5702 = vmatprep.mubr.msk.f32.mxu0 %vm6652_vm0, %v6653_v6  ;;  %6119 = vmatprep.mubr.msk.f32.mxu1 %vm6652_vm0, %v6653_v6 }
  0x65   :  { %5703 = vmatmul.mubr.msk.f32.gmra.mrb[36].mxu0 %vm267_vm2, %v47_v57  ;;  %6120 = vmatmul.mubr.msk.f32.gmra.mrb[36].mxu1 %vm267_vm2, %v186_v58  ;;  %v78_v57 = vld [vmem:[%s9404_s0 + $0x188] sm:$0xff]  ;;  %v217_v58 = vld [vmem:[%s9404_s0 + $0x5e0] sm:$0xff] }
  0x66   :  { %5705 = vmatprep.mubr.msk.f32.mxu0 %vm6652_vm0, %v6653_v6  ;;  %6122 = vmatprep.mubr.msk.f32.mxu1 %vm6652_vm0, %v6653_v6 }
  0x69   :  { %5706 = vmatmul.mubr.msk.f32.gmra.mrb[38].mxu0 %vm267_vm2, %v48_v59  ;;  %6123 = vmatmul.mubr.msk.f32.gmra.mrb[38].mxu1 %vm267_vm2, %v187_v60  ;;  %v79_v59 = vld [vmem:[%s9404_s0 + $0x190] sm:$0xff]  ;;  %v218_v60 = vld [vmem:[%s9404_s0 + $0x5e8] sm:$0xff] }
  0x6a   :  { %5708 = vmatprep.mubr.msk.f32.mxu0 %vm6652_vm0, %v6653_v6  ;;  %6125 = vmatprep.mubr.msk.f32.mxu1 %vm6652_vm0, %v6653_v6 }
  0x6d   :  { %5709 = vmatmul.mubr.msk.f32.gmra.mrb[40].mxu0 %vm267_vm2, %v49_v61  ;;  %6126 = vmatmul.mubr.msk.f32.gmra.mrb[40].mxu1 %vm267_vm2, %v188_v62  ;;  %v80_v61 = vld [vmem:[%s9404_s0 + $0x198] sm:$0xff]  ;;  %v219_v62 = vld [vmem:[%s9404_s0 + $0x5f0] sm:$0xff] }
  0x6e   :  { %5711 = vmatprep.mubr.msk.f32.mxu0 %vm6652_vm0, %v6653_v6  ;;  %6128 = vmatprep.mubr.msk.f32.mxu1 %vm6652_vm0, %v6653_v6 }
  0x71   :  { %5712 = vmatmul.mubr.msk.f32.gmra.mrb[42].mxu0 %vm267_vm2, %v50_v63  ;;  %6129 = vmatmul.mubr.msk.f32.gmra.mrb[42].mxu1 %vm267_vm2, %v189_v1  ;;  %v81_v63 = vld [vmem:[%s9404_s0 + $0x1a0] sm:$0xff]  ;;  %v220_v1 = vld [vmem:[%s9404_s0 + $0x5f8] sm:$0xff] }
  0x72   :  { %5714 = vmatprep.mubr.msk.f32.mxu0 %vm6652_vm0, %v6653_v6  ;;  %6131 = vmatprep.mubr.msk.f32.mxu1 %vm6652_vm0, %v6653_v6 }
  0x75   :  { %5715 = vmatmul.mubr.msk.f32.gmra.mrb[44].mxu0 %vm267_vm2, %v51_v2  ;;  %6132 = vmatmul.mubr.msk.f32.gmra.mrb[44].mxu1 %vm267_vm2, %v190_v3  ;;  %v82_v2 = vld [vmem:[%s9404_s0 + $0x1a8] sm:$0xff]  ;;  %v221_v3 = vld [vmem:[%s9404_s0 + $0x600] sm:$0xff] }
  0x76   :  { %5717 = vmatprep.mubr.msk.f32.mxu0 %vm6652_vm0, %v6653_v6  ;;  %6134 = vmatprep.mubr.msk.f32.mxu1 %vm6652_vm0, %v6653_v6 }
  0x79   :  { %5718 = vmatmul.mubr.msk.f32.gmra.mrb[46].mxu0 %vm267_vm2, %v52_v4  ;;  %6135 = vmatmul.mubr.msk.f32.gmra.mrb[46].mxu1 %vm267_vm2, %v191_v5 }
  0x7a   :  { %5720 = vmatprep.mubr.msk.f32.mxu0 %vm6652_vm0, %v6653_v6  ;;  %6137 = vmatprep.mubr.msk.f32.mxu1 %vm6652_vm0, %v6653_v6 }
  0x7d   :  { %5721 = vmatmul.mubr.msk.f32.gmra.mrb[48].mxu0 %vm267_vm2, %v53_v7  ;;  %6138 = vmatmul.mubr.msk.f32.gmra.mrb[48].mxu1 %vm267_vm2, %v192_v8 }
  0x7e   :  { %5723 = vmatprep.mubr.msk.f32.mxu0 %vm6652_vm0, %v6653_v6  ;;  %6140 = vmatprep.mubr.msk.f32.mxu1 %vm6652_vm0, %v6653_v6 }
  0x81   :  { %5724 = vmatmul.mubr.msk.f32.gmra.mrb[50].mxu0 %vm267_vm2, %v54_v9  ;;  %6141 = vmatmul.mubr.msk.f32.gmra.mrb[50].mxu1 %vm267_vm2, %v193_v10 }
  0x82   :  { %5726 = vmatprep.mubr.msk.f32.mxu0 %vm6652_vm0, %v6653_v6  ;;  %6143 = vmatprep.mubr.msk.f32.mxu1 %vm6652_vm0, %v6653_v6 }
  0x85   :  { %5727 = vmatmul.mubr.msk.f32.gmra.mrb[52].mxu0 %vm267_vm2, %v55_v11  ;;  %6144 = vmatmul.mubr.msk.f32.gmra.mrb[52].mxu1 %vm267_vm2, %v194_v12  ;;  %v83_v11 = vld [vmem:[%s9404_s0 + $0x1b0] sm:$0xff]  ;;  %v222_v12 = vld [vmem:[%s9404_s0 + $0x608] sm:$0xff] }
  0x86   :  { %5729 = vmatprep.mubr.msk.f32.mxu0 %vm6652_vm0, %v6653_v6  ;;  %6146 = vmatprep.mubr.msk.f32.mxu1 %vm6652_vm0, %v6653_v6 }
  0x89   :  { %5730 = vmatmul.mubr.msk.f32.gmra.mrb[54].mxu0 %vm267_vm2, %v56_v13  ;;  %6147 = vmatmul.mubr.msk.f32.gmra.mrb[54].mxu1 %vm267_vm2, %v195_v14 }
  0x8a   :  { %5732 = vmatprep.mubr.msk.f32.mxu0 %vm6652_vm0, %v6653_v6  ;;  %6149 = vmatprep.mubr.msk.f32.mxu1 %vm6652_vm0, %v6653_v6 }
  0x8d   :  { %5733 = vmatmul.mubr.msk.f32.gmra.mrb[56].mxu0 %vm267_vm2, %v57_v15  ;;  %6150 = vmatmul.mubr.msk.f32.gmra.mrb[56].mxu1 %vm267_vm2, %v196_v16 }
  0x8e   :  { %5735 = vmatprep.mubr.msk.f32.mxu0 %vm6652_vm0, %v6653_v6  ;;  %6152 = vmatprep.mubr.msk.f32.mxu1 %vm6652_vm0, %v6653_v6 }
  0x91   :  { %5736 = vmatmul.mubr.msk.f32.gmra.mrb[58].mxu0 %vm267_vm2, %v58_v17  ;;  %6153 = vmatmul.mubr.msk.f32.gmra.mrb[58].mxu1 %vm267_vm2, %v197_v18 }
  0x92   :  { %5738 = vmatprep.mubr.msk.f32.mxu0 %vm6652_vm0, %v6653_v6  ;;  %6155 = vmatprep.mubr.msk.f32.mxu1 %vm6652_vm0, %v6653_v6 }
  0x95   :  { %5739 = vmatmul.mubr.msk.f32.gmra.mrb[60].mxu0 %vm267_vm2, %v59_v19  ;;  %6156 = vmatmul.mubr.msk.f32.gmra.mrb[60].mxu1 %vm267_vm2, %v198_v20  ;;  %v84_v19 = vld [vmem:[%s9404_s0 + $0x1b8] sm:$0xff]  ;;  %v223_v20 = vld [vmem:[%s9404_s0 + $0x610] sm:$0xff] }
  0x96   :  { %5741 = vmatprep.mubr.msk.f32.mxu0 %vm6652_vm0, %v6653_v6  ;;  %6158 = vmatprep.mubr.msk.f32.mxu1 %vm6652_vm0, %v6653_v6 }
  0x99   :  { %5742 = vmatmul.mubr.msk.f32.gmra.mrb[62].mxu0 %vm267_vm2, %v60_v21  ;;  %6159 = vmatmul.mubr.msk.f32.gmra.mrb[62].mxu1 %vm267_vm2, %v199_v22 }
  0x9a   :  { %5744 = vmatprep.mubr.msk.f32.mxu0 %vm6652_vm0, %v6653_v6  ;;  %6161 = vmatprep.mubr.msk.f32.mxu1 %vm6652_vm0, %v6653_v6 }
  0x9d   :  { %5745 = vmatmul.mubr.msk.f32.gmra.mrb[64].mxu0 %vm267_vm2, %v61_v23  ;;  %6162 = vmatmul.mubr.msk.f32.gmra.mrb[64].mxu1 %vm267_vm2, %v200_v24 }
  0x9e   :  { %5747 = vmatprep.mubr.msk.f32.mxu0 %vm6652_vm0, %v6653_v6  ;;  %6164 = vmatprep.mubr.msk.f32.mxu1 %vm6652_vm0, %v6653_v6 }
  0xa1   :  { %5748 = vmatmul.mubr.msk.f32.gmra.mrb[66].mxu0 %vm267_vm2, %v62_v25  ;;  %6165 = vmatmul.mubr.msk.f32.gmra.mrb[66].mxu1 %vm267_vm2, %v201_v26  ;;  %v85_v25 = vld [vmem:[%s9404_s0 + $0x1c0] sm:$0xff] }
  0xa2   :  { %5750 = vmatprep.mubr.msk.f32.mxu0 %vm6652_vm0, %v6653_v6  ;;  %6167 = vmatprep.mubr.msk.f32.mxu1 %vm6652_vm0, %v6653_v6 }
  0xa5   :  { %5751 = vmatmul.mubr.msk.f32.gmra.mrb[68].mxu0 %vm267_vm2, %v63_v27  ;;  %6168 = vmatmul.mubr.msk.f32.gmra.mrb[68].mxu1 %vm267_vm2, %v202_v28 }
  0xa6   :  { %5753 = vmatprep.mubr.msk.f32.mxu0 %vm6652_vm0, %v6653_v6  ;;  %6170 = vmatprep.mubr.msk.f32.mxu1 %vm6652_vm0, %v6653_v6 }
  0xa9   :  { %5754 = vmatmul.mubr.msk.f32.gmra.mrb[70].mxu0 %vm267_vm2, %v64_v29  ;;  %6171 = vmatmul.mubr.msk.f32.gmra.mrb[70].mxu1 %vm267_vm2, %v203_v30  ;;  %v224_v29 = vld [vmem:[%s9404_s0 + $0x618] sm:$0xff] }
  0xaa   :  { %5756 = vmatprep.mubr.msk.f32.mxu0 %vm6652_vm0, %v6653_v6  ;;  %6173 = vmatprep.mubr.msk.f32.mxu1 %vm6652_vm0, %v6653_v6 }
  0xad   :  { %5757 = vmatmul.mubr.msk.f32.gmra.mrb[72].mxu0 %vm267_vm2, %v65_v31  ;;  %6174 = vmatmul.mubr.msk.f32.gmra.mrb[72].mxu1 %vm267_vm2, %v204_v32 }
  0xae   :  { %5759 = vmatprep.mubr.msk.f32.mxu0 %vm6652_vm0, %v6653_v6  ;;  %6176 = vmatprep.mubr.msk.f32.mxu1 %vm6652_vm0, %v6653_v6 }
  0xb1   :  { %5760 = vmatmul.mubr.msk.f32.gmra.mrb[74].mxu0 %vm267_vm2, %v66_v33  ;;  %6177 = vmatmul.mubr.msk.f32.gmra.mrb[74].mxu1 %vm267_vm2, %v205_v34 }
  0xb2   :  { %5762 = vmatprep.mubr.msk.f32.mxu0 %vm6652_vm0, %v6653_v6  ;;  %6179 = vmatprep.mubr.msk.f32.mxu1 %vm6652_vm0, %v6653_v6 }
  0xb5   :  { %5763 = vmatmul.mubr.msk.f32.gmra.mrb[76].mxu0 %vm267_vm2, %v67_v35  ;;  %6180 = vmatmul.mubr.msk.f32.gmra.mrb[76].mxu1 %vm267_vm2, %v206_v36  ;;  %v86_v35 = vld [vmem:[%s9404_s0 + $0x1c8] sm:$0xff] }
  0xb6   :  { %5765 = vmatprep.mubr.msk.f32.mxu0 %vm6652_vm0, %v6653_v6  ;;  %6182 = vmatprep.mubr.msk.f32.mxu1 %vm6652_vm0, %v6653_v6 }
  0xb9   :  { %5766 = vmatmul.mubr.msk.f32.gmra.mrb[78].mxu0 %vm267_vm2, %v68_v37  ;;  %6183 = vmatmul.mubr.msk.f32.gmra.mrb[78].mxu1 %vm267_vm2, %v207_v38 }
  0xba   :  { %5768 = vmatprep.mubr.msk.f32.mxu0 %vm6652_vm0, %v6653_v6  ;;  %6185 = vmatprep.mubr.msk.f32.mxu1 %vm6652_vm0, %v6653_v6 }
  0xbd   :  { %5769 = vmatmul.mubr.msk.f32.gmra.mrb[80].mxu0 %vm267_vm2, %v69_v39  ;;  %6186 = vmatmul.mubr.msk.f32.gmra.mrb[80].mxu1 %vm267_vm2, %v208_v40  ;;  %v225_v39 = vld [vmem:[%s9404_s0 + $0x620] sm:$0xff] }
  0xbe   :  { %5771 = vmatprep.mubr.msk.f32.mxu0 %vm6652_vm0, %v6653_v6  ;;  %6188 = vmatprep.mubr.msk.f32.mxu1 %vm6652_vm0, %v6653_v6 }
  0xc1   :  { %5772 = vmatmul.mubr.msk.f32.gmra.mrb[82].mxu0 %vm267_vm2, %v70_v41  ;;  %6189 = vmatmul.mubr.msk.f32.gmra.mrb[82].mxu1 %vm267_vm2, %v209_v42 }
  0xc2   :  { %5774 = vmatprep.mubr.msk.f32.mxu0 %vm6652_vm0, %v6653_v6  ;;  %6191 = vmatprep.mubr.msk.f32.mxu1 %vm6652_vm0, %v6653_v6 }
  0xc5   :  { %5775 = vmatmul.mubr.msk.f32.gmra.mrb[84].mxu0 %vm267_vm2, %v71_v43  ;;  %6192 = vmatmul.mubr.msk.f32.gmra.mrb[84].mxu1 %vm267_vm2, %v210_v44 }
  0xc6   :  { %5777 = vmatprep.mubr.msk.f32.mxu0 %vm6652_vm0, %v6653_v6  ;;  %6194 = vmatprep.mubr.msk.f32.mxu1 %vm6652_vm0, %v6653_v6 }
  0xc9   :  { %5778 = vmatmul.mubr.msk.f32.gmra.mrb[86].mxu0 %vm267_vm2, %v72_v45  ;;  %6195 = vmatmul.mubr.msk.f32.gmra.mrb[86].mxu1 %vm267_vm2, %v211_v46  ;;  %v87_v45 = vld [vmem:[%s9404_s0 + $0x1d0] sm:$0xff] }
  0xca   :  { %5780 = vmatprep.mubr.msk.f32.mxu0 %vm6652_vm0, %v6653_v6  ;;  %6197 = vmatprep.mubr.msk.f32.mxu1 %vm6652_vm0, %v6653_v6 }
  0xcd   :  { %5781 = vmatmul.mubr.msk.f32.gmra.mrb[88].mxu0 %vm267_vm2, %v73_v47  ;;  %6198 = vmatmul.mubr.msk.f32.gmra.mrb[88].mxu1 %vm267_vm2, %v212_v48 }
  0xce   :  { %5783 = vmatprep.mubr.msk.f32.mxu0 %vm6652_vm0, %v6653_v6  ;;  %6200 = vmatprep.mubr.msk.f32.mxu1 %vm6652_vm0, %v6653_v6 }
  0xd1   :  { %5784 = vmatmul.mubr.msk.f32.gmra.mrb[90].mxu0 %vm267_vm2, %v74_v49  ;;  %6201 = vmatmul.mubr.msk.f32.gmra.mrb[90].mxu1 %vm267_vm2, %v213_v50  ;;  %v226_v49 = vld [vmem:[%s9404_s0 + $0x628] sm:$0xff] }
  0xd2   :  { %5786 = vmatprep.mubr.msk.f32.mxu0 %vm6652_vm0, %v6653_v6  ;;  %6203 = vmatprep.mubr.msk.f32.mxu1 %vm6652_vm0, %v6653_v6 }
  0xd5   :  { %5787 = vmatmul.mubr.msk.f32.gmra.mrb[92].mxu0 %vm267_vm2, %v75_v51  ;;  %6204 = vmatmul.mubr.msk.f32.gmra.mrb[92].mxu1 %vm267_vm2, %v214_v52 }
  0xd6   :  { %5789 = vmatprep.mubr.msk.f32.mxu0 %vm6652_vm0, %v6653_v6  ;;  %6206 = vmatprep.mubr.msk.f32.mxu1 %vm6652_vm0, %v6653_v6 }
  0xd9   :  { %5790 = vmatmul.mubr.msk.f32.gmra.mrb[94].mxu0 %vm267_vm2, %v76_v53  ;;  %6207 = vmatmul.mubr.msk.f32.gmra.mrb[94].mxu1 %vm267_vm2, %v215_v54 }
  0xda   :  { %5792 = vmatprep.mubr.msk.f32.mxu0 %vm6652_vm0, %v6653_v6  ;;  %6209 = vmatprep.mubr.msk.f32.mxu1 %vm6652_vm0, %v6653_v6 }
  0xdd   :  { %5793 = vmatmul.mubr.msk.f32.gmra.mrb[96].mxu0 %vm267_vm2, %v77_v55  ;;  %6210 = vmatmul.mubr.msk.f32.gmra.mrb[96].mxu1 %vm267_vm2, %v216_v56  ;;  %v88_v55 = vld [vmem:[%s9404_s0 + $0x1d8] sm:$0xff] }
  0xde   :  { %5795 = vmatprep.mubr.msk.f32.mxu0 %vm6652_vm0, %v6653_v6  ;;  %6212 = vmatprep.mubr.msk.f32.mxu1 %vm6652_vm0, %v6653_v6 }
  0xe1   :  { %5796 = vmatmul.mubr.msk.f32.gmra.mrb[98].mxu0 %vm267_vm2, %v78_v57  ;;  %6213 = vmatmul.mubr.msk.f32.gmra.mrb[98].mxu1 %vm267_vm2, %v217_v58 }
  0xe2   :  { %5798 = vmatprep.mubr.msk.f32.mxu0 %vm6652_vm0, %v6653_v6  ;;  %6215 = vmatprep.mubr.msk.f32.mxu1 %vm6652_vm0, %v6653_v6 }
  0xe5   :  { %5799 = vmatmul.mubr.msk.f32.gmra.mrb[100].mxu0 %vm267_vm2, %v79_v59  ;;  %6216 = vmatmul.mubr.msk.f32.gmra.mrb[100].mxu1 %vm267_vm2, %v218_v60  ;;  %v227_v59 = vld [vmem:[%s9404_s0 + $0x630] sm:$0xff] }
  0xe6   :  { %5801 = vmatprep.mubr.msk.f32.mxu0 %vm6652_vm0, %v6653_v6  ;;  %6218 = vmatprep.mubr.msk.f32.mxu1 %vm6652_vm0, %v6653_v6 }
  0xe9   :  { %5802 = vmatmul.mubr.msk.f32.gmra.mrb[102].mxu0 %vm267_vm2, %v80_v61  ;;  %6219 = vmatmul.mubr.msk.f32.gmra.mrb[102].mxu1 %vm267_vm2, %v219_v62 }
  0xea   :  { %5804 = vmatprep.mubr.msk.f32.mxu0 %vm6652_vm0, %v6653_v6  ;;  %6221 = vmatprep.mubr.msk.f32.mxu1 %vm6652_vm0, %v6653_v6 }
  0xed   :  { %5805 = vmatmul.mubr.msk.f32.gmra.mrb[104].mxu0 %vm267_vm2, %v81_v63  ;;  %6222 = vmatmul.mubr.msk.f32.gmra.mrb[104].mxu1 %vm267_vm2, %v220_v1 }
  0xee   :  { %5807 = vmatprep.mubr.msk.f32.mxu0 %vm6652_vm0, %v6653_v6  ;;  %6224 = vmatprep.mubr.msk.f32.mxu1 %vm6652_vm0, %v6653_v6 }
  0xf0   :  { %v1013_v4 = vpop.f32.mrb[0].mxu0  ;;  %v1708_v5 = vpop.f32.mrb[0].mxu1 }
  0xf1   :  { %v2137_v7 = vmax.f32 %v1013_v4, 0.0  ;;  %v5650_v8 = vpop.f32.mrb[1].mxu0  ;;  %5808 = vmatmul.mubr.msk.f32.gmra.mrb[106].mxu0 %vm267_vm2, %v82_v2  ;;  %v2276_v9 = vmax.f32 %v1708_v5, 0.0  ;;  %6225 = vmatmul.mubr.msk.f32.gmra.mrb[106].mxu1 %vm267_vm2, %v221_v3  ;;  %v6067_v10 = vpop.f32.mrb[1].mxu1  ;;  %v89_v2 = vld [vmem:[%s9404_s0 + $0x1e0] sm:$0xff] }
  0xf2   :  { %5810 = vmatprep.mubr.msk.f32.mxu0 %vm6652_vm0, %v6653_v6  ;;  %6227 = vmatprep.mubr.msk.f32.mxu1 %vm6652_vm0, %v6653_v6 }
  0xf3   :  { %2363 = vst.msk [vmem:[#allocation2] sm:$0xff] %vm2362_vm3, %v2137_v7  ;;  %2502 = vst.msk [vmem:[#allocation2 + $0x458] sm:$0xff] %vm2362_vm3, %v2276_v9  ;;  %v228_v7 = vld [vmem:[%s9404_s0 + $0x638] sm:$0xff] }
  0xf4   :  { %v1018_v13 = vpop.f32.mrb[2].mxu0  ;;  %v1713_v14 = vpop.f32.mrb[2].mxu1 }
  0xf5   :  { %v2138_v15 = vmax.f32 %v1018_v13, 0.0  ;;  %v5653_v16 = vpop.f32.mrb[3].mxu0  ;;  %5811 = vmatmul.mubr.msk.f32.gmra.mrb[108].mxu0 %vm267_vm2, %v83_v11  ;;  %v2277_v17 = vmax.f32 %v1713_v14, 0.0  ;;  %6228 = vmatmul.mubr.msk.f32.gmra.mrb[108].mxu1 %vm267_vm2, %v222_v12  ;;  %v6070_v18 = vpop.f32.mrb[3].mxu1 }
  0xf6   :  { %5813 = vmatprep.mubr.msk.f32.mxu0 %vm6652_vm0, %v6653_v6  ;;  %6230 = vmatprep.mubr.msk.f32.mxu1 %vm6652_vm0, %v6653_v6  ;;  %v229_v16 = vld [vmem:[%s9404_s0 + $0x640] sm:$0xff] }
  0xf7   :  { %2364 = vst.msk [vmem:[#allocation2 + $0x8] sm:$0xff] %vm2362_vm3, %v2138_v15  ;;  %2503 = vst.msk [vmem:[#allocation2 + $0x460] sm:$0xff] %vm2362_vm3, %v2277_v17  ;;  %v90_v15 = vld [vmem:[%s9404_s0 + $0x1e8] sm:$0xff] }
  0xf8   :  { %v1023_v21 = vpop.f32.mrb[4].mxu0  ;;  %v1718_v22 = vpop.f32.mrb[4].mxu1 }
  0xf9   :  { %v2139_v23 = vmax.f32 %v1023_v21, 0.0  ;;  %v5656_v24 = vpop.f32.mrb[5].mxu0  ;;  %5814 = vmatmul.mubr.msk.f32.gmra.mrb[110].mxu0 %vm267_vm2, %v84_v19  ;;  %v2278_v26 = vmax.f32 %v1718_v22, 0.0  ;;  %v6073_v27 = vpop.f32.mrb[5].mxu1  ;;  %6231 = vmatmul.mubr.msk.f32.gmra.mrb[110].mxu1 %vm267_vm2, %v223_v20 }
  0xfa   :  { %5816 = vmatprep.mubr.msk.f32.mxu0 %vm6652_vm0, %v6653_v6  ;;  %v3261_v28 = vld [vmem:[#allocation2 + $0x458] sm:$0xff]  ;;  %6233 = vmatprep.mubr.msk.f32.mxu1 %vm6652_vm0, %v6653_v6  ;;  %v2588_v30 = vld [vmem:[#allocation2] sm:$0xff]  ;;  %v91_v24 = vld [vmem:[%s9404_s0 + $0x1f0] sm:$0xff] }
  0xfb   :  { %2365 = vst.msk [vmem:[#allocation2 + $0x10] sm:$0xff] %vm2362_vm3, %v2139_v23  ;;  %2504 = vst.msk [vmem:[#allocation2 + $0x468] sm:$0xff] %vm2362_vm3, %v2278_v26  ;;  %3283 = vrot.lane.b32.xlu0 %v3261_v28, %s6654_s29 }
  0xfc   :  { %2597 = vst.msk [vmem:[#allocation3] sm:$0xff] %vm2362_vm3, %v2588_v30  ;;  %v1028_v31 = vpop.f32.mrb[6].mxu0  ;;  %v1723_v32 = vpop.f32.mrb[6].mxu1 }
  0xfd   :  { %v2140_v33 = vmax.f32 %v1028_v31, 0.0  ;;  %v5659_v34 = vpop.f32.mrb[7].mxu0  ;;  %5817 = vmatmul.mubr.msk.f32.gmra.mrb[112].mxu0 %vm267_vm2, %v85_v25  ;;  %v2279_v36 = vmax.f32 %v1723_v32, 0.0  ;;  %v6076_v37 = vpop.f32.mrb[7].mxu1  ;;  %6234 = vmatmul.mubr.msk.f32.gmra.mrb[112].mxu1 %vm267_vm2, %v224_v29  ;;  %v230_v25 = vld [vmem:[%s9404_s0 + $0x648] sm:$0xff]  ;;  %v92_v31 = vld [vmem:[%s9404_s0 + $0x1f8] sm:$0xff] }
  0xfe   :  { %5819 = vmatprep.mubr.msk.f32.mxu0 %vm6652_vm0, %v6653_v6  ;;  %v3262_v38 = vld [vmem:[#allocation2 + $0x460] sm:$0xff]  ;;  %6236 = vmatprep.mubr.msk.f32.mxu1 %vm6652_vm0, %v6653_v6  ;;  %v2589_v40 = vld [vmem:[#allocation2 + $0x8] sm:$0xff]  ;;  %v231_v34 = vld [vmem:[%s9404_s0 + $0x650] sm:$0xff] }
  0xff   :  { %2366 = vst.msk [vmem:[#allocation2 + $0x18] sm:$0xff] %vm2362_vm3, %v2140_v33  ;;  %2505 = vst.msk [vmem:[#allocation2 + $0x470] sm:$0xff] %vm2362_vm3, %v2279_v36  ;;  %3285 = vrot.lane.b32.xlu0 %v3262_v38, %s6654_s29 }
 0x100   :  { %2598 = vst.msk [vmem:[#allocation3 + $0x38] sm:$0xff] %vm2362_vm3, %v2589_v40  ;;  %v1033_v41 = vpop.f32.mrb[8].mxu0  ;;  %v1728_v42 = vpop.f32.mrb[8].mxu1 }
 0x101   :  { %v2141_v43 = vmax.f32 %v1033_v41, 0.0  ;;  %v5662_v44 = vpop.f32.mrb[9].mxu0  ;;  %5820 = vmatmul.mubr.msk.f32.gmra.mrb[114].mxu0 %vm267_vm2, %v86_v35  ;;  %v2280_v46 = vmax.f32 %v1728_v42, 0.0  ;;  %6237 = vmatmul.mubr.msk.f32.gmra.mrb[114].mxu1 %vm267_vm2, %v225_v39  ;;  %v6079_v47 = vpop.f32.mrb[9].mxu1  ;;  %v93_v41 = vld [vmem:[%s9404_s0 + $0x200] sm:$0xff] }
 0x102   :  { %5822 = vmatprep.mubr.msk.f32.mxu0 %vm6652_vm0, %v6653_v6  ;;  %v3263_v48 = vld [vmem:[#allocation2 + $0x468] sm:$0xff]  ;;  %6239 = vmatprep.mubr.msk.f32.mxu1 %vm6652_vm0, %v6653_v6  ;;  %v2590_v50 = vld [vmem:[#allocation2 + $0x10] sm:$0xff]  ;;  %v232_v44 = vld [vmem:[%s9404_s0 + $0x658] sm:$0xff] }
 0x103   :  { %2367 = vst.msk [vmem:[#allocation2 + $0x20] sm:$0xff] %vm2362_vm3, %v2141_v43  ;;  %2506 = vst.msk [vmem:[#allocation2 + $0x478] sm:$0xff] %vm2362_vm3, %v2280_v46  ;;  %3287 = vrot.lane.b32.xlu0 %v3263_v48, %s6654_s29 }
 0x104   :  { %2599 = vst.msk [vmem:[#allocation3 + $0x70] sm:$0xff] %vm2362_vm3, %v2590_v50  ;;  %v1038_v51 = vpop.f32.mrb[10].mxu0  ;;  %v1733_v52 = vpop.f32.mrb[10].mxu1 }
 0x105   :  { %v2142_v53 = vmax.f32 %v1038_v51, 0.0  ;;  %v5665_v54 = vpop.f32.mrb[11].mxu0  ;;  %5823 = vmatmul.mubr.msk.f32.gmra.mrb[116].mxu0 %vm267_vm2, %v87_v45  ;;  %6240 = vmatmul.mubr.msk.f32.gmra.mrb[116].mxu1 %vm267_vm2, %v226_v49  ;;  %v2281_v56 = vmax.f32 %v1733_v52, 0.0  ;;  %v6082_v57 = vpop.f32.mrb[11].mxu1  ;;  %v94_v51 = vld [vmem:[%s9404_s0 + $0x208] sm:$0xff] }
 0x106   :  { %5825 = vmatprep.mubr.msk.f32.mxu0 %vm6652_vm0, %v6653_v6  ;;  %v3264_v58 = vld [vmem:[#allocation2 + $0x470] sm:$0xff]  ;;  %6242 = vmatprep.mubr.msk.f32.mxu1 %vm6652_vm0, %v6653_v6  ;;  %v2591_v60 = vld [vmem:[#allocation2 + $0x18] sm:$0xff] }
 0x107   :  { %2368 = vst.msk [vmem:[#allocation2 + $0x28] sm:$0xff] %vm2362_vm3, %v2142_v53  ;;  %3289 = vrot.lane.b32.xlu0 %v3264_v58, %s6654_s29  ;;  %2507 = vst.msk [vmem:[#allocation2 + $0x480] sm:$0xff] %vm2362_vm3, %v2281_v56 }
 0x108   :  { %2600 = vst.msk [vmem:[#allocation3 + $0xa8] sm:$0xff] %vm2362_vm3, %v2591_v60  ;;  %v1043_v61 = vpop.f32.mrb[12].mxu0  ;;  %v1738_v62 = vpop.f32.mrb[12].mxu1 }
 0x109   :  { %v2143_v63 = vmax.f32 %v1043_v61, 0.0  ;;  %v5668_v1 = vpop.f32.mrb[13].mxu0  ;;  %5826 = vmatmul.mubr.msk.f32.gmra.mrb[118].mxu0 %vm267_vm2, %v88_v55  ;;  %v2282_v3 = vmax.f32 %v1738_v62, 0.0  ;;  %v6085_v4 = vpop.f32.mrb[13].mxu1  ;;  %6243 = vmatmul.mubr.msk.f32.gmra.mrb[118].mxu1 %vm267_vm2, %v227_v59  ;;  %v233_v55 = vld [vmem:[%s9404_s0 + $0x660] sm:$0xff]  ;;  %v95_v61 = vld [vmem:[%s9404_s0 + $0x210] sm:$0xff] }
 0x10a   :  { %5828 = vmatprep.mubr.msk.f32.mxu0 %vm6652_vm0, %v6653_v6  ;;  %v3265_v5 = vld [vmem:[#allocation2 + $0x478] sm:$0xff]  ;;  %6245 = vmatprep.mubr.msk.f32.mxu1 %vm6652_vm0, %v6653_v6  ;;  %v2592_v8 = vld [vmem:[#allocation2 + $0x20] sm:$0xff] }
 0x10b   :  { %2369 = vst.msk [vmem:[#allocation2 + $0x30] sm:$0xff] %vm2362_vm3, %v2143_v63  ;;  %3291 = vrot.lane.b32.xlu0 %v3265_v5, %s6654_s29  ;;  %2508 = vst.msk [vmem:[#allocation2 + $0x488] sm:$0xff] %vm2362_vm3, %v2282_v3 }
 0x10c   :  { %2601 = vst.msk [vmem:[#allocation3 + $0xe0] sm:$0xff] %vm2362_vm3, %v2592_v8  ;;  %v1048_v9 = vpop.f32.mrb[14].mxu0  ;;  %v1743_v10 = vpop.f32.mrb[14].mxu1 }
 0x10d   :  { %v2144_v11 = vmax.f32 %v1048_v9, 0.0  ;;  %v5671_v12 = vpop.f32.mrb[15].mxu0  ;;  %5829 = vmatmul.mubr.msk.f32.gmra.mrb[120].mxu0 %vm267_vm2, %v89_v2  ;;  %v2283_v13 = vmax.f32 %v1743_v10, 0.0  ;;  %v6088_v14 = vpop.f32.mrb[15].mxu1  ;;  %6246 = vmatmul.mubr.msk.f32.gmra.mrb[120].mxu1 %vm267_vm2, %v228_v7  ;;  %v234_v2 = vld [vmem:[%s9404_s0 + $0x668] sm:$0xff]  ;;  %v96_v9 = vld [vmem:[%s9404_s0 + $0x218] sm:$0xff] }
 0x10e   :  { %5831 = vmatprep.mubr.msk.f32.mxu0 %vm6652_vm0, %v6653_v6  ;;  %6248 = vmatprep.mubr.msk.f32.mxu1 %vm6652_vm0, %v6653_v6  ;;  %v2593_v17 = vld [vmem:[#allocation2 + $0x28] sm:$0xff]  ;;  %v3311_v35 = vld [vmem:[#allocation2 + $0x480] sm:$0xff] }
 0x10f   :  { %2370 = vst.msk [vmem:[#allocation2 + $0x38] sm:$0xff] %vm2362_vm3, %v2144_v11  ;;  %2509 = vst.msk [vmem:[#allocation2 + $0x490] sm:$0xff] %vm2362_vm3, %v2283_v13  ;;  %v235_v13 = vld [vmem:[%s9404_s0 + $0x670] sm:$0xff] }
 0x110   :  { %2602 = vst.msk [vmem:[#allocation3 + $0x118] sm:$0xff] %vm2362_vm3, %v2593_v17  ;;  %v1053_v18 = vpop.f32.mrb[16].mxu0  ;;  %v1748_v19 = vpop.f32.mrb[16].mxu1  ;;  %3320 = vst.msk [vmem:[#allocation3 + $0x20] sm:$0xff] %vm2362_vm3, %v3311_v35 }
 0x111   :  { %v2145_v20 = vmax.f32 %v1053_v18, 0.0  ;;  %v5674_v21 = vpop.f32.mrb[17].mxu0  ;;  %5832 = vmatmul.mubr.msk.f32.gmra.mrb[122].mxu0 %vm267_vm2, %v90_v15  ;;  %v2284_v22 = vmax.f32 %v1748_v19, 0.0  ;;  %v6091_v23 = vpop.f32.mrb[17].mxu1  ;;  %6249 = vmatmul.mubr.msk.f32.gmra.mrb[122].mxu1 %vm267_vm2, %v229_v16 }
 0x112   :  { %5834 = vmatprep.mubr.msk.f32.mxu0 %vm6652_vm0, %v6653_v6  ;;  %6251 = vmatprep.mubr.msk.f32.mxu1 %vm6652_vm0, %v6653_v6  ;;  %v2594_v26 = vld [vmem:[#allocation2 + $0x30] sm:$0xff]  ;;  %v3312_v45 = vld [vmem:[#allocation2 + $0x488] sm:$0xff]  ;;  %v236_v23 = vld [vmem:[%s9404_s0 + $0x678] sm:$0xff] }
 0x113   :  { %2371 = vst.msk [vmem:[#allocation2 + $0x40] sm:$0xff] %vm2362_vm3, %v2145_v20  ;;  %2510 = vst.msk [vmem:[#allocation2 + $0x498] sm:$0xff] %vm2362_vm3, %v2284_v22  ;;  %v97_v22 = vld [vmem:[%s9404_s0 + $0x220] sm:$0xff] }
 0x114   :  { %2603 = vst.msk [vmem:[#allocation3 + $0x150] sm:$0xff] %vm2362_vm3, %v2594_v26  ;;  %v1058_v27 = vpop.f32.mrb[18].mxu0  ;;  %v1753_v28 = vpop.f32.mrb[18].mxu1  ;;  %3321 = vst.msk [vmem:[#allocation3 + $0x58] sm:$0xff] %vm2362_vm3, %v3312_v45 }
 0x115   :  { %v2146_v29 = vmax.f32 %v1058_v27, 0.0  ;;  %v5677_v30 = vpop.f32.mrb[19].mxu0  ;;  %5835 = vmatmul.mubr.msk.f32.gmra.mrb[124].mxu0 %vm267_vm2, %v91_v24  ;;  %v2285_v32 = vmax.f32 %v1753_v28, 0.0  ;;  %v6094_v33 = vpop.f32.mrb[19].mxu1  ;;  %6252 = vmatmul.mubr.msk.f32.gmra.mrb[124].mxu1 %vm267_vm2, %v230_v25 }
 0x116   :  { %5837 = vmatprep.mubr.msk.f32.mxu0 %vm6652_vm0, %v6653_v6  ;;  %6254 = vmatprep.mubr.msk.f32.mxu1 %vm6652_vm0, %v6653_v6  ;;  %v2595_v36 = vld [vmem:[#allocation2 + $0x38] sm:$0xff]  ;;  %v3313_v56 = vld [vmem:[#allocation2 + $0x490] sm:$0xff]  ;;  %v237_v33 = vld [vmem:[%s9404_s0 + $0x680] sm:$0xff] }
 0x117   :  { %2372 = vst.msk [vmem:[#allocation2 + $0x48] sm:$0xff] %vm2362_vm3, %v2146_v29  ;;  %2511 = vst.msk [vmem:[#allocation2 + $0x4a0] sm:$0xff] %vm2362_vm3, %v2285_v32  ;;  %v98_v32 = vld [vmem:[%s9404_s0 + $0x228] sm:$0xff] }
 0x118   :  { %2604 = vst.msk [vmem:[#allocation3 + $0x188] sm:$0xff] %vm2362_vm3, %v2595_v36  ;;  %v1063_v37 = vpop.f32.mrb[20].mxu0  ;;  %v1758_v38 = vpop.f32.mrb[20].mxu1  ;;  %3322 = vst.msk [vmem:[#allocation3 + $0x90] sm:$0xff] %vm2362_vm3, %v3313_v56 }
 0x119   :  { %v2147_v39 = vmax.f32 %v1063_v37, 0.0  ;;  %v5680_v40 = vpop.f32.mrb[21].mxu0  ;;  %5838 = vmatmul.mubr.msk.f32.gmra.mrb[126].mxu0 %vm267_vm2, %v92_v31  ;;  %v2286_v42 = vmax.f32 %v1758_v38, 0.0  ;;  %v6097_v43 = vpop.f32.mrb[21].mxu1  ;;  %6255 = vmatmul.mubr.msk.f32.gmra.mrb[126].mxu1 %vm267_vm2, %v231_v34 }
 0x11a   :  { %5840 = vmatprep.mubr.msk.f32.mxu0 %vm6652_vm0, %v6653_v6  ;;  %6257 = vmatprep.mubr.msk.f32.mxu1 %vm6652_vm0, %v6653_v6  ;;  %v2596_v46 = vld [vmem:[#allocation2 + $0x40] sm:$0xff]  ;;  %v3314_v3 = vld [vmem:[#allocation2 + $0x498] sm:$0xff]  ;;  %v238_v43 = vld [vmem:[%s9404_s0 + $0x688] sm:$0xff] }
 0x11b   :  { %2373 = vst.msk [vmem:[#allocation2 + $0x50] sm:$0xff] %vm2362_vm3, %v2147_v39  ;;  %2512 = vst.msk [vmem:[#allocation2 + $0x4a8] sm:$0xff] %vm2362_vm3, %v2286_v42  ;;  %v99_v42 = vld [vmem:[%s9404_s0 + $0x230] sm:$0xff] }
 0x11c   :  { %2605 = vst.msk [vmem:[#allocation3 + $0x1c0] sm:$0xff] %vm2362_vm3, %v2596_v46  ;;  %v1068_v47 = vpop.f32.mrb[22].mxu0  ;;  %v1763_v48 = vpop.f32.mrb[22].mxu1  ;;  %3323 = vst.msk [vmem:[#allocation3 + $0xc8] sm:$0xff] %vm2362_vm3, %v3314_v3 }
 0x11d   :  { %v2148_v49 = vmax.f32 %v1068_v47, 0.0  ;;  %v5683_v50 = vpop.f32.mrb[23].mxu0  ;;  %5841 = vmatmul.mubr.msk.f32.gmra.mrb[128].mxu0 %vm267_vm2, %v93_v41  ;;  %v2287_v52 = vmax.f32 %v1763_v48, 0.0  ;;  %v6100_v53 = vpop.f32.mrb[23].mxu1  ;;  %6258 = vmatmul.mubr.msk.f32.gmra.mrb[128].mxu1 %vm267_vm2, %v232_v44 }
 0x11e   :  { %v2606_v54 = vld [vmem:[#allocation2 + $0x48] sm:$0xff]  ;;  %5843 = vmatprep.mubr.msk.f32.mxu0 %vm6652_vm0, %v6653_v6  ;;  %6260 = vmatprep.mubr.msk.f32.mxu1 %vm6652_vm0, %v6653_v6  ;;  %v3315_v14 = vld [vmem:[#allocation2 + $0x4a0] sm:$0xff] }
 0x11f   :  { %2374 = vst.msk [vmem:[#allocation2 + $0x58] sm:$0xff] %vm2362_vm3, %v2148_v49  ;;  %2624 = vrot.lane.b32.xlu0 %v2606_v54, %s6655_s21  ;;  %2513 = vst.msk [vmem:[#allocation2 + $0x4b0] sm:$0xff] %vm2362_vm3, %v2287_v52  ;;  %v100_v52 = vld [vmem:[%s9404_s0 + $0x238] sm:$0xff] }
 0x120   :  { %v1073_v57 = vpop.f32.mrb[24].mxu0  ;;  %v1768_v58 = vpop.f32.mrb[24].mxu1  ;;  %3324 = vst.msk [vmem:[#allocation3 + $0x100] sm:$0xff] %vm2362_vm3, %v3315_v14 }
 0x121   :  { %v2149_v59 = vmax.f32 %v1073_v57, 0.0  ;;  %v5686_v60 = vpop.f32.mrb[25].mxu0  ;;  %5844 = vmatmul.mubr.msk.f32.gmra.mrb[130].mxu0 %vm267_vm2, %v94_v51  ;;  %v2288_v62 = vmax.f32 %v1768_v58, 0.0  ;;  %v6103_v63 = vpop.f32.mrb[25].mxu1  ;;  %6261 = vmatmul.mubr.msk.f32.gmra.mrb[130].mxu1 %vm267_vm2, %v233_v55 }
 0x122   :  { %v2607_v1 = vld [vmem:[#allocation2 + $0x50] sm:$0xff]  ;;  %5846 = vmatprep.mubr.msk.f32.mxu0 %vm6652_vm0, %v6653_v6  ;;  %6263 = vmatprep.mubr.msk.f32.mxu1 %vm6652_vm0, %v6653_v6  ;;  %v3316_v24 = vld [vmem:[#allocation2 + $0x4a8] sm:$0xff] }
 0x123   :  { %2375 = vst.msk [vmem:[#allocation2 + $0x60] sm:$0xff] %vm2362_vm3, %v2149_v59  ;;  %2626 = vrot.lane.b32.xlu1 %v2607_v1, %s6655_s21  ;;  %2514 = vst.msk [vmem:[#allocation2 + $0x4b8] sm:$0xff] %vm2362_vm3, %v2288_v62 }
 0x124   :  { %v1078_v4 = vpop.f32.mrb[26].mxu0  ;;  %v1773_v5 = vpop.f32.mrb[26].mxu1  ;;  %3325 = vst.msk [vmem:[#allocation3 + $0x138] sm:$0xff] %vm2362_vm3, %v3316_v24 }
 0x125   :  { %v2150_v7 = vmax.f32 %v1078_v4, 0.0  ;;  %v5689_v8 = vpop.f32.mrb[27].mxu0  ;;  %5847 = vmatmul.mubr.msk.f32.gmra.mrb[132].mxu0 %vm267_vm2, %v95_v61  ;;  %v2289_v10 = vmax.f32 %v1773_v5, 0.0  ;;  %v6106_v11 = vpop.f32.mrb[27].mxu1  ;;  %6264 = vmatmul.mubr.msk.f32.gmra.mrb[132].mxu1 %vm267_vm2, %v234_v2  ;;  %v101_v61 = vld [vmem:[%s9404_s0 + $0x240] sm:$0xff] }
 0x126   :  { %v2608_v12 = vld [vmem:[#allocation2 + $0x58] sm:$0xff]  ;;  %5849 = vmatprep.mubr.msk.f32.mxu0 %vm6652_vm0, %v6653_v6  ;;  %6266 = vmatprep.mubr.msk.f32.mxu1 %vm6652_vm0, %v6653_v6  ;;  %v3317_v34 = vld [vmem:[#allocation2 + $0x4b0] sm:$0xff] }
 0x127   :  { %2376 = vst.msk [vmem:[#allocation2 + $0x68] sm:$0xff] %vm2362_vm3, %v2150_v7  ;;  %2628 = vrot.lane.b32.xlu1 %v2608_v12, %s6655_s21  ;;  %2515 = vst.msk [vmem:[#allocation2 + $0x4c0] sm:$0xff] %vm2362_vm3, %v2289_v10  ;;  %v102_v7 = vld [vmem:[%s9404_s0 + $0x248] sm:$0xff] }
 0x128   :  { %v1083_v15 = vpop.f32.mrb[28].mxu0  ;;  %v1778_v16 = vpop.f32.mrb[28].mxu1  ;;  %3326 = vst.msk [vmem:[#allocation3 + $0x170] sm:$0xff] %vm2362_vm3, %v3317_v34 }
 0x129   :  { %v2151_v17 = vmax.f32 %v1083_v15, 0.0  ;;  %v5692_v18 = vpop.f32.mrb[29].mxu0  ;;  %5850 = vmatmul.mubr.msk.f32.gmra.mrb[134].mxu0 %vm267_vm2, %v96_v9  ;;  %v2290_v19 = vmax.f32 %v1778_v16, 0.0  ;;  %v6109_v20 = vpop.f32.mrb[29].mxu1  ;;  %6267 = vmatmul.mubr.msk.f32.gmra.mrb[134].mxu1 %vm267_vm2, %v235_v13  ;;  %v103_v15 = vld [vmem:[%s9404_s0 + $0x250] sm:$0xff] }
 0x12a   :  { %v2609_v21 = vld [vmem:[#allocation2 + $0x60] sm:$0xff]  ;;  %5852 = vmatprep.mubr.msk.f32.mxu0 %vm6652_vm0, %v6653_v6  ;;  %6269 = vmatprep.mubr.msk.f32.mxu1 %vm6652_vm0, %v6653_v6  ;;  %v3318_v44 = vld [vmem:[#allocation2 + $0x4b8] sm:$0xff] }
 0x12b   :  { %2377 = vst.msk [vmem:[#allocation2 + $0x70] sm:$0xff] %vm2362_vm3, %v2151_v17  ;;  %2630 = vrot.lane.b32.xlu1 %v2609_v21, %s6655_s21  ;;  %2516 = vst.msk [vmem:[#allocation2 + $0x4c8] sm:$0xff] %vm2362_vm3, %v2290_v19 }
 0x12c   :  { %v1088_v25 = vpop.f32.mrb[30].mxu0  ;;  %v1783_v26 = vpop.f32.mrb[30].mxu1  ;;  %3327 = vst.msk [vmem:[#allocation3 + $0x1a8] sm:$0xff] %vm2362_vm3, %v3318_v44 }
 0x12d   :  { %v2152_v27 = vmax.f32 %v1088_v25, 0.0  ;;  %v5695_v28 = vpop.f32.mrb[31].mxu0  ;;  %5853 = vmatmul.mubr.msk.f32.gmra.mrb[136].mxu0 %vm267_vm2, %v97_v22  ;;  %v2291_v29 = vmax.f32 %v1783_v26, 0.0  ;;  %v6112_v30 = vpop.f32.mrb[31].mxu1  ;;  %6270 = vmatmul.mubr.msk.f32.gmra.mrb[136].mxu1 %vm267_vm2, %v236_v23  ;;  %v104_v23 = vld [vmem:[%s9404_s0 + $0x258] sm:$0xff] }
 0x12e   :  { %v2610_v31 = vld [vmem:[#allocation2 + $0x68] sm:$0xff]  ;;  %5855 = vmatprep.mubr.msk.f32.mxu0 %vm6652_vm0, %v6653_v6  ;;  %6272 = vmatprep.mubr.msk.f32.mxu1 %vm6652_vm0, %v6653_v6  ;;  %v3319_v53 = vld [vmem:[#allocation2 + $0x4c0] sm:$0xff] }
 0x12f   :  { %2378 = vst.msk [vmem:[#allocation2 + $0x78] sm:$0xff] %vm2362_vm3, %v2152_v27  ;;  %2632 = vrot.lane.b32.xlu1 %v2610_v31, %s6655_s21  ;;  %2517 = vst.msk [vmem:[#allocation2 + $0x4d0] sm:$0xff] %vm2362_vm3, %v2291_v29  ;;  %v105_v31 = vld [vmem:[%s9404_s0 + $0x260] sm:$0xff] }
 0x130   :  { %v1093_v35 = vpop.f32.mrb[32].mxu0  ;;  %v1788_v36 = vpop.f32.mrb[32].mxu1  ;;  %3328 = vst.msk [vmem:[#allocation3 + $0x1e0] sm:$0xff] %vm2362_vm3, %v3319_v53 }
 0x131   :  { %v2153_v37 = vmax.f32 %v1093_v35, 0.0  ;;  %v5698_v38 = vpop.f32.mrb[33].mxu0  ;;  %5856 = vmatmul.mubr.msk.f32.gmra.mrb[138].mxu0 %vm267_vm2, %v98_v32  ;;  %v2292_v39 = vmax.f32 %v1788_v36, 0.0  ;;  %v6115_v40 = vpop.f32.mrb[33].mxu1  ;;  %6273 = vmatmul.mubr.msk.f32.gmra.mrb[138].mxu1 %vm267_vm2, %v237_v33 }
 0x132   :  { %v2611_v41 = vld [vmem:[#allocation2 + $0x70] sm:$0xff]  ;;  %5858 = vmatprep.mubr.msk.f32.mxu0 %vm6652_vm0, %v6653_v6  ;;  %6275 = vmatprep.mubr.msk.f32.mxu1 %vm6652_vm0, %v6653_v6  ;;  %v3329_v46 = vld [vmem:[#allocation2 + $0x4c8] sm:$0xff] }
 0x133   :  { %2379 = vst.msk [vmem:[#allocation2 + $0x80] sm:$0xff] %vm2362_vm3, %v2153_v37  ;;  %2634 = vrot.lane.b32.xlu1 %v2611_v41, %s6655_s21  ;;  %2518 = vst.msk [vmem:[#allocation2 + $0x4d8] sm:$0xff] %vm2362_vm3, %v2292_v39  ;;  %v106_v39 = vld [vmem:[%s9404_s0 + $0x268] sm:$0xff] }
 0x134   :  { %v1098_v45 = vpop.f32.mrb[34].mxu0  ;;  %v1793_v47 = vpop.f32.mrb[34].mxu1 }
 0x135   :  { %v2154_v48 = vmax.f32 %v1098_v45, 0.0  ;;  %v5701_v49 = vpop.f32.mrb[35].mxu0  ;;  %5859 = vmatmul.mubr.msk.f32.gmra.mrb[140].mxu0 %vm267_vm2, %v99_v42  ;;  %v2293_v50 = vmax.f32 %v1793_v47, 0.0  ;;  %v6118_v51 = vpop.f32.mrb[35].mxu1  ;;  %6276 = vmatmul.mubr.msk.f32.gmra.mrb[140].mxu1 %vm267_vm2, %v238_v43  ;;  %v107_v47 = vld [vmem:[%s9404_s0 + $0x270] sm:$0xff] }
 0x136   :  { %5861 = vmatprep.mubr.msk.f32.mxu0 %vm6652_vm0, %v6653_v6  ;;  %6278 = vmatprep.mubr.msk.f32.mxu1 %vm6652_vm0, %v6653_v6  ;;  %v2612_v60 = vld [vmem:[#allocation2 + $0x78] sm:$0xff]  ;;  %v3330_v63 = vld [vmem:[#allocation2 + $0x4d0] sm:$0xff] }
 0x137   :  { %2380 = vst.msk [vmem:[#allocation2 + $0x88] sm:$0xff] %vm2362_vm3, %v2154_v48  ;;  %3347 = vrot.lane.b32.xlu1 %v3329_v46, %s6655_s21  ;;  %2519 = vst.msk [vmem:[#allocation2 + $0x4e0] sm:$0xff] %vm2362_vm3, %v2293_v50 }
 0x138   :  { %v1103_v54 = vpop.f32.mrb[36].mxu0  ;;  %v1798_v55 = vpop.f32.mrb[36].mxu1 }
 0x139   :  { %v2155_v56 = vmax.f32 %v1103_v54, 0.0  ;;  %v5704_v57 = vpop.f32.mrb[37].mxu0  ;;  %5862 = vmatmul.mubr.msk.f32.gmra.mrb[142].mxu0 %vm267_vm2, %v100_v52  ;;  %v2294_v58 = vmax.f32 %v1798_v55, 0.0  ;;  %v6121_v59 = vpop.f32.mrb[37].mxu1  ;;  %v108_v55 = vld [vmem:[%s9404_s0 + $0x278] sm:$0xff] }
 0x13a   :  { %5864 = vmatprep.mubr.msk.f32.mxu0 %vm6652_vm0, %v6653_v6  ;;  %v2613_v14 = vld [vmem:[#allocation2 + $0x80] sm:$0xff]  ;;  %v3331_v17 = vld [vmem:[#allocation2 + $0x4d8] sm:$0xff] }
 0x13b   :  { %2381 = vst.msk [vmem:[#allocation2 + $0x90] sm:$0xff] %vm2362_vm3, %v2155_v56  ;;  %2636 = vrot.lane.b32.xlu1 %v2612_v60, %s6655_s21  ;;  %2520 = vst.msk [vmem:[#allocation2 + $0x4e8] sm:$0xff] %vm2362_vm3, %v2294_v58 }
 0x13c   :  { %v1108_v62 = vpop.f32.mrb[38].mxu0  ;;  %v1803_v1 = vpop.f32.mrb[38].mxu1 }
 0x13d   :  { %v2156_v2 = vmax.f32 %v1108_v62, 0.0  ;;  %v5707_v3 = vpop.f32.mrb[39].mxu0  ;;  %5865 = vmatmul.mubr.msk.f32.gmra.mrb[144].mxu0 %vm267_vm2, %v101_v61  ;;  %v2295_v4 = vmax.f32 %v1803_v1, 0.0  ;;  %v6124_v5 = vpop.f32.mrb[39].mxu1 }
 0x13e   :  { %5867 = vmatprep.mubr.msk.f32.mxu0 %vm6652_vm0, %v6653_v6  ;;  %v2614_v30 = vld [vmem:[#allocation2 + $0x88] sm:$0xff]  ;;  %v3332_v33 = vld [vmem:[#allocation2 + $0x4e0] sm:$0xff] }
 0x13f   :  { %2382 = vst.msk [vmem:[#allocation2 + $0x98] sm:$0xff] %vm2362_vm3, %v2156_v2  ;;  %3349 = vrot.lane.b32.xlu1 %v3330_v63, %s6655_s21  ;;  %2521 = vst.msk [vmem:[#allocation2 + $0x4f0] sm:$0xff] %vm2362_vm3, %v2295_v4  ;;  %v109_v63 = vld [vmem:[%s9404_s0 + $0x280] sm:$0xff] }
 0x140   :  { %v1113_v8 = vpop.f32.mrb[40].mxu0  ;;  %v1808_v9 = vpop.f32.mrb[40].mxu1 }
 0x141   :  { %v2157_v10 = vmax.f32 %v1113_v8, 0.0  ;;  %v5710_v11 = vpop.f32.mrb[41].mxu0  ;;  %5868 = vmatmul.mubr.msk.f32.gmra.mrb[146].mxu0 %vm267_vm2, %v102_v7  ;;  %v2296_v12 = vmax.f32 %v1808_v9, 0.0  ;;  %v6127_v13 = vpop.f32.mrb[41].mxu1  ;;  %v110_v9 = vld [vmem:[%s9404_s0 + $0x288] sm:$0xff] }
 0x142   :  { %5870 = vmatprep.mubr.msk.f32.mxu0 %vm6652_vm0, %v6653_v6  ;;  %v2661_v46 = vld [vmem:[#allocation2 + $0x90] sm:$0xff]  ;;  %v3333_v49 = vld [vmem:[#allocation2 + $0x4e8] sm:$0xff] }
 0x143   :  { %2383 = vst.msk [vmem:[#allocation2 + $0xa0] sm:$0xff] %vm2362_vm3, %v2157_v10  ;;  %2638 = vrot.lane.b32.xlu1 %v2613_v14, %s6655_s21  ;;  %2522 = vst.msk [vmem:[#allocation2 + $0x4f8] sm:$0xff] %vm2362_vm3, %v2296_v12 }
 0x144   :  { %v1118_v16 = vpop.f32.mrb[42].mxu0  ;;  %v1813_v18 = vpop.f32.mrb[42].mxu1 }
 0x145   :  { %v2158_v19 = vmax.f32 %v1118_v16, 0.0  ;;  %v5713_v20 = vpop.f32.mrb[43].mxu0  ;;  %5871 = vmatmul.mubr.msk.f32.gmra.mrb[148].mxu0 %vm267_vm2, %v103_v15  ;;  %v2297_v21 = vmax.f32 %v1813_v18, 0.0  ;;  %v6130_v22 = vpop.f32.mrb[43].mxu1 }
 0x146   :  { %5873 = vmatprep.mubr.msk.f32.mxu0 %vm6652_vm0, %v6653_v6  ;;  %v2662_v62 = vld [vmem:[#allocation2 + $0x98] sm:$0xff] }
 0x147   :  { %2384 = vst.msk [vmem:[#allocation2 + $0xa8] sm:$0xff] %vm2362_vm3, %v2158_v19  ;;  %3351 = vrot.lane.b32.xlu1 %v3331_v17, %s6655_s21  ;;  %2523 = vst.msk [vmem:[#allocation2 + $0x500] sm:$0xff] %vm2362_vm3, %v2297_v21  ;;  %v111_v17 = vld [vmem:[%s9404_s0 + $0x290] sm:$0xff] }
 0x148   :  { %v1123_v24 = vpop.f32.mrb[44].mxu0  ;;  %v1818_v25 = vpop.f32.mrb[44].mxu1 }
 0x149   :  { %v2159_v26 = vmax.f32 %v1123_v24, 0.0  ;;  %v5716_v27 = vpop.f32.mrb[45].mxu0  ;;  %5874 = vmatmul.mubr.msk.f32.gmra.mrb[150].mxu0 %vm267_vm2, %v104_v23  ;;  %v2298_v28 = vmax.f32 %v1818_v25, 0.0  ;;  %v6133_v29 = vpop.f32.mrb[45].mxu1  ;;  %v112_v25 = vld [vmem:[%s9404_s0 + $0x298] sm:$0xff] }
 0x14a   :  { %5876 = vmatprep.mubr.msk.f32.mxu0 %vm6652_vm0, %v6653_v6  ;;  %v2663_v8 = vld [vmem:[#allocation2 + $0xa0] sm:$0xff] }
 0x14b   :  { %2385 = vst.msk [vmem:[#allocation2 + $0xb0] sm:$0xff] %vm2362_vm3, %v2159_v26  ;;  %2640 = vrot.lane.b32.xlu1 %v2614_v30, %s6655_s21  ;;  %2524 = vst.msk [vmem:[#allocation2 + $0x508] sm:$0xff] %vm2362_vm3, %v2298_v28 }
 0x14c   :  { %v1128_v32 = vpop.f32.mrb[46].mxu0  ;;  %v1823_v34 = vpop.f32.mrb[46].mxu1 }
 0x14d   :  { %v2160_v35 = vmax.f32 %v1128_v32, 0.0  ;;  %v5719_v36 = vpop.f32.mrb[47].mxu0  ;;  %5877 = vmatmul.mubr.msk.f32.gmra.mrb[152].mxu0 %vm267_vm2, %v105_v31  ;;  %v2299_v37 = vmax.f32 %v1823_v34, 0.0  ;;  %v6136_v38 = vpop.f32.mrb[47].mxu1  ;;  %v239_v34 = vld [vmem:[%s9404_s0 + $0x690] sm:$0xff] }
 0x14e   :  { %5879 = vmatprep.mubr.msk.f32.mxu0 %vm6652_vm0, %v6653_v6  ;;  %v2664_v16 = vld [vmem:[#allocation2 + $0xa8] sm:$0xff]  ;;  %6279 = vmatmul.mubr.msk.f32.gmra.mrb[142].mxu1 %vm267_vm2, %v239_v34 }
 0x14f   :  { %2386 = vst.msk [vmem:[#allocation2 + $0xb8] sm:$0xff] %vm2362_vm3, %v2160_v35  ;;  %3353 = vrot.lane.b32.xlu1 %v3332_v33, %s6655_s21  ;;  %2525 = vst.msk [vmem:[#allocation2 + $0x510] sm:$0xff] %vm2362_vm3, %v2299_v37  ;;  %v113_v33 = vld [vmem:[%s9404_s0 + $0x2a0] sm:$0xff]  ;;  %6281 = vmatprep.mubr.msk.f32.mxu1 %vm6652_vm0, %v6653_v6 }
 0x150   :  { %v1133_v40 = vpop.f32.mrb[48].mxu0  ;;  %v1828_v41 = vpop.f32.mrb[48].mxu1 }
 0x151   :  { %v2161_v42 = vmax.f32 %v1133_v40, 0.0  ;;  %v5722_v43 = vpop.f32.mrb[49].mxu0  ;;  %5880 = vmatmul.mubr.msk.f32.gmra.mrb[154].mxu0 %vm267_vm2, %v106_v39  ;;  %v2300_v44 = vmax.f32 %v1828_v41, 0.0  ;;  %v6139_v45 = vpop.f32.mrb[49].mxu1  ;;  %v114_v41 = vld [vmem:[%s9404_s0 + $0x2a8] sm:$0xff] }
 0x152   :  { %5882 = vmatprep.mubr.msk.f32.mxu0 %vm6652_vm0, %v6653_v6  ;;  %v2665_v24 = vld [vmem:[#allocation2 + $0xb0] sm:$0xff] }
 0x153   :  { %2387 = vst.msk [vmem:[#allocation2 + $0xc0] sm:$0xff] %vm2362_vm3, %v2161_v42  ;;  %2679 = vrot.lane.b32.xlu1 %v2661_v46, %s6656_s15  ;;  %2526 = vst.msk [vmem:[#allocation2 + $0x518] sm:$0xff] %vm2362_vm3, %v2300_v44 }
 0x154   :  { %v1138_v48 = vpop.f32.mrb[50].mxu0  ;;  %v1833_v50 = vpop.f32.mrb[50].mxu1 }
 0x155   :  { %v2162_v51 = vmax.f32 %v1138_v48, 0.0  ;;  %v5725_v52 = vpop.f32.mrb[51].mxu0  ;;  %5883 = vmatmul.mubr.msk.f32.gmra.mrb[156].mxu0 %vm267_vm2, %v107_v47  ;;  %v2301_v53 = vmax.f32 %v1833_v50, 0.0  ;;  %v6142_v54 = vpop.f32.mrb[51].mxu1  ;;  %v115_v50 = vld [vmem:[%s9404_s0 + $0x2b0] sm:$0xff] }
 0x156   :  { %5885 = vmatprep.mubr.msk.f32.mxu0 %vm6652_vm0, %v6653_v6  ;;  %v2666_v32 = vld [vmem:[#allocation2 + $0xb8] sm:$0xff]  ;;  %v3383_v36 = vld [vmem:[#allocation2 + $0x510] sm:$0xff] }
 0x157   :  { %2388 = vst.msk [vmem:[#allocation2 + $0xc8] sm:$0xff] %vm2362_vm3, %v2162_v51  ;;  %3355 = vrot.lane.b32.xlu1 %v3333_v49, %s6655_s21  ;;  %2527 = vst.msk [vmem:[#allocation2 + $0x520] sm:$0xff] %vm2362_vm3, %v2301_v53 }
 0x158   :  { %v1143_v56 = vpop.f32.mrb[52].mxu0  ;;  %v1838_v57 = vpop.f32.mrb[52].mxu1 }
 0x159   :  { %v2163_v58 = vmax.f32 %v1143_v56, 0.0  ;;  %v5728_v59 = vpop.f32.mrb[53].mxu0  ;;  %5886 = vmatmul.mubr.msk.f32.gmra.mrb[158].mxu0 %vm267_vm2, %v108_v55  ;;  %v2302_v60 = vmax.f32 %v1838_v57, 0.0  ;;  %v6145_v61 = vpop.f32.mrb[53].mxu1 }
 0x15a   :  { %5888 = vmatprep.mubr.msk.f32.mxu0 %vm6652_vm0, %v6653_v6  ;;  %v2667_v49 = vld [vmem:[#allocation2 + $0xc0] sm:$0xff]  ;;  %v3384_v53 = vld [vmem:[#allocation2 + $0x518] sm:$0xff] }
 0x15b   :  { %2389 = vst.msk [vmem:[#allocation2 + $0xd0] sm:$0xff] %vm2362_vm3, %v2163_v58  ;;  %2681 = vrot.lane.b32.xlu1 %v2662_v62, %s6656_s15  ;;  %2528 = vst.msk [vmem:[#allocation2 + $0x528] sm:$0xff] %vm2362_vm3, %v2302_v60  ;;  %v116_v58 = vld [vmem:[%s9404_s0 + $0x2b8] sm:$0xff] }
 0x15c   :  { %v1148_v1 = vpop.f32.mrb[54].mxu0  ;;  %v1843_v2 = vpop.f32.mrb[54].mxu1 }
 0x15d   :  { %v2164_v3 = vmax.f32 %v1148_v1, 0.0  ;;  %v5731_v4 = vpop.f32.mrb[55].mxu0  ;;  %5889 = vmatmul.mubr.msk.f32.gmra.mrb[160].mxu0 %vm267_vm2, %v109_v63  ;;  %v2303_v5 = vmax.f32 %v1843_v2, 0.0  ;;  %v6148_v7 = vpop.f32.mrb[55].mxu1 }
 0x15e   :  { %5891 = vmatprep.mubr.msk.f32.mxu0 %vm6652_vm0, %v6653_v6  ;;  %v117_v4 = vld [vmem:[%s9404_s0 + $0x2c0] sm:$0xff] }
 0x15f   :  { %2390 = vst.msk [vmem:[#allocation2 + $0xd8] sm:$0xff] %vm2362_vm3, %v2164_v3  ;;  %2683 = vrot.lane.b32.xlu1 %v2663_v8, %s6656_s15  ;;  %2529 = vst.msk [vmem:[#allocation2 + $0x530] sm:$0xff] %vm2362_vm3, %v2303_v5  ;;  %v2668_v3 = vld [vmem:[#allocation2 + $0xc8] sm:$0xff]  ;;  %v3385_v8 = vld [vmem:[#allocation2 + $0x520] sm:$0xff] }
 0x160   :  { %v1153_v10 = vpop.f32.mrb[56].mxu0  ;;  %v1848_v11 = vpop.f32.mrb[56].mxu1 }
 0x161   :  { %v2165_v12 = vmax.f32 %v1153_v10, 0.0  ;;  %v5734_v13 = vpop.f32.mrb[57].mxu0  ;;  %5892 = vmatmul.mubr.msk.f32.gmra.mrb[162].mxu0 %vm267_vm2, %v110_v9  ;;  %v2304_v14 = vmax.f32 %v1848_v11, 0.0  ;;  %v6151_v15 = vpop.f32.mrb[57].mxu1 }
 0x162   :  { %5894 = vmatprep.mubr.msk.f32.mxu0 %vm6652_vm0, %v6653_v6 }
 0x163   :  { %2391 = vst.msk [vmem:[#allocation2 + $0xe0] sm:$0xff] %vm2362_vm3, %v2165_v12  ;;  %2685 = vrot.lane.b32.xlu1 %v2664_v16, %s6656_s15  ;;  %2530 = vst.msk [vmem:[#allocation2 + $0x538] sm:$0xff] %vm2362_vm3, %v2304_v14  ;;  %v118_v14 = vld [vmem:[%s9404_s0 + $0x2c8] sm:$0xff] }
 0x164   :  { %v1158_v18 = vpop.f32.mrb[58].mxu0  ;;  %v1853_v19 = vpop.f32.mrb[58].mxu1 }
 0x165   :  { %v2166_v20 = vmax.f32 %v1158_v18, 0.0  ;;  %v5737_v21 = vpop.f32.mrb[59].mxu0  ;;  %5895 = vmatmul.mubr.msk.f32.gmra.mrb[164].mxu0 %vm267_vm2, %v111_v17  ;;  %v2305_v22 = vmax.f32 %v1853_v19, 0.0  ;;  %v6154_v23 = vpop.f32.mrb[59].mxu1 }
 0x166   :  { %5897 = vmatprep.mubr.msk.f32.mxu0 %vm6652_vm0, %v6653_v6  ;;  %v119_v23 = vld [vmem:[%s9404_s0 + $0x2d0] sm:$0xff] }
 0x167   :  { %2392 = vst.msk [vmem:[#allocation2 + $0xe8] sm:$0xff] %vm2362_vm3, %v2166_v20  ;;  %2687 = vrot.lane.b32.xlu1 %v2665_v24, %s6656_s15  ;;  %2531 = vst.msk [vmem:[#allocation2 + $0x540] sm:$0xff] %vm2362_vm3, %v2305_v22  ;;  %v2669_v22 = vld [vmem:[#allocation2 + $0xd0] sm:$0xff] }
 0x168   :  { %v1163_v26 = vpop.f32.mrb[60].mxu0  ;;  %v1858_v27 = vpop.f32.mrb[60].mxu1 }
 0x169   :  { %v2167_v28 = vmax.f32 %v1163_v26, 0.0  ;;  %v5740_v29 = vpop.f32.mrb[61].mxu0  ;;  %5898 = vmatmul.mubr.msk.f32.gmra.mrb[166].mxu0 %vm267_vm2, %v112_v25  ;;  %v2306_v30 = vmax.f32 %v1858_v27, 0.0  ;;  %v6157_v31 = vpop.f32.mrb[61].mxu1  ;;  %v3386_v26 = vld [vmem:[#allocation2 + $0x528] sm:$0xff] }
 0x16a   :  { %5900 = vmatprep.mubr.msk.f32.mxu0 %vm6652_vm0, %v6653_v6 }
 0x16b   :  { %2393 = vst.msk [vmem:[#allocation2 + $0xf0] sm:$0xff] %vm2362_vm3, %v2167_v28  ;;  %2689 = vrot.lane.b32.xlu1 %v2666_v32, %s6656_s15  ;;  %2532 = vst.msk [vmem:[#allocation2 + $0x548] sm:$0xff] %vm2362_vm3, %v2306_v30  ;;  %v120_v32 = vld [vmem:[%s9404_s0 + $0x2d8] sm:$0xff] }
 0x16c   :  { %v1168_v35 = vpop.f32.mrb[62].mxu0  ;;  %v1863_v37 = vpop.f32.mrb[62].mxu1 }
 0x16d   :  { %v2168_v38 = vmax.f32 %v1168_v35, 0.0  ;;  %v5743_v39 = vpop.f32.mrb[63].mxu0  ;;  %5901 = vmatmul.mubr.msk.f32.gmra.mrb[168].mxu0 %vm267_vm2, %v113_v33  ;;  %v2307_v40 = vmax.f32 %v1863_v37, 0.0  ;;  %v6160_v42 = vpop.f32.mrb[63].mxu1 }
 0x16e   :  { %5903 = vmatprep.mubr.msk.f32.mxu0 %vm6652_vm0, %v6653_v6  ;;  %v7820_v47 = vpop.permute.xlu0 %3283  ;;  %v2716_v39 = vld [vmem:[#allocation2 + $0xd8] sm:$0xff] }
 0x16f   :  { %2394 = vst.msk [vmem:[#allocation2 + $0xf8] sm:$0xff] %vm2362_vm3, %v2168_v38  ;;  %3401 = vrot.lane.b32.xlu1 %v3383_v36, %s6656_s15  ;;  %2533 = vst.msk [vmem:[#allocation2 + $0x550] sm:$0xff] %vm2362_vm3, %v2307_v40  ;;  %v121_v40 = vld [vmem:[%s9404_s0 + $0x2e0] sm:$0xff] }
 0x170   :  { %v1173_v43 = vpop.f32.mrb[64].mxu0  ;;  %v1868_v44 = vpop.f32.mrb[64].mxu1 }
 0x171   :  { %v2169_v45 = vmax.f32 %v1173_v43, 0.0  ;;  %v5746_v46 = vpop.f32.mrb[65].mxu0  ;;  %5904 = vmatmul.mubr.msk.f32.gmra.mrb[170].mxu0 %vm267_vm2, %v114_v41  ;;  %v2308_v48 = vmax.f32 %v1868_v44, 0.0  ;;  %v6163_v51 = vpop.f32.mrb[65].mxu1 }
 0x172   :  { %5906 = vmatprep.mubr.msk.f32.mxu0 %vm6652_vm0, %v6653_v6  ;;  %v7838_v60 = vpop.permute.xlu0 %3285  ;;  %v122_v51 = vld [vmem:[%s9404_s0 + $0x2e8] sm:$0xff] }
 0x173   :  { %2395 = vst.msk [vmem:[#allocation2 + $0x100] sm:$0xff] %vm2362_vm3, %v2169_v45  ;;  %2691 = vrot.lane.b32.xlu1 %v2667_v49, %s6656_s15  ;;  %2534 = vst.msk [vmem:[#allocation2 + $0x558] sm:$0xff] %vm2362_vm3, %v2308_v48 }
 0x174   :  { %v1178_v52 = vpop.f32.mrb[66].mxu0  ;;  %v1873_v54 = vpop.f32.mrb[66].mxu1 }
 0x175   :  { %v2170_v55 = vmax.f32 %v1178_v52, 0.0  ;;  %v5749_v56 = vpop.f32.mrb[67].mxu0  ;;  %5907 = vmatmul.mubr.msk.f32.gmra.mrb[172].mxu0 %vm267_vm2, %v115_v50  ;;  %v2309_v57 = vmax.f32 %v1873_v54, 0.0  ;;  %v6166_v59 = vpop.f32.mrb[67].mxu1  ;;  %v2717_v50 = vld [vmem:[#allocation2 + $0xe0] sm:$0xff] }
 0x176   :  { %5909 = vmatprep.mubr.msk.f32.mxu0 %vm6652_vm0, %v6653_v6  ;;  %v7851_v12 = vpop.permute.xlu0 %3287  ;;  %v2718_v59 = vld [vmem:[#allocation2 + $0xe8] sm:$0xff] }
 0x177   :  { %2396 = vst.msk [vmem:[#allocation2 + $0x108] sm:$0xff] %vm2362_vm3, %v2170_v55  ;;  %3403 = vrot.lane.b32.xlu1 %v3384_v53, %s6656_s15  ;;  %2535 = vst.msk [vmem:[#allocation2 + $0x560] sm:$0xff] %vm2362_vm3, %v2309_v57 }
 0x178   :  { %v1183_v61 = vpop.f32.mrb[68].mxu0  ;;  %v1878_v62 = vpop.f32.mrb[68].mxu1 }
 0x179   :  { %v2171_v63 = vmax.f32 %v1183_v61, 0.0  ;;  %v5752_v1 = vpop.f32.mrb[69].mxu0  ;;  %5910 = vmatmul.mubr.msk.f32.gmra.mrb[174].mxu0 %vm267_vm2, %v116_v58  ;;  %v2310_v2 = vmax.f32 %v1878_v62, 0.0  ;;  %v6169_v5 = vpop.f32.mrb[69].mxu1  ;;  %v123_v61 = vld [vmem:[%s9404_s0 + $0x2f0] sm:$0xff] }
 0x17a   :  { %5912 = vmatprep.mubr.msk.f32.mxu0 %vm6652_vm0, %v6653_v6  ;;  %v7869_v24 = vpop.permute.xlu0 %3289 }
 0x17b   :  { %2397 = vst.msk [vmem:[#allocation2 + $0x110] sm:$0xff] %vm2362_vm3, %v2171_v63  ;;  %2693 = vrot.lane.b32.xlu1 %v2668_v3, %s6656_s15  ;;  %2536 = vst.msk [vmem:[#allocation2 + $0x568] sm:$0xff] %vm2362_vm3, %v2310_v2 }
 0x17c   :  { %v1188_v7 = vpop.f32.mrb[70].mxu0  ;;  %v1883_v9 = vpop.f32.mrb[70].mxu1 }
 0x17d   :  { %v2172_v10 = vmax.f32 %v1188_v7, 0.0  ;;  %v5755_v11 = vpop.f32.mrb[71].mxu0  ;;  %5913 = vmatmul.mubr.msk.f32.gmra.mrb[176].mxu0 %vm267_vm2, %v117_v4  ;;  %v2311_v13 = vmax.f32 %v1883_v9, 0.0  ;;  %v6172_v15 = vpop.f32.mrb[71].mxu1  ;;  %v124_v9 = vld [vmem:[%s9404_s0 + $0x2f8] sm:$0xff] }
 0x17e   :  { %5915 = vmatprep.mubr.msk.f32.mxu0 %vm6652_vm0, %v6653_v6  ;;  %v7889_v42 = vpop.permute.xlu0 %3291  ;;  %v3768_v15 = vld [vmem:[%s9405_s2 + $0x80] sm:$0xff] }
 0x17f   :  { %2398 = vst.msk [vmem:[#allocation2 + $0x118] sm:$0xff] %vm2362_vm3, %v2172_v10  ;;  %3405 = vrot.lane.b32.xlu1 %v3385_v8, %s6656_s15  ;;  %2537 = vst.msk [vmem:[#allocation2 + $0x570] sm:$0xff] %vm2362_vm3, %v2311_v13  ;;  %v2719_v8 = vld [vmem:[#allocation2 + $0xf0] sm:$0xff] }
 0x180   :  { %v1193_v16 = vpop.f32.mrb[72].mxu0  ;;  %v1888_v17 = vpop.f32.mrb[72].mxu1 }
 0x181   :  { %v2173_v18 = vmax.f32 %v1193_v16, 0.0  ;;  %v5758_v19 = vpop.f32.mrb[73].mxu0  ;;  %5916 = vmatmul.mubr.msk.f32.gmra.mrb[178].mxu0 %vm267_vm2, %v118_v14  ;;  %v2312_v20 = vmax.f32 %v1888_v17, 0.0  ;;  %v6175_v21 = vpop.f32.mrb[73].mxu1  ;;  %v3769_v16 = vld [vmem:[%s9405_s2 + $0x88] sm:$0xff]  ;;  %v3752_v17 = vld [vmem:[%s9405_s2] sm:$0xff] }
 0x182   :  { %5918 = vmatprep.mubr.msk.f32.mxu0 %vm6652_vm0, %v6653_v6 }
 0x183   :  { %2399 = vst.msk [vmem:[#allocation2 + $0x120] sm:$0xff] %vm2362_vm3, %v2173_v18  ;;  %2695 = vrot.lane.b32.xlu1 %v2669_v22, %s6656_s15  ;;  %2538 = vst.msk [vmem:[#allocation2 + $0x578] sm:$0xff] %vm2362_vm3, %v2312_v20  ;;  %v6414_v22 = vpack.c.bf16 %v3769_v16, %v3768_v15 }
 0x184   :  { %v1198_v25 = vpop.f32.mrb[74].mxu0  ;;  %v1893_v27 = vpop.f32.mrb[74].mxu1 }
 0x185   :  { %v2174_v28 = vmax.f32 %v1198_v25, 0.0  ;;  %v5761_v29 = vpop.f32.mrb[75].mxu0  ;;  %5919 = vmatmul.mubr.msk.f32.gmra.mrb[180].mxu0 %vm267_vm2, %v119_v23  ;;  %v2313_v30 = vmax.f32 %v1893_v27, 0.0  ;;  %v6178_v31 = vpop.f32.mrb[75].mxu1  ;;  %v3753_v23 = vld [vmem:[%s9405_s2 + $0x8] sm:$0xff]  ;;  %v2720_v25 = vld [vmem:[#allocation2 + $0xf8] sm:$0xff]  ;;  %6415 = vmatprep.subr.bf16.mxu1 %v6414_v22 }
 0x186   :  { %5921 = vmatprep.mubr.msk.f32.mxu0 %vm6652_vm0, %v6653_v6  ;;  %v130_v22 = vld [vmem:[%s9404_s0 + $0x328] sm:$0xff] }
 0x187   :  { %2400 = vst.msk [vmem:[#allocation2 + $0x128] sm:$0xff] %vm2362_vm3, %v2174_v28  ;;  %3407 = vrot.lane.b32.xlu1 %v3386_v26, %s6656_s15  ;;  %2539 = vst.msk [vmem:[#allocation2 + $0x580] sm:$0xff] %vm2362_vm3, %v2313_v30  ;;  %v125_v26 = vld [vmem:[%s9404_s0 + $0x300] sm:$0xff]  ;;  %v6416_v28 = vpack.c.bf16 %v3753_v23, %v3752_v17 }
 0x188   :  { %v1203_v33 = vpop.f32.mrb[76].mxu0  ;;  %v1898_v34 = vpop.f32.mrb[76].mxu1 }
 0x189   :  { %v2175_v35 = vmax.f32 %v1203_v33, 0.0  ;;  %v5764_v36 = vpop.f32.mrb[77].mxu0  ;;  %5922 = vmatmul.mubr.msk.f32.gmra.mrb[182].mxu0 %vm267_vm2, %v120_v32  ;;  %v2314_v37 = vmax.f32 %v1898_v34, 0.0  ;;  %v6181_v38 = vpop.f32.mrb[77].mxu1  ;;  %6417 = vmatpush3.bf16.msra.mxu1 %v6416_v28 }
 0x18a   :  { %5924 = vmatprep.mubr.msk.f32.mxu0 %vm6652_vm0, %v6653_v6  ;;  %v2771_v41 = vld [vmem:[#allocation2 + $0x120] sm:$0xff] }
 0x18b   :  { %2401 = vst.msk [vmem:[#allocation2 + $0x130] sm:$0xff] %vm2362_vm3, %v2175_v35  ;;  %2734 = vrot.lane.b32.xlu1 %v2716_v39, %s6654_s29  ;;  %2540 = vst.msk [vmem:[#allocation2 + $0x588] sm:$0xff] %vm2362_vm3, %v2314_v37  ;;  %v2721_v36 = vld [vmem:[#allocation2 + $0x100] sm:$0xff]  ;;  %v126_v37 = vld [vmem:[%s9404_s0 + $0x308] sm:$0xff] }
 0x18c   :  { %2780 = vst.msk [vmem:[#allocation3 + $0x8] sm:$0xff] %vm2362_vm3, %v2771_v41  ;;  %v1208_v43 = vpop.f32.mrb[78].mxu0  ;;  %v1903_v44 = vpop.f32.mrb[78].mxu1  ;;  %v3437_v41 = vld [vmem:[#allocation2 + $0x558] sm:$0xff] }
 0x18d   :  { %v2176_v45 = vmax.f32 %v1208_v43, 0.0  ;;  %v5767_v46 = vpop.f32.mrb[79].mxu0  ;;  %5925 = vmatmul.mubr.msk.f32.gmra.mrb[184].mxu0 %vm267_vm2, %v121_v40  ;;  %v2315_v48 = vmax.f32 %v1903_v44, 0.0  ;;  %v6184_v49 = vpop.f32.mrb[79].mxu1 }
 0x18e   :  { %5927 = vmatprep.mubr.msk.f32.mxu0 %vm6652_vm0, %v6653_v6  ;;  %v2772_v52 = vld [vmem:[#allocation2 + $0x128] sm:$0xff]  ;;  %v127_v49 = vld [vmem:[%s9404_s0 + $0x310] sm:$0xff] }
 0x18f   :  { %2402 = vst.msk [vmem:[#allocation2 + $0x138] sm:$0xff] %vm2362_vm3, %v2176_v45  ;;  %2736 = vrot.lane.b32.xlu1 %v2717_v50, %s6654_s29  ;;  %2541 = vst.msk [vmem:[#allocation2 + $0x590] sm:$0xff] %vm2362_vm3, %v2315_v48 }
 0x190   :  { %2781 = vst.msk [vmem:[#allocation3 + $0x40] sm:$0xff] %vm2362_vm3, %v2772_v52  ;;  %v1213_v53 = vpop.f32.mrb[80].mxu0  ;;  %v1908_v54 = vpop.f32.mrb[80].mxu1 }
 0x191   :  { %v2177_v55 = vmax.f32 %v1213_v53, 0.0  ;;  %5928 = vmatmul.mubr.msk.f32.gmra.mrb[186].mxu0 %vm267_vm2, %v122_v51  ;;  %v2625_v56 = vpop.permute.xlu0 %2624  ;;  %v5770_v57 = vpop.f32.mrb[81].mxu0  ;;  %v2316_v58 = vmax.f32 %v1908_v54, 0.0 }
 0x192   :  { %2652 = vst.msk [vmem:[#allocation3] sm:$0xff] %vm2651_vm4, %v2625_v56  ;;  %5930 = vmatprep.mubr.msk.f32.mxu0 %vm6652_vm0, %v6653_v6  ;;  %v6187_v62 = vpop.f32.mrb[81].mxu1  ;;  %v2773_v63 = vld [vmem:[#allocation2 + $0x130] sm:$0xff] }
 0x193   :  { %2403 = vst.msk [vmem:[#allocation2 + $0x140] sm:$0xff] %vm2362_vm3, %v2177_v55  ;;  %2738 = vrot.lane.b32.xlu1 %v2718_v59, %s6654_s29  ;;  %2542 = vst.msk [vmem:[#allocation2 + $0x598] sm:$0xff] %vm2362_vm3, %v2316_v58  ;;  %v2722_v58 = vld [vmem:[#allocation2 + $0x108] sm:$0xff]  ;;  %v128_v59 = vld [vmem:[%s9404_s0 + $0x318] sm:$0xff] }
 0x194   :  { %2782 = vst.msk [vmem:[#allocation3 + $0x78] sm:$0xff] %vm2362_vm3, %v2773_v63  ;;  %v1218_v1 = vpop.f32.mrb[82].mxu0  ;;  %v1913_v2 = vpop.f32.mrb[82].mxu1 }
 0x195   :  { %v2178_v3 = vmax.f32 %v1218_v1, 0.0  ;;  %5931 = vmatmul.mubr.msk.f32.gmra.mrb[188].mxu0 %vm267_vm2, %v123_v61  ;;  %v2627_v4 = vpop.permute.xlu1 %2626  ;;  %v5773_v5 = vpop.f32.mrb[83].mxu0  ;;  %v2317_v7 = vmax.f32 %v1913_v2, 0.0  ;;  %v3438_v2 = vld [vmem:[#allocation2 + $0x560] sm:$0xff] }
 0x196   :  { %2653 = vst.msk [vmem:[#allocation3 + $0x38] sm:$0xff] %vm2651_vm4, %v2627_v4  ;;  %5933 = vmatprep.mubr.msk.f32.mxu0 %vm6652_vm0, %v6653_v6  ;;  %v6190_v10 = vpop.f32.mrb[83].mxu1  ;;  %v2774_v11 = vld [vmem:[#allocation2 + $0x138] sm:$0xff] }
 0x197   :  { %2404 = vst.msk [vmem:[#allocation2 + $0x148] sm:$0xff] %vm2362_vm3, %v2178_v3  ;;  %2740 = vrot.lane.b32.xlu1 %v2719_v8, %s6654_s29  ;;  %2543 = vst.msk [vmem:[#allocation2 + $0x5a0] sm:$0xff] %vm2362_vm3, %v2317_v7 }
 0x198   :  { %2783 = vst.msk [vmem:[#allocation3 + $0xb0] sm:$0xff] %vm2362_vm3, %v2774_v11  ;;  %v1223_v13 = vpop.f32.mrb[84].mxu0  ;;  %v1918_v14 = vpop.f32.mrb[84].mxu1 }
 0x199   :  { %v2179_v18 = vmax.f32 %v1223_v13, 0.0  ;;  %5934 = vmatmul.mubr.msk.f32.gmra.mrb[190].mxu0 %vm267_vm2, %v124_v9  ;;  %v2629_v19 = vpop.permute.xlu1 %2628  ;;  %v5776_v20 = vpop.f32.mrb[85].mxu0  ;;  %v2318_v21 = vmax.f32 %v1918_v14, 0.0  ;;  %v129_v9 = vld [vmem:[%s9404_s0 + $0x320] sm:$0xff] }
 0x19a   :  { %2654 = vst.msk [vmem:[#allocation3 + $0x70] sm:$0xff] %vm2651_vm4, %v2629_v19  ;;  %5936 = vmatprep.mubr.msk.f32.mxu0 %vm6652_vm0, %v6653_v6  ;;  %v6193_v27 = vpop.f32.mrb[85].mxu1  ;;  %v2775_v29 = vld [vmem:[#allocation2 + $0x140] sm:$0xff]  ;;  %v2723_v20 = vld [vmem:[#allocation2 + $0x110] sm:$0xff] }
 0x19b   :  { %2405 = vst.msk [vmem:[#allocation2 + $0x150] sm:$0xff] %vm2362_vm3, %v2179_v18  ;;  %2742 = vrot.lane.b32.xlu1 %v2720_v25, %s6654_s29  ;;  %2544 = vst.msk [vmem:[#allocation2 + $0x5a8] sm:$0xff] %vm2362_vm3, %v2318_v21  ;;  %v3439_v27 = vld [vmem:[#allocation2 + $0x568] sm:$0xff] }
 0x19c   :  { %2784 = vst.msk [vmem:[#allocation3 + $0xe8] sm:$0xff] %vm2362_vm3, %v2775_v29  ;;  %v1228_v30 = vpop.f32.mrb[86].mxu0  ;;  %v1923_v31 = vpop.f32.mrb[86].mxu1 }
 0x19d   :  { %v2180_v32 = vmax.f32 %v1228_v30, 0.0  ;;  %5937 = vmatmul.mubr.msk.f32.gmra.mrb[192].mxu0 %vm267_vm2, %v125_v26  ;;  %v2631_v33 = vpop.permute.xlu1 %2630  ;;  %v5779_v34 = vpop.f32.mrb[87].mxu0  ;;  %v2319_v35 = vmax.f32 %v1923_v31, 0.0 }
 0x19e   :  { %2655 = vst.msk [vmem:[#allocation3 + $0xa8] sm:$0xff] %vm2651_vm4, %v2631_v33  ;;  %5939 = vmatprep.mubr.msk.f32.mxu0 %vm6652_vm0, %v6653_v6  ;;  %v6196_v38 = vpop.f32.mrb[87].mxu1  ;;  %v2776_v39 = vld [vmem:[#allocation2 + $0x148] sm:$0xff]  ;;  %v3491_v63 = vld [vmem:[#allocation2 + $0x5a0] sm:$0xff]  ;;  %v131_v34 = vld [vmem:[%s9404_s0 + $0x330] sm:$0xff] }
 0x19f   :  { %2406 = vst.msk [vmem:[#allocation2 + $0x158] sm:$0xff] %vm2362_vm3, %v2180_v32  ;;  %2744 = vrot.lane.b32.xlu1 %v2721_v36, %s6654_s29  ;;  %2545 = vst.msk [vmem:[#allocation2 + $0x5b0] sm:$0xff] %vm2362_vm3, %v2319_v35 }
 0x1a0   :  { %2785 = vst.msk [vmem:[#allocation3 + $0x120] sm:$0xff] %vm2362_vm3, %v2776_v39  ;;  %v1233_v40 = vpop.f32.mrb[88].mxu0  ;;  %v1928_v43 = vpop.f32.mrb[88].mxu1  ;;  %3500 = vst.msk [vmem:[#allocation3 + $0x28] sm:$0xff] %vm2362_vm3, %v3491_v63 }
 0x1a1   :  { %v2181_v44 = vmax.f32 %v1233_v40, 0.0  ;;  %5940 = vmatmul.mubr.msk.f32.gmra.mrb[194].mxu0 %vm267_vm2, %v126_v37  ;;  %v2633_v45 = vpop.permute.xlu1 %2632  ;;  %v5782_v46 = vpop.f32.mrb[89].mxu0  ;;  %v2320_v48 = vmax.f32 %v1928_v43, 0.0 }
 0x1a2   :  { %2656 = vst.msk [vmem:[#allocation3 + $0xe0] sm:$0xff] %vm2651_vm4, %v2633_v45  ;;  %5942 = vmatprep.mubr.msk.f32.mxu0 %vm6652_vm0, %v6653_v6  ;;  %v6199_v50 = vpop.f32.mrb[89].mxu1  ;;  %v2777_v51 = vld [vmem:[#allocation2 + $0x150] sm:$0xff]  ;;  %v3492_v13 = vld [vmem:[#allocation2 + $0x5a8] sm:$0xff]  ;;  %v132_v46 = vld [vmem:[%s9404_s0 + $0x338] sm:$0xff] }
 0x1a3   :  { %2407 = vst.msk [vmem:[#allocation2 + $0x160] sm:$0xff] %vm2362_vm3, %v2181_v44  ;;  %3455 = vrot.lane.b32.xlu1 %v3437_v41, %s6654_s29  ;;  %2546 = vst.msk [vmem:[#allocation2 + $0x5b8] sm:$0xff] %vm2362_vm3, %v2320_v48  ;;  %v2724_v44 = vld [vmem:[#allocation2 + $0x118] sm:$0xff] }
 0x1a4   :  { %2786 = vst.msk [vmem:[#allocation3 + $0x158] sm:$0xff] %vm2362_vm3, %v2777_v51  ;;  %v1238_v52 = vpop.f32.mrb[90].mxu0  ;;  %v1933_v53 = vpop.f32.mrb[90].mxu1  ;;  %3501 = vst.msk [vmem:[#allocation3 + $0x60] sm:$0xff] %vm2362_vm3, %v3492_v13 }
 0x1a5   :  { %v2182_v54 = vmax.f32 %v1238_v52, 0.0  ;;  %5943 = vmatmul.mubr.msk.f32.gmra.mrb[196].mxu0 %vm267_vm2, %v127_v49  ;;  %v2635_v55 = vpop.permute.xlu1 %2634  ;;  %v5785_v56 = vpop.f32.mrb[91].mxu0  ;;  %v2321_v57 = vmax.f32 %v1933_v53, 0.0  ;;  %v3440_v52 = vld [vmem:[#allocation2 + $0x570] sm:$0xff] }
 0x1a6   :  { %2657 = vst.msk [vmem:[#allocation3 + $0x118] sm:$0xff] %vm2651_vm4, %v2635_v55  ;;  %5945 = vmatprep.mubr.msk.f32.mxu0 %vm6652_vm0, %v6653_v6  ;;  %v6202_v61 = vpop.f32.mrb[91].mxu1  ;;  %v2778_v62 = vld [vmem:[#allocation2 + $0x158] sm:$0xff]  ;;  %v3493_v25 = vld [vmem:[#allocation2 + $0x5b0] sm:$0xff] }
 0x1a7   :  { %2408 = vst.msk [vmem:[#allocation2 + $0x168] sm:$0xff] %vm2362_vm3, %v2182_v54  ;;  %2746 = vrot.lane.b32.xlu1 %v2722_v58, %s6654_s29  ;;  %2547 = vst.msk [vmem:[#allocation2 + $0x5c0] sm:$0xff] %vm2362_vm3, %v2321_v57  ;;  %v133_v58 = vld [vmem:[%s9404_s0 + $0x340] sm:$0xff] }
 0x1a8   :  { %2787 = vst.msk [vmem:[#allocation3 + $0x190] sm:$0xff] %vm2362_vm3, %v2778_v62  ;;  %v1243_v1 = vpop.f32.mrb[92].mxu0  ;;  %v1938_v3 = vpop.f32.mrb[92].mxu1  ;;  %3502 = vst.msk [vmem:[#allocation3 + $0x98] sm:$0xff] %vm2362_vm3, %v3493_v25 }
 0x1a9   :  { %v2183_v4 = vmax.f32 %v1243_v1, 0.0  ;;  %5946 = vmatmul.mubr.msk.f32.gmra.mrb[198].mxu0 %vm267_vm2, %v128_v59  ;;  %v3348_v5 = vpop.permute.xlu1 %3347  ;;  %v5788_v7 = vpop.f32.mrb[93].mxu0  ;;  %v2322_v8 = vmax.f32 %v1938_v3, 0.0 }
 0x1aa   :  { %3374 = vst.msk [vmem:[#allocation3 + $0x20] sm:$0xff] %vm2651_vm4, %v3348_v5  ;;  %5948 = vmatprep.mubr.msk.f32.mxu0 %vm6652_vm0, %v6653_v6  ;;  %v6205_v10 = vpop.f32.mrb[93].mxu1  ;;  %v2779_v11 = vld [vmem:[#allocation2 + $0x160] sm:$0xff]  ;;  %v3494_v36 = vld [vmem:[#allocation2 + $0x5b8] sm:$0xff]  ;;  %v134_v7 = vld [vmem:[%s9404_s0 + $0x348] sm:$0xff] }
 0x1ab   :  { %2409 = vst.msk [vmem:[#allocation2 + $0x170] sm:$0xff] %vm2362_vm3, %v2183_v4  ;;  %3457 = vrot.lane.b32.xlu1 %v3438_v2, %s6654_s29  ;;  %2548 = vst.msk [vmem:[#allocation2 + $0x5c8] sm:$0xff] %vm2362_vm3, %v2322_v8 }
 0x1ac   :  { %2788 = vst.msk [vmem:[#allocation3 + $0x1c8] sm:$0xff] %vm2362_vm3, %v2779_v11  ;;  %v1248_v14 = vpop.f32.mrb[94].mxu0  ;;  %v1943_v15 = vpop.f32.mrb[94].mxu1  ;;  %3503 = vst.msk [vmem:[#allocation3 + $0xd0] sm:$0xff] %vm2362_vm3, %v3494_v36 }
 0x1ad   :  { %v2184_v16 = vmax.f32 %v1248_v14, 0.0  ;;  %5949 = vmatmul.mubr.msk.f32.gmra.mrb[200].mxu0 %vm267_vm2, %v129_v9  ;;  %v2637_v17 = vpop.permute.xlu1 %2636  ;;  %v5791_v18 = vpop.f32.mrb[95].mxu0  ;;  %v2323_v19 = vmax.f32 %v1943_v15, 0.0 }
 0x1ae   :  { %2658 = vst.msk [vmem:[#allocation3 + $0x150] sm:$0xff] %vm2651_vm4, %v2637_v17  ;;  %v2789_v21 = vld [vmem:[#allocation2 + $0x168] sm:$0xff]  ;;  %5951 = vmatprep.mubr.msk.f32.mxu0 %vm6652_vm0, %v6653_v6  ;;  %v6208_v23 = vpop.f32.mrb[95].mxu1  ;;  %v3495_v49 = vld [vmem:[#allocation2 + $0x5c0] sm:$0xff]  ;;  %v135_v18 = vld [vmem:[%s9404_s0 + $0x350] sm:$0xff] }
 0x1af   :  { %2410 = vst.msk [vmem:[#allocation2 + $0x178] sm:$0xff] %vm2362_vm3, %v2184_v16  ;;  %2748 = vrot.lane.b32.xlu1 %v2723_v20, %s6654_s29  ;;  %2807 = vrot.lane.b32.xlu0 %v2789_v21, %s6655_s21  ;;  %2549 = vst.msk [vmem:[#allocation2 + $0x5d0] sm:$0xff] %vm2362_vm3, %v2323_v19  ;;  %v3770_v20 = vld [vmem:[%s9405_s2 + $0x90] sm:$0xff]  ;;  %v3771_v21 = vld [vmem:[%s9405_s2 + $0x98] sm:$0xff] }
 0x1b0   :  { %v1253_v26 = vpop.f32.mrb[96].mxu0  ;;  %v1948_v28 = vpop.f32.mrb[96].mxu1  ;;  %3504 = vst.msk [vmem:[#allocation3 + $0x108] sm:$0xff] %vm2362_vm3, %v3495_v49 }
 0x1b1   :  { %v2185_v29 = vmax.f32 %v1253_v26, 0.0  ;;  %5952 = vmatmul.mubr.msk.f32.gmra.mrb[202].mxu0 %vm267_vm2, %v130_v22  ;;  %v3350_v30 = vpop.permute.xlu1 %3349  ;;  %v5794_v31 = vpop.f32.mrb[97].mxu0  ;;  %v2324_v32 = vmax.f32 %v1948_v28, 0.0  ;;  %v3754_v22 = vld [vmem:[%s9405_s2 + $0x10] sm:$0xff]  ;;  %v3755_v28 = vld [vmem:[%s9405_s2 + $0x18] sm:$0xff] }
 0x1b2   :  { %3375 = vst.msk [vmem:[#allocation3 + $0x58] sm:$0xff] %vm2651_vm4, %v3350_v30  ;;  %v2790_v33 = vld [vmem:[#allocation2 + $0x170] sm:$0xff]  ;;  %5954 = vmatprep.mubr.msk.f32.mxu0 %vm6652_vm0, %v6653_v6  ;;  %v6211_v35 = vpop.f32.mrb[97].mxu1  ;;  %v3496_v61 = vld [vmem:[#allocation2 + $0x5c8] sm:$0xff] }
 0x1b3   :  { %2411 = vst.msk [vmem:[#allocation2 + $0x180] sm:$0xff] %vm2362_vm3, %v2185_v29  ;;  %3459 = vrot.lane.b32.xlu1 %v3439_v27, %s6654_s29  ;;  %2809 = vrot.lane.b32.xlu0 %v2790_v33, %s6655_s21  ;;  %2550 = vst.msk [vmem:[#allocation2 + $0x5d8] sm:$0xff] %vm2362_vm3, %v2324_v32  ;;  %v6418_v27 = vpack.c.bf16 %v3771_v21, %v3770_v20  ;;  %v136_v35 = vld [vmem:[%s9404_s0 + $0x358] sm:$0xff]  ;;  %v241_v20 = vld [vmem:[%s9404_s0 + $0x6a0] sm:$0xff] }
 0x1b4   :  { %v1258_v37 = vpop.f32.mrb[98].mxu0  ;;  %v1953_v38 = vpop.f32.mrb[98].mxu1  ;;  %3505 = vst.msk [vmem:[#allocation3 + $0x140] sm:$0xff] %vm2362_vm3, %v3496_v61 }
 0x1b5   :  { %v2186_v39 = vmax.f32 %v1258_v37, 0.0  ;;  %5955 = vmatmul.mubr.msk.f32.gmra.mrb[204].mxu0 %vm267_vm2, %v131_v34  ;;  %v2639_v40 = vpop.permute.xlu1 %2638  ;;  %v5797_v41 = vpop.f32.mrb[99].mxu0  ;;  %v2325_v43 = vmax.f32 %v1953_v38, 0.0  ;;  %v6420_v34 = vpack.c.bf16 %v3755_v28, %v3754_v22  ;;  %6419 = vmatprep.subr.bf16.mxu1 %v6418_v27  ;;  %v141_v27 = vld [vmem:[%s9404_s0 + $0x380] sm:$0xff] }
 0x1b6   :  { %2659 = vst.msk [vmem:[#allocation3 + $0x188] sm:$0xff] %vm2651_vm4, %v2639_v40  ;;  %v2791_v45 = vld [vmem:[#allocation2 + $0x178] sm:$0xff]  ;;  %5957 = vmatprep.mubr.msk.f32.mxu0 %vm6652_vm0, %v6653_v6  ;;  %v6214_v48 = vpop.f32.mrb[99].mxu1  ;;  %v3497_v9 = vld [vmem:[#allocation2 + $0x5d0] sm:$0xff] }
 0x1b7   :  { %2412 = vst.msk [vmem:[#allocation2 + $0x188] sm:$0xff] %vm2362_vm3, %v2186_v39  ;;  %2750 = vrot.lane.b32.xlu1 %v2724_v44, %s6654_s29  ;;  %2811 = vrot.lane.b32.xlu0 %v2791_v45, %s6655_s21  ;;  %2551 = vst.msk [vmem:[#allocation2 + $0x5e0] sm:$0xff] %vm2362_vm3, %v2325_v43 }
 0x1b8   :  { %v1263_v50 = vpop.f32.mrb[100].mxu0  ;;  %v1958_v51 = vpop.f32.mrb[100].mxu1  ;;  %3506 = vst.msk [vmem:[#allocation3 + $0x178] sm:$0xff] %vm2362_vm3, %v3497_v9  ;;  %6421 = vmatpush3.bf16.msra.mxu1 %v6420_v34 }
 0x1b9   :  { %v2187_v53 = vmax.f32 %v1263_v50, 0.0  ;;  %5958 = vmatmul.mubr.msk.f32.gmra.mrb[206].mxu0 %vm267_vm2, %v132_v46  ;;  %v3352_v54 = vpop.permute.xlu1 %3351  ;;  %v5800_v55 = vpop.f32.mrb[101].mxu0  ;;  %v2326_v56 = vmax.f32 %v1958_v51, 0.0  ;;  %v137_v46 = vld [vmem:[%s9404_s0 + $0x360] sm:$0xff] }
 0x1ba   :  { %3376 = vst.msk [vmem:[#allocation3 + $0x90] sm:$0xff] %vm2651_vm4, %v3352_v54  ;;  %v2792_v57 = vld [vmem:[#allocation2 + $0x180] sm:$0xff]  ;;  %5960 = vmatprep.mubr.msk.f32.mxu0 %vm6652_vm0, %v6653_v6  ;;  %v6217_v59 = vpop.f32.mrb[101].mxu1  ;;  %v3498_v29 = vld [vmem:[#allocation2 + $0x5d8] sm:$0xff] }
 0x1bb   :  { %2413 = vst.msk [vmem:[#allocation2 + $0x190] sm:$0xff] %vm2362_vm3, %v2187_v53  ;;  %2813 = vrot.lane.b32.xlu0 %v2792_v57, %s6655_s21  ;;  %2552 = vst.msk [vmem:[#allocation2 + $0x5e8] sm:$0xff] %vm2362_vm3, %v2326_v56  ;;  %3461 = vrot.lane.b32.xlu1 %v3440_v52, %s6654_s29  ;;  %v240_v52 = vld [vmem:[%s9404_s0 + $0x698] sm:$0xff]  ;;  %v138_v57 = vld [vmem:[%s9404_s0 + $0x368] sm:$0xff] }
 0x1bc   :  { %v1268_v62 = vpop.f32.mrb[102].mxu0  ;;  %v1963_v63 = vpop.f32.mrb[102].mxu1  ;;  %3507 = vst.msk [vmem:[#allocation3 + $0x1b0] sm:$0xff] %vm2362_vm3, %v3498_v29  ;;  %6282 = vmatmul.mubr.msk.f32.gmra.mrb[144].mxu1 %vm267_vm2, %v240_v52 }
 0x1bd   :  { %v2188_v1 = vmax.f32 %v1268_v62, 0.0  ;;  %5961 = vmatmul.mubr.msk.f32.gmra.mrb[208].mxu0 %vm267_vm2, %v133_v58  ;;  %v2641_v2 = vpop.permute.xlu1 %2640  ;;  %v5803_v3 = vpop.f32.mrb[103].mxu0  ;;  %v2327_v4 = vmax.f32 %v1963_v63, 0.0  ;;  %6284 = vmatprep.mubr.msk.f32.mxu1 %vm6652_vm0, %v6653_v6 }
 0x1be   :  { %2660 = vst.msk [vmem:[#allocation3 + $0x1c0] sm:$0xff] %vm2651_vm4, %v2641_v2  ;;  %v2793_v5 = vld [vmem:[#allocation2 + $0x188] sm:$0xff]  ;;  %5963 = vmatprep.mubr.msk.f32.mxu0 %vm6652_vm0, %v6653_v6  ;;  %v6220_v8 = vpop.f32.mrb[103].mxu1  ;;  %v3499_v37 = vld [vmem:[#allocation2 + $0x5e0] sm:$0xff] }
 0x1bf   :  { %2414 = vst.msk [vmem:[#allocation2 + $0x198] sm:$0xff] %vm2362_vm3, %v2188_v1  ;;  %2815 = vrot.lane.b32.xlu0 %v2793_v5, %s6655_s21  ;;  %2553 = vst.msk [vmem:[#allocation2 + $0x5f0] sm:$0xff] %vm2362_vm3, %v2327_v4  ;;  %v139_v5 = vld [vmem:[%s9404_s0 + $0x370] sm:$0xff] }
 0x1c0   :  { %v1273_v10 = vpop.f32.mrb[104].mxu0  ;;  %v1968_v11 = vpop.f32.mrb[104].mxu1  ;;  %3508 = vst.msk [vmem:[#allocation3 + $0x1e8] sm:$0xff] %vm2362_vm3, %v3499_v37  ;;  %6285 = vmatmul.mubr.msk.f32.gmra.mrb[146].mxu1 %vm267_vm2, %v241_v20  ;;  %v3773_v20 = vld [vmem:[%s9405_s2 + $0xa8] sm:$0xff] }
 0x1c1   :  { %v2189_v13 = vmax.f32 %v1273_v10, 0.0  ;;  %5964 = vmatmul.mubr.msk.f32.gmra.mrb[210].mxu0 %vm267_vm2, %v134_v7  ;;  %v3354_v14 = vpop.permute.xlu1 %3353  ;;  %v5806_v15 = vpop.f32.mrb[105].mxu0  ;;  %v2328_v16 = vmax.f32 %v1968_v11, 0.0  ;;  %6287 = vmatprep.mubr.msk.f32.mxu1 %vm6652_vm0, %v6653_v6 }
 0x1c2   :  { %3377 = vst.msk [vmem:[#allocation3 + $0xc8] sm:$0xff] %vm2651_vm4, %v3354_v14  ;;  %v2794_v17 = vld [vmem:[#allocation2 + $0x190] sm:$0xff]  ;;  %5966 = vmatprep.mubr.msk.f32.mxu0 %vm6652_vm0, %v6653_v6  ;;  %v6223_v19 = vpop.f32.mrb[105].mxu1  ;;  %v3509_v25 = vld [vmem:[#allocation2 + $0x5e8] sm:$0xff] }
 0x1c3   :  { %2415 = vst.msk [vmem:[#allocation2 + $0x1a0] sm:$0xff] %vm2362_vm3, %v2189_v13  ;;  %2817 = vrot.lane.b32.xlu0 %v2794_v17, %s6655_s21  ;;  %2554 = vst.msk [vmem:[#allocation2 + $0x5f8] sm:$0xff] %vm2362_vm3, %v2328_v16  ;;  %v140_v16 = vld [vmem:[%s9404_s0 + $0x378] sm:$0xff] }
 0x1c4   :  { %v1278_v23 = vpop.f32.mrb[106].mxu0  ;;  %v1973_v26 = vpop.f32.mrb[106].mxu1 }
 0x1c5   :  { %v2190_v30 = vmax.f32 %v1278_v23, 0.0  ;;  %5967 = vmatmul.mubr.msk.f32.gmra.mrb[212].mxu0 %vm267_vm2, %v135_v18  ;;  %v2680_v31 = vpop.permute.xlu1 %2679  ;;  %v5809_v32 = vpop.f32.mrb[107].mxu0  ;;  %v2329_v33 = vmax.f32 %v1973_v26, 0.0 }
 0x1c6   :  { %2707 = vst.msk [vmem:[#allocation3] sm:$0xff] %vm2706_vm5, %v2680_v31  ;;  %5969 = vmatprep.mubr.msk.f32.mxu0 %vm6652_vm0, %v6653_v6  ;;  %v6226_v36 = vpop.f32.mrb[107].mxu1  ;;  %v2795_v45 = vld [vmem:[#allocation2 + $0x198] sm:$0xff]  ;;  %v3510_v50 = vld [vmem:[#allocation2 + $0x5f0] sm:$0xff] }
 0x1c7   :  { %2416 = vst.msk [vmem:[#allocation2 + $0x1a8] sm:$0xff] %vm2362_vm3, %v2190_v30  ;;  %3527 = vrot.lane.b32.xlu0 %v3509_v25, %s6655_s21  ;;  %2555 = vst.msk [vmem:[#allocation2 + $0x600] sm:$0xff] %vm2362_vm3, %v2329_v33  ;;  %v142_v36 = vld [vmem:[%s9404_s0 + $0x388] sm:$0xff] }
 0x1c8   :  { %v1283_v38 = vpop.f32.mrb[108].mxu0  ;;  %v1978_v39 = vpop.f32.mrb[108].mxu1 }
 0x1c9   :  { %v2191_v40 = vmax.f32 %v1283_v38, 0.0  ;;  %5970 = vmatmul.mubr.msk.f32.gmra.mrb[214].mxu0 %vm267_vm2, %v136_v35  ;;  %v3356_v41 = vpop.permute.xlu1 %3355  ;;  %v5812_v43 = vpop.f32.mrb[109].mxu0  ;;  %v2330_v44 = vmax.f32 %v1978_v39, 0.0 }
 0x1ca   :  { %3378 = vst.msk [vmem:[#allocation3 + $0x100] sm:$0xff] %vm2651_vm4, %v3356_v41  ;;  %5972 = vmatprep.mubr.msk.f32.mxu0 %vm6652_vm0, %v6653_v6  ;;  %v6229_v48 = vpop.f32.mrb[109].mxu1  ;;  %v2796_v3 = vld [vmem:[#allocation2 + $0x1a0] sm:$0xff]  ;;  %v3511_v9 = vld [vmem:[#allocation2 + $0x5f8] sm:$0xff] }
 0x1cb   :  { %2417 = vst.msk [vmem:[#allocation2 + $0x1b0] sm:$0xff] %vm2362_vm3, %v2191_v40  ;;  %2819 = vrot.lane.b32.xlu0 %v2795_v45, %s6655_s21  ;;  %2556 = vst.msk [vmem:[#allocation2 + $0x608] sm:$0xff] %vm2362_vm3, %v2330_v44 }
 0x1cc   :  { %v1288_v49 = vpop.f32.mrb[110].mxu0  ;;  %v1983_v51 = vpop.f32.mrb[110].mxu1 }
 0x1cd   :  { %v2192_v53 = vmax.f32 %v1288_v49, 0.0  ;;  %5973 = vmatmul.mubr.msk.f32.gmra.mrb[216].mxu0 %vm267_vm2, %v137_v46  ;;  %v2682_v54 = vpop.permute.xlu1 %2681  ;;  %v5815_v55 = vpop.f32.mrb[111].mxu0  ;;  %v2331_v56 = vmax.f32 %v1983_v51, 0.0  ;;  %v143_v46 = vld [vmem:[%s9404_s0 + $0x390] sm:$0xff]  ;;  %v242_v49 = vld [vmem:[%s9404_s0 + $0x6a8] sm:$0xff] }
 0x1ce   :  { %2708 = vst.msk [vmem:[#allocation3 + $0x38] sm:$0xff] %vm2706_vm5, %v2682_v54  ;;  %5975 = vmatprep.mubr.msk.f32.mxu0 %vm6652_vm0, %v6653_v6  ;;  %v6232_v58 = vpop.f32.mrb[111].mxu1  ;;  %v2797_v26 = vld [vmem:[#allocation2 + $0x1a8] sm:$0xff]  ;;  %v3512_v30 = vld [vmem:[#allocation2 + $0x600] sm:$0xff]  ;;  %6288 = vmatmul.mubr.msk.f32.gmra.mrb[148].mxu1 %vm267_vm2, %v242_v49 }
 0x1cf   :  { %2418 = vst.msk [vmem:[#allocation2 + $0x1b8] sm:$0xff] %vm2362_vm3, %v2192_v53  ;;  %3529 = vrot.lane.b32.xlu0 %v3510_v50, %s6655_s21  ;;  %2557 = vst.msk [vmem:[#allocation2 + $0x610] sm:$0xff] %vm2362_vm3, %v2331_v56  ;;  %6290 = vmatprep.mubr.msk.f32.mxu1 %vm6652_vm0, %v6653_v6 }
 0x1d0   :  { %v1293_v59 = vpop.f32.mrb[112].mxu0  ;;  %v1988_v61 = vpop.f32.mrb[112].mxu1 }
 0x1d1   :  { %v2193_v62 = vmax.f32 %v1293_v59, 0.0  ;;  %5976 = vmatmul.mubr.msk.f32.gmra.mrb[218].mxu0 %vm267_vm2, %v138_v57  ;;  %v2684_v63 = vpop.permute.xlu1 %2683  ;;  %v5818_v1 = vpop.f32.mrb[113].mxu0  ;;  %v2332_v2 = vmax.f32 %v1988_v61, 0.0  ;;  %v144_v57 = vld [vmem:[%s9404_s0 + $0x398] sm:$0xff]  ;;  %v243_v59 = vld [vmem:[%s9404_s0 + $0x6b0] sm:$0xff] }
 0x1d2   :  { %2709 = vst.msk [vmem:[#allocation3 + $0x70] sm:$0xff] %vm2706_vm5, %v2684_v63  ;;  %v2843_v4 = vld [vmem:[#allocation2 + $0x1b0] sm:$0xff]  ;;  %5978 = vmatprep.mubr.msk.f32.mxu0 %vm6652_vm0, %v6653_v6  ;;  %v6235_v7 = vpop.f32.mrb[113].mxu1  ;;  %v3513_v39 = vld [vmem:[#allocation2 + $0x608] sm:$0xff]  ;;  %6291 = vmatmul.mubr.msk.f32.gmra.mrb[150].mxu1 %vm267_vm2, %v243_v59 }
 0x1d3   :  { %2419 = vst.msk [vmem:[#allocation2 + $0x1c0] sm:$0xff] %vm2362_vm3, %v2193_v62  ;;  %2821 = vrot.lane.b32.xlu0 %v2796_v3, %s6655_s21  ;;  %2861 = vrot.lane.b32.xlu1 %v2843_v4, %s6656_s15  ;;  %2558 = vst.msk [vmem:[#allocation2 + $0x618] sm:$0xff] %vm2362_vm3, %v2332_v2 }
 0x1d4   :  { %v1298_v8 = vpop.f32.mrb[114].mxu0  ;;  %v1993_v10 = vpop.f32.mrb[114].mxu1  ;;  %6293 = vmatprep.mubr.msk.f32.mxu1 %vm6652_vm0, %v6653_v6 }
 0x1d5   :  { %v2194_v11 = vmax.f32 %v1298_v8, 0.0  ;;  %5979 = vmatmul.mubr.msk.f32.gmra.mrb[220].mxu0 %vm267_vm2, %v139_v5  ;;  %v2686_v13 = vpop.permute.xlu1 %2685  ;;  %v5821_v14 = vpop.f32.mrb[115].mxu0  ;;  %v2333_v15 = vmax.f32 %v1993_v10, 0.0  ;;  %v145_v5 = vld [vmem:[%s9404_s0 + $0x3a0] sm:$0xff]  ;;  %v244_v8 = vld [vmem:[%s9404_s0 + $0x6b8] sm:$0xff] }
 0x1d6   :  { %2710 = vst.msk [vmem:[#allocation3 + $0xa8] sm:$0xff] %vm2706_vm5, %v2686_v13  ;;  %5981 = vmatprep.mubr.msk.f32.mxu0 %vm6652_vm0, %v6653_v6  ;;  %v6238_v17 = vpop.f32.mrb[115].mxu1  ;;  %v2844_v56 = vld [vmem:[#allocation2 + $0x1b8] sm:$0xff]  ;;  %6294 = vmatmul.mubr.msk.f32.gmra.mrb[152].mxu1 %vm267_vm2, %v244_v8 }
 0x1d7   :  { %2420 = vst.msk [vmem:[#allocation2 + $0x1c8] sm:$0xff] %vm2362_vm3, %v2194_v11  ;;  %3531 = vrot.lane.b32.xlu0 %v3511_v9, %s6655_s21  ;;  %2559 = vst.msk [vmem:[#allocation2 + $0x620] sm:$0xff] %vm2362_vm3, %v2333_v15  ;;  %6296 = vmatprep.mubr.msk.f32.mxu1 %vm6652_vm0, %v6653_v6  ;;  %v146_v17 = vld [vmem:[%s9404_s0 + $0x3a8] sm:$0xff] }
 0x1d8   :  { %v1303_v18 = vpop.f32.mrb[116].mxu0  ;;  %v1998_v19 = vpop.f32.mrb[116].mxu1 }
 0x1d9   :  { %v2195_v21 = vmax.f32 %v1303_v18, 0.0  ;;  %5982 = vmatmul.mubr.msk.f32.gmra.mrb[222].mxu0 %vm267_vm2, %v140_v16  ;;  %v2688_v22 = vpop.permute.xlu1 %2687  ;;  %v5824_v23 = vpop.f32.mrb[117].mxu0  ;;  %v2334_v25 = vmax.f32 %v1998_v19, 0.0  ;;  %v3772_v19 = vld [vmem:[%s9405_s2 + $0xa0] sm:$0xff] }
 0x1da   :  { %2711 = vst.msk [vmem:[#allocation3 + $0xe0] sm:$0xff] %vm2706_vm5, %v2688_v22  ;;  %5984 = vmatprep.mubr.msk.f32.mxu0 %vm6652_vm0, %v6653_v6  ;;  %v6241_v28 = vpop.f32.mrb[117].mxu1  ;;  %v2845_v4 = vld [vmem:[#allocation2 + $0x1c0] sm:$0xff] }
 0x1db   :  { %2421 = vst.msk [vmem:[#allocation2 + $0x1d0] sm:$0xff] %vm2362_vm3, %v2195_v21  ;;  %2823 = vrot.lane.b32.xlu0 %v2797_v26, %s6655_s21  ;;  %2560 = vst.msk [vmem:[#allocation2 + $0x628] sm:$0xff] %vm2362_vm3, %v2334_v25  ;;  %v3756_v21 = vld [vmem:[%s9405_s2 + $0x20] sm:$0xff]  ;;  %v6422_v25 = vpack.c.bf16 %v3773_v20, %v3772_v19  ;;  %v3757_v26 = vld [vmem:[%s9405_s2 + $0x28] sm:$0xff] }
 0x1dc   :  { %v1308_v29 = vpop.f32.mrb[118].mxu0  ;;  %v2003_v31 = vpop.f32.mrb[118].mxu1 }
 0x1dd   :  { %v2196_v32 = vmax.f32 %v1308_v29, 0.0  ;;  %5985 = vmatmul.mubr.msk.f32.gmra.mrb[224].mxu0 %vm267_vm2, %v141_v27  ;;  %v2690_v33 = vpop.permute.xlu1 %2689  ;;  %v5827_v34 = vpop.f32.mrb[119].mxu0  ;;  %v2335_v35 = vmax.f32 %v2003_v31, 0.0  ;;  %v245_v27 = vld [vmem:[%s9404_s0 + $0x6c0] sm:$0xff]  ;;  %6423 = vmatprep.subr.bf16.mxu1 %v6422_v25  ;;  %v151_v25 = vld [vmem:[%s9404_s0 + $0x3d0] sm:$0xff] }
 0x1de   :  { %2712 = vst.msk [vmem:[#allocation3 + $0x118] sm:$0xff] %vm2706_vm5, %v2690_v33  ;;  %5987 = vmatprep.mubr.msk.f32.mxu0 %vm6652_vm0, %v6653_v6  ;;  %v6244_v37 = vpop.f32.mrb[119].mxu1  ;;  %v2846_v16 = vld [vmem:[#allocation2 + $0x1c8] sm:$0xff]  ;;  %6297 = vmatmul.mubr.msk.f32.gmra.mrb[154].mxu1 %vm267_vm2, %v245_v27  ;;  %v147_v34 = vld [vmem:[%s9404_s0 + $0x3b0] sm:$0xff] }
 0x1df   :  { %2422 = vst.msk [vmem:[#allocation2 + $0x1d8] sm:$0xff] %vm2362_vm3, %v2196_v32  ;;  %3533 = vrot.lane.b32.xlu0 %v3512_v30, %s6655_s21  ;;  %2561 = vst.msk [vmem:[#allocation2 + $0x630] sm:$0xff] %vm2362_vm3, %v2335_v35  ;;  %v6424_v32 = vpack.c.bf16 %v3757_v26, %v3756_v21  ;;  %6299 = vmatprep.mubr.msk.f32.mxu1 %vm6652_vm0, %v6653_v6 }
 0x1e0   :  { %v1313_v38 = vpop.f32.mrb[120].mxu0  ;;  %v2008_v40 = vpop.f32.mrb[120].mxu1 }
 0x1e1   :  { %v2197_v41 = vmax.f32 %v1313_v38, 0.0  ;;  %5988 = vmatmul.mubr.msk.f32.gmra.mrb[226].mxu0 %vm267_vm2, %v142_v36  ;;  %v3402_v43 = vpop.permute.xlu1 %3401  ;;  %v5830_v44 = vpop.f32.mrb[121].mxu0  ;;  %v2336_v45 = vmax.f32 %v2008_v40, 0.0  ;;  %6425 = vmatpush3.bf16.msra.mxu1 %v6424_v32  ;;  %v246_v36 = vld [vmem:[%s9404_s0 + $0x6c8] sm:$0xff] }
 0x1e2   :  { %3428 = vst.msk [vmem:[#allocation3 + $0x20] sm:$0xff] %vm2706_vm5, %v3402_v43  ;;  %5990 = vmatprep.mubr.msk.f32.mxu0 %vm6652_vm0, %v6653_v6  ;;  %v6247_v48 = vpop.f32.mrb[121].mxu1  ;;  %v2847_v33 = vld [vmem:[#allocation2 + $0x1d0] sm:$0xff]  ;;  %6300 = vmatmul.mubr.msk.f32.gmra.mrb[156].mxu1 %vm267_vm2, %v246_v36 }
 0x1e3   :  { %2423 = vst.msk [vmem:[#allocation2 + $0x1e0] sm:$0xff] %vm2362_vm3, %v2197_v41  ;;  %3535 = vrot.lane.b32.xlu0 %v3513_v39, %s6655_s21  ;;  %2562 = vst.msk [vmem:[#allocation2 + $0x638] sm:$0xff] %vm2362_vm3, %v2336_v45  ;;  %v148_v45 = vld [vmem:[%s9404_s0 + $0x3b8] sm:$0xff]  ;;  %6302 = vmatprep.mubr.msk.f32.mxu1 %vm6652_vm0, %v6653_v6  ;;  %v247_v48 = vld [vmem:[%s9404_s0 + $0x6d0] sm:$0xff] }
 0x1e4   :  { %v1318_v50 = vpop.f32.mrb[122].mxu0  ;;  %v2013_v51 = vpop.f32.mrb[122].mxu1 }
 0x1e5   :  { %v2198_v52 = vmax.f32 %v1318_v50, 0.0  ;;  %5991 = vmatmul.mubr.msk.f32.gmra.mrb[228].mxu0 %vm267_vm2, %v143_v46  ;;  %v2692_v53 = vpop.permute.xlu1 %2691  ;;  %v5833_v54 = vpop.f32.mrb[123].mxu0  ;;  %v2337_v55 = vmax.f32 %v2013_v51, 0.0 }
 0x1e6   :  { %2713 = vst.msk [vmem:[#allocation3 + $0x150] sm:$0xff] %vm2706_vm5, %v2692_v53  ;;  %5993 = vmatprep.mubr.msk.f32.mxu0 %vm6652_vm0, %v6653_v6  ;;  %v6250_v58 = vpop.f32.mrb[123].mxu1  ;;  %v2848_v44 = vld [vmem:[#allocation2 + $0x1d8] sm:$0xff]  ;;  %v3563_v50 = vld [vmem:[#allocation2 + $0x630] sm:$0xff]  ;;  %6303 = vmatmul.mubr.msk.f32.gmra.mrb[158].mxu1 %vm267_vm2, %v247_v48 }
 0x1e7   :  { %2424 = vst.msk [vmem:[#allocation2 + $0x1e8] sm:$0xff] %vm2362_vm3, %v2198_v52  ;;  %2863 = vrot.lane.b32.xlu0 %v2844_v56, %s6656_s15  ;;  %2563 = vst.msk [vmem:[#allocation2 + $0x640] sm:$0xff] %vm2362_vm3, %v2337_v55  ;;  %v149_v56 = vld [vmem:[%s9404_s0 + $0x3c0] sm:$0xff]  ;;  %6305 = vmatprep.mubr.msk.f32.mxu1 %vm6652_vm0, %v6653_v6  ;;  %v248_v58 = vld [vmem:[%s9404_s0 + $0x6d8] sm:$0xff] }
 0x1e8   :  { %v1323_v61 = vpop.f32.mrb[124].mxu0  ;;  %v2018_v62 = vpop.f32.mrb[124].mxu1  ;;  %v251_v48 = vld [vmem:[%s9404_s0 + $0x6f0] sm:$0xff] }
 0x1e9   :  { %v2199_v63 = vmax.f32 %v1323_v61, 0.0  ;;  %5994 = vmatmul.mubr.msk.f32.gmra.mrb[230].mxu0 %vm267_vm2, %v144_v57  ;;  %v3404_v1 = vpop.permute.xlu1 %3403  ;;  %v5836_v2 = vpop.f32.mrb[125].mxu0  ;;  %v2338_v3 = vmax.f32 %v2018_v62, 0.0 }
 0x1ea   :  { %3429 = vst.msk [vmem:[#allocation3 + $0x58] sm:$0xff] %vm2706_vm5, %v3404_v1  ;;  %5996 = vmatprep.mubr.msk.f32.mxu0 %vm6652_vm0, %v6653_v6  ;;  %v6253_v7 = vpop.f32.mrb[125].mxu1  ;;  %v150_v2 = vld [vmem:[%s9404_s0 + $0x3c8] sm:$0xff]  ;;  %6306 = vmatmul.mubr.msk.f32.gmra.mrb[160].mxu1 %vm267_vm2, %v248_v58 }
 0x1eb   :  { %2425 = vst.msk [vmem:[#allocation2 + $0x1f0] sm:$0xff] %vm2362_vm3, %v2199_v63  ;;  %2865 = vrot.lane.b32.xlu0 %v2845_v4, %s6656_s15  ;;  %2564 = vst.msk [vmem:[#allocation2 + $0x648] sm:$0xff] %vm2362_vm3, %v2338_v3  ;;  %v3774_v4 = vld [vmem:[%s9405_s2 + $0xb0] sm:$0xff]  ;;  %v2849_v7 = vld [vmem:[#allocation2 + $0x1e0] sm:$0xff]  ;;  %6308 = vmatprep.mubr.msk.f32.mxu1 %vm6652_vm0, %v6653_v6 }
 0x1ec   :  { %v1328_v9 = vpop.f32.mrb[126].mxu0  ;;  %v2023_v10 = vpop.f32.mrb[126].mxu1  ;;  %v3781_v58 = vld [vmem:[%s9405_s2 + $0xe8] sm:$0xff] }
 0x1ed   :  { %v2200_v11 = vmax.f32 %v1328_v9, 0.0  ;;  %5997 = vmatmul.mubr.msk.f32.gmra.mrb[232].mxu0 %vm267_vm2, %v145_v5  ;;  %v2694_v13 = vpop.permute.xlu1 %2693  ;;  %v5839_v14 = vpop.f32.mrb[127].mxu0  ;;  %v2339_v15 = vmax.f32 %v2023_v10, 0.0  ;;  %v3775_v5 = vld [vmem:[%s9405_s2 + $0xb8] sm:$0xff]  ;;  %v3758_v10 = vld [vmem:[%s9405_s2 + $0x30] sm:$0xff] }
 0x1ee   :  { %2714 = vst.msk [vmem:[#allocation3 + $0x188] sm:$0xff] %vm2706_vm5, %v2694_v13  ;;  %5999 = vmatprep.mubr.msk.f32.mxu0 %vm6652_vm0, %v6653_v6  ;;  %v6256_v18 = vpop.f32.mrb[127].mxu1  ;;  %v6426_v9 = vpack.c.bf16 %v3775_v5, %v3774_v4  ;;  %v249_v13 = vld [vmem:[%s9404_s0 + $0x6e0] sm:$0xff] }
 0x1ef   :  { %2426 = vst.msk [vmem:[#allocation2 + $0x1f8] sm:$0xff] %vm2362_vm3, %v2200_v11  ;;  %2867 = vrot.lane.b32.xlu0 %v2846_v16, %s6656_s15  ;;  %2565 = vst.msk [vmem:[#allocation2 + $0x650] sm:$0xff] %vm2362_vm3, %v2339_v15  ;;  %v3759_v11 = vld [vmem:[%s9405_s2 + $0x38] sm:$0xff]  ;;  %6309 = vmatmul.mubr.msk.f32.gmra.mrb[162].mxu1 %vm267_vm2, %v249_v13  ;;  %v154_v13 = vld [vmem:[%s9404_s0 + $0x3e8] sm:$0xff] }
 0x1f0   :  { %v1333_v22 = vpop.f32.mrb[128].mxu0  ;;  %v2028_v23 = vpop.f32.mrb[128].mxu1  ;;  %v6428_v14 = vpack.c.bf16 %v3759_v11, %v3758_v10  ;;  %v3564_v16 = vld [vmem:[#allocation2 + $0x638] sm:$0xff]  ;;  %6427 = vmatprep.subr.bf16.mxu1 %v6426_v9  ;;  %6311 = vmatprep.mubr.msk.f32.mxu1 %vm6652_vm0, %v6653_v6  ;;  %v3782_v9 = vld [vmem:[%s9405_s2 + $0xf0] sm:$0xff] }
 0x1f1   :  { %v2201_v28 = vmax.f32 %v1333_v22, 0.0  ;;  %6000 = vmatmul.mubr.msk.f32.gmra.mrb[234].mxu0 %vm267_vm2, %v146_v17  ;;  %v3406_v29 = vpop.permute.xlu1 %3405  ;;  %v5842_v30 = vpop.f32.mrb[129].mxu0  ;;  %v2340_v31 = vmax.f32 %v2028_v23, 0.0  ;;  %v3776_v22 = vld [vmem:[%s9405_s2 + $0xc0] sm:$0xff]  ;;  %v3777_v23 = vld [vmem:[%s9405_s2 + $0xc8] sm:$0xff]  ;;  %v3783_v10 = vld [vmem:[%s9405_s2 + $0xf8] sm:$0xff] }
 0x1f2   :  { %3430 = vst.msk [vmem:[#allocation3 + $0x90] sm:$0xff] %vm2706_vm5, %v3406_v29  ;;  %6002 = vmatprep.mubr.msk.f32.mxu0 %vm6652_vm0, %v6653_v6  ;;  %v6259_v35 = vpop.f32.mrb[129].mxu1  ;;  %6429 = vmatpush3.bf16.msra.mxu1 %v6428_v14  ;;  %v6430_v27 = vpack.c.bf16 %v3777_v23, %v3776_v22  ;;  %v3761_v29 = vld [vmem:[%s9405_s2 + $0x48] sm:$0xff]  ;;  %v2851_v11 = vld [vmem:[#allocation2 + $0x1f0] sm:$0xff]  ;;  %v6442_v14 = vpack.c.bf16 %v3783_v10, %v3782_v9  ;;  %v161_v9 = vld [vmem:[%s9404_s0 + $0x420] sm:$0xff] }
 0x1f3   :  { %2427 = vst.msk [vmem:[#allocation2 + $0x200] sm:$0xff] %vm2362_vm3, %v2201_v28  ;;  %2869 = vrot.lane.b32.xlu0 %v2847_v33, %s6656_s15  ;;  %2566 = vst.msk [vmem:[#allocation2 + $0x658] sm:$0xff] %vm2362_vm3, %v2340_v31  ;;  %v3760_v28 = vld [vmem:[%s9405_s2 + $0x40] sm:$0xff]  ;;  %v250_v30 = vld [vmem:[%s9404_s0 + $0x6e8] sm:$0xff] }
 0x1f4   :  { %v1338_v37 = vpop.f32.mrb[130].mxu0  ;;  %v2033_v38 = vpop.f32.mrb[130].mxu1  ;;  %v6432_v31 = vpack.c.bf16 %v3761_v29, %v3760_v28  ;;  %6431 = vmatprep.subr.bf16.mxu1 %v6430_v27  ;;  %6312 = vmatmul.mubr.msk.f32.gmra.mrb[164].mxu1 %vm267_vm2, %v250_v30 }
 0x1f5   :  { %v2202_v39 = vmax.f32 %v1338_v37, 0.0  ;;  %6003 = vmatmul.mubr.msk.f32.gmra.mrb[236].mxu0 %vm267_vm2, %v147_v34  ;;  %v2696_v40 = vpop.permute.xlu1 %2695  ;;  %v5845_v41 = vpop.f32.mrb[131].mxu0  ;;  %v2341_v43 = vmax.f32 %v2033_v38, 0.0  ;;  %v152_v37 = vld [vmem:[%s9404_s0 + $0x3d8] sm:$0xff]  ;;  %6314 = vmatprep.mubr.msk.f32.mxu1 %vm6652_vm0, %v6653_v6 }
 0x1f6   :  { %2715 = vst.msk [vmem:[#allocation3 + $0x1c0] sm:$0xff] %vm2706_vm5, %v2696_v40  ;;  %6005 = vmatprep.mubr.msk.f32.mxu0 %vm6652_vm0, %v6653_v6  ;;  %v6262_v46 = vpop.f32.mrb[131].mxu1  ;;  %v3779_v40 = vld [vmem:[%s9405_s2 + $0xd8] sm:$0xff]  ;;  %v2850_v41 = vld [vmem:[#allocation2 + $0x1e8] sm:$0xff]  ;;  %6433 = vmatpush3.bf16.msra.mxu1 %v6432_v31 }
 0x1f7   :  { %2428 = vst.msk [vmem:[#allocation2 + $0x208] sm:$0xff] %vm2362_vm3, %v2202_v39  ;;  %2871 = vrot.lane.b32.xlu0 %v2848_v44, %s6656_s15  ;;  %2567 = vst.msk [vmem:[#allocation2 + $0x660] sm:$0xff] %vm2362_vm3, %v2341_v43  ;;  %v3778_v39 = vld [vmem:[%s9405_s2 + $0xd0] sm:$0xff]  ;;  %v3763_v46 = vld [vmem:[%s9405_s2 + $0x58] sm:$0xff] }
 0x1f8   :  { %v1343_v49 = vpop.f32.mrb[132].mxu0  ;;  %v2038_v51 = vpop.f32.mrb[132].mxu1  ;;  %v6434_v44 = vpack.c.bf16 %v3779_v40, %v3778_v39  ;;  %6315 = vmatmul.mubr.msk.f32.gmra.mrb[166].mxu1 %vm267_vm2, %v251_v48  ;;  %v2897_v30 = vld [vmem:[#allocation2 + $0x1f8] sm:$0xff] }
 0x1f9   :  { %v2203_v52 = vmax.f32 %v1343_v49, 0.0  ;;  %6006 = vmatmul.mubr.msk.f32.gmra.mrb[238].mxu0 %vm267_vm2, %v148_v45  ;;  %v3408_v53 = vpop.permute.xlu1 %3407  ;;  %v5848_v54 = vpop.f32.mrb[133].mxu0  ;;  %v2342_v55 = vmax.f32 %v2038_v51, 0.0  ;;  %v3762_v45 = vld [vmem:[%s9405_s2 + $0x50] sm:$0xff]  ;;  %v3565_v51 = vld [vmem:[#allocation2 + $0x640] sm:$0xff]  ;;  %6317 = vmatprep.mubr.msk.f32.mxu1 %vm6652_vm0, %v6653_v6  ;;  %v156_v31 = vld [vmem:[%s9404_s0 + $0x3f8] sm:$0xff] }
 0x1fa   :  { %3431 = vst.msk [vmem:[#allocation3 + $0xc8] sm:$0xff] %vm2706_vm5, %v3408_v53  ;;  %6008 = vmatprep.mubr.msk.f32.mxu0 %vm6652_vm0, %v6653_v6  ;;  %v6265_v57 = vpop.f32.mrb[133].mxu1  ;;  %v6436_v49 = vpack.c.bf16 %v3763_v46, %v3762_v45  ;;  %6435 = vmatprep.subr.bf16.mxu1 %v6434_v44  ;;  %v158_v45 = vld [vmem:[%s9404_s0 + $0x408] sm:$0xff] }
 0x1fb   :  { %2429 = vst.msk [vmem:[#allocation2 + $0x210] sm:$0xff] %vm2362_vm3, %v2203_v52  ;;  %3581 = vrot.lane.b32.xlu0 %v3563_v50, %s6656_s15  ;;  %2568 = vst.msk [vmem:[#allocation2 + $0x668] sm:$0xff] %vm2362_vm3, %v2342_v55  ;;  %v3780_v57 = vld [vmem:[%s9405_s2 + $0xe0] sm:$0xff] }
 0x1fc   :  { %v1348_v59 = vpop.f32.mrb[134].mxu0  ;;  %v2043_v61 = vpop.f32.mrb[134].mxu1  ;;  %6437 = vmatpush3.bf16.msra.mxu1 %v6436_v49 }
 0x1fd   :  { %v2204_v62 = vmax.f32 %v1348_v59, 0.0  ;;  %6009 = vmatmul.mubr.msk.f32.gmra.mrb[240].mxu0 %vm267_vm2, %v149_v56  ;;  %v2735_v63 = vpop.permute.xlu1 %2734  ;;  %v5851_v1 = vpop.f32.mrb[135].mxu0  ;;  %v2343_v3 = vmax.f32 %v2043_v61, 0.0  ;;  %v153_v59 = vld [vmem:[%s9404_s0 + $0x3e0] sm:$0xff]  ;;  %v6438_v61 = vpack.c.bf16 %v3781_v58, %v3780_v57 }
 0x1fe   :  { %2762 = vst.msk [vmem:[#allocation3] sm:$0xff] %vm2761_vm6, %v2735_v63  ;;  %6011 = vmatprep.mubr.msk.f32.mxu0 %vm6652_vm0, %v6653_v6  ;;  %v6268_v8 = vpop.f32.mrb[135].mxu1  ;;  %v252_v1 = vld [vmem:[%s9404_s0 + $0x6f8] sm:$0xff]  ;;  %v2899_v44 = vld [vmem:[#allocation2 + $0x208] sm:$0xff] }
 0x1ff   :  { %2430 = vst.msk [vmem:[#allocation2 + $0x218] sm:$0xff] %vm2362_vm3, %v2204_v62  ;;  %2873 = vrot.lane.b32.xlu0 %v2849_v7, %s6656_s15  ;;  %2569 = vst.msk [vmem:[#allocation2 + $0x670] sm:$0xff] %vm2362_vm3, %v2343_v3  ;;  %v3764_v62 = vld [vmem:[%s9405_s2 + $0x60] sm:$0xff]  ;;  %6439 = vmatprep.subr.bf16.mxu1 %v6438_v61 }
 0x200   :  { %v1353_v15 = vpop.f32.mrb[136].mxu0  ;;  %v2048_v17 = vpop.f32.mrb[136].mxu1  ;;  %6318 = vmatmul.mubr.msk.f32.gmra.mrb[168].mxu1 %vm267_vm2, %v252_v1 }
 0x201   :  { %v2205_v18 = vmax.f32 %v1353_v15, 0.0  ;;  %6012 = vmatmul.mubr.msk.f32.gmra.mrb[242].mxu0 %vm267_vm2, %v150_v2  ;;  %v2737_v19 = vpop.permute.xlu1 %2736  ;;  %v5854_v20 = vpop.f32.mrb[137].mxu0  ;;  %v2344_v21 = vmax.f32 %v2048_v17, 0.0  ;;  %v3765_v2 = vld [vmem:[%s9405_s2 + $0x68] sm:$0xff]  ;;  %v3766_v15 = vld [vmem:[%s9405_s2 + $0x70] sm:$0xff]  ;;  %6320 = vmatprep.mubr.msk.f32.mxu1 %vm6652_vm0, %v6653_v6  ;;  %v3767_v17 = vld [vmem:[%s9405_s2 + $0x78] sm:$0xff] }
 0x202   :  { %2763 = vst.msk [vmem:[#allocation3 + $0x38] sm:$0xff] %vm2761_vm6, %v2737_v19  ;;  %6014 = vmatprep.mubr.msk.f32.mxu0 %vm6652_vm0, %v6653_v6  ;;  %v6271_v26 = vpop.f32.mrb[137].mxu1  ;;  %v6440_v4 = vpack.c.bf16 %v3765_v2, %v3764_v62  ;;  %v3566_v19 = vld [vmem:[#allocation2 + $0x648] sm:$0xff]  ;;  %v6444_v20 = vpack.c.bf16 %v3767_v17, %v3766_v15 }
 0x203   :  { %2431 = vst.msk [vmem:[#allocation2 + $0x220] sm:$0xff] %vm2362_vm3, %v2205_v18  ;;  %3583 = vrot.lane.b32.xlu0 %v3564_v16, %s6656_s15  ;;  %2570 = vst.msk [vmem:[#allocation2 + $0x678] sm:$0xff] %vm2362_vm3, %v2344_v21  ;;  %v253_v16 = vld [vmem:[%s9404_s0 + $0x700] sm:$0xff]  ;;  %v162_v17 = vld [vmem:[%s9404_s0 + $0x428] sm:$0xff] }
 0x204   :  { %v1358_v32 = vpop.f32.mrb[138].mxu0  ;;  %v2053_v33 = vpop.f32.mrb[138].mxu1  ;;  %6441 = vmatpush3.bf16.msra.mxu1 %v6440_v4 }
 0x205   :  { %v2206_v34 = vmax.f32 %v1358_v32, 0.0  ;;  %6015 = vmatmul.mubr.msk.f32.gmra.mrb[244].mxu0 %vm267_vm2, %v151_v25  ;;  %v2739_v35 = vpop.permute.xlu1 %2738  ;;  %v5857_v36 = vpop.f32.mrb[139].mxu0  ;;  %v2345_v38 = vmax.f32 %v2053_v33, 0.0  ;;  %6443 = vmatprep.subr.bf16.mxu1 %v6442_v14  ;;  %v155_v25 = vld [vmem:[%s9404_s0 + $0x3f0] sm:$0xff] }
 0x206   :  { %2764 = vst.msk [vmem:[#allocation3 + $0x70] sm:$0xff] %vm2761_vm6, %v2739_v35  ;;  %6017 = vmatprep.mubr.msk.f32.mxu0 %vm6652_vm0, %v6653_v6  ;;  %v6274_v43 = vpop.f32.mrb[139].mxu1  ;;  %6321 = vmatmul.mubr.msk.f32.gmra.mrb[170].mxu1 %vm267_vm2, %v253_v16  ;;  %v2898_v36 = vld [vmem:[#allocation2 + $0x200] sm:$0xff]  ;;  %v2901_v62 = vld [vmem:[#allocation2 + $0x218] sm:$0xff] }
 0x207   :  { %2432 = vst.msk [vmem:[#allocation2 + $0x228] sm:$0xff] %vm2362_vm3, %v2206_v34  ;;  %2875 = vrot.lane.b32.xlu0 %v2850_v41, %s6656_s15  ;;  %2571 = vst.msk [vmem:[#allocation2 + $0x680] sm:$0xff] %vm2362_vm3, %v2345_v38 }
 0x208   :  { %v1363_v50 = vpop.f32.mrb[140].mxu0  ;;  %v2058_v52 = vpop.f32.mrb[140].mxu1  ;;  %6445 = vmatpush3.bf16.msra.mxu1 %v6444_v20 }
 0x209   :  { %v2207_v53 = vmax.f32 %v1363_v50, 0.0  ;;  %6018 = vmatmul.mubr.msk.f32.gmra.mrb[246].mxu0 %vm267_vm2, %v152_v37  ;;  %v2741_v54 = vpop.permute.xlu1 %2740  ;;  %v5860_v55 = vpop.f32.mrb[141].mxu0  ;;  %v2346_v56 = vmax.f32 %v2058_v52, 0.0  ;;  %v157_v37 = vld [vmem:[%s9404_s0 + $0x400] sm:$0xff] }
 0x20a   :  { %2765 = vst.msk [vmem:[#allocation3 + $0xa8] sm:$0xff] %vm2761_vm6, %v2741_v54  ;;  %6020 = vmatprep.mubr.msk.f32.mxu0 %vm6652_vm0, %v6653_v6  ;;  %v6277_v63 = vpop.f32.mrb[141].mxu1  ;;  %v159_v54 = vld [vmem:[%s9404_s0 + $0x410] sm:$0xff] }
 0x20b   :  { %2433 = vst.msk [vmem:[#allocation2 + $0x230] sm:$0xff] %vm2362_vm3, %v2207_v53  ;;  %3585 = vrot.lane.b32.xlu0 %v3565_v51, %s6656_s15  ;;  %2572 = vst.msk [vmem:[#allocation2 + $0x688] sm:$0xff] %vm2362_vm3, %v2346_v56  ;;  %v2900_v53 = vld [vmem:[#allocation2 + $0x210] sm:$0xff]  ;;  %v160_v63 = vld [vmem:[%s9404_s0 + $0x418] sm:$0xff] }
 0x20c   :  { %v1368_v3 = vpop.f32.mrb[142].mxu0 }
 0x20d   :  { %v2208_v5 = vmax.f32 %v1368_v3, 0.0  ;;  %6021 = vmatmul.mubr.msk.f32.gmra.mrb[248].mxu0 %vm267_vm2, %v153_v59  ;;  %v2743_v7 = vpop.permute.xlu1 %2742  ;;  %v5863_v8 = vpop.f32.mrb[143].mxu0 }
 0x20e   :  { %2766 = vst.msk [vmem:[#allocation3 + $0xe0] sm:$0xff] %vm2761_vm6, %v2743_v7  ;;  %6023 = vmatprep.mubr.msk.f32.mxu0 %vm6652_vm0, %v6653_v6  ;;  %v2902_v8 = vld [vmem:[#allocation2 + $0x220] sm:$0xff] }
 0x20f   :  { %2434 = vst.msk [vmem:[#allocation2 + $0x238] sm:$0xff] %vm2362_vm3, %v2208_v5  ;;  %2877 = vrot.lane.b32.xlu0 %v2851_v11, %s6656_s15 }
 0x210   :  { %v1373_v18 = vpop.f32.mrb[144].mxu0 }
 0x211   :  { %v2209_v21 = vmax.f32 %v1373_v18, 0.0  ;;  %6024 = vmatmul.mubr.msk.f32.gmra.mrb[250].mxu0 %vm267_vm2, %v154_v13  ;;  %v2745_v22 = vpop.permute.xlu1 %2744  ;;  %v5866_v23 = vpop.f32.mrb[145].mxu0  ;;  %v3617_v13 = vld [vmem:[#allocation2 + $0x678] sm:$0xff] }
 0x212   :  { %2767 = vst.msk [vmem:[#allocation3 + $0x118] sm:$0xff] %vm2761_vm6, %v2745_v22  ;;  %6026 = vmatprep.mubr.msk.f32.mxu0 %vm6652_vm0, %v6653_v6 }
 0x213   :  { %2435 = vst.msk [vmem:[#allocation2 + $0x240] sm:$0xff] %vm2362_vm3, %v2209_v21  ;;  %3587 = vrot.lane.b32.xlu0 %v3566_v19, %s6656_s15 }
 0x214   :  { %v1378_v26 = vpop.f32.mrb[146].mxu0 }
 0x215   :  { %v2210_v27 = vmax.f32 %v1378_v26, 0.0  ;;  %6027 = vmatmul.mubr.msk.f32.gmra.mrb[252].mxu0 %vm267_vm2, %v155_v25  ;;  %v3456_v28 = vpop.permute.xlu1 %3455  ;;  %v5869_v29 = vpop.f32.mrb[147].mxu0  ;;  %v2903_v25 = vld [vmem:[#allocation2 + $0x228] sm:$0xff]  ;;  %v163_v26 = vld [vmem:[%s9404_s0 + $0x430] sm:$0xff] }
 0x216   :  { %3482 = vst.msk [vmem:[#allocation3 + $0x20] sm:$0xff] %vm2761_vm6, %v3456_v28  ;;  %6029 = vmatprep.mubr.msk.f32.mxu0 %vm6652_vm0, %v6653_v6  ;;  %v3618_v29 = vld [vmem:[#allocation2 + $0x680] sm:$0xff] }
 0x217   :  { %2436 = vst.msk [vmem:[#allocation2 + $0x248] sm:$0xff] %vm2362_vm3, %v2210_v27  ;;  %2915 = vrot.lane.b32.xlu0 %v2897_v30, %s6654_s29 }
 0x218   :  { %v1383_v32 = vpop.f32.mrb[148].mxu0 }
 0x219   :  { %v2211_v33 = vmax.f32 %v1383_v32, 0.0  ;;  %6030 = vmatmul.mubr.msk.f32.gmra.mrb[254].mxu0 %vm267_vm2, %v156_v31  ;;  %v2747_v34 = vpop.permute.xlu1 %2746  ;;  %v5872_v35 = vpop.f32.mrb[149].mxu0 }
 0x21a   :  { %2768 = vst.msk [vmem:[#allocation3 + $0x150] sm:$0xff] %vm2761_vm6, %v2747_v34  ;;  %6032 = vmatprep.mubr.msk.f32.mxu0 %vm6652_vm0, %v6653_v6  ;;  %v2951_v38 = vld [vmem:[#allocation2 + $0x240] sm:$0xff] }
 0x21b   :  { %2437 = vst.msk [vmem:[#allocation2 + $0x250] sm:$0xff] %vm2362_vm3, %v2211_v33  ;;  %2917 = vrot.lane.b32.xlu0 %v2898_v36, %s6654_s29  ;;  %2960 = vst.msk [vmem:[#allocation3 + $0x10] sm:$0xff] %vm2362_vm3, %v2951_v38  ;;  %v164_v33 = vld [vmem:[%s9404_s0 + $0x438] sm:$0xff] }
 0x21c   :  { %v1388_v39 = vpop.f32.mrb[150].mxu0 }
 0x21d   :  { %v2212_v40 = vmax.f32 %v1388_v39, 0.0  ;;  %6033 = vmatmul.mubr.msk.f32.gmra.mrb[0].mxu0 %vm267_vm2, %v157_v37  ;;  %v3458_v41 = vpop.permute.xlu1 %3457  ;;  %v5875_v43 = vpop.f32.mrb[151].mxu0  ;;  %v2904_v39 = vld [vmem:[#allocation2 + $0x230] sm:$0xff] }
 0x21e   :  { %3483 = vst.msk [vmem:[#allocation3 + $0x58] sm:$0xff] %vm2761_vm6, %v3458_v41  ;;  %6035 = vmatprep.mubr.msk.f32.mxu0 %vm6652_vm0, %v6653_v6  ;;  %v2952_v46 = vld [vmem:[#allocation2 + $0x248] sm:$0xff] }
 0x21f   :  { %2438 = vst.msk [vmem:[#allocation2 + $0x258] sm:$0xff] %vm2362_vm3, %v2212_v40  ;;  %2919 = vrot.lane.b32.xlu0 %v2899_v44, %s6654_s29  ;;  %2961 = vst.msk [vmem:[#allocation3 + $0x48] sm:$0xff] %vm2362_vm3, %v2952_v46  ;;  %v165_v40 = vld [vmem:[%s9404_s0 + $0x440] sm:$0xff]  ;;  %v3619_v44 = vld [vmem:[#allocation2 + $0x688] sm:$0xff] }
 0x220   :  { %v1393_v48 = vpop.f32.mrb[152].mxu0 }
 0x221   :  { %v2213_v49 = vmax.f32 %v1393_v48, 0.0  ;;  %6036 = vmatmul.mubr.msk.f32.gmra.mrb[2].mxu0 %vm267_vm2, %v158_v45  ;;  %v2749_v50 = vpop.permute.xlu1 %2748  ;;  %v2808_v51 = vpop.permute.xlu0 %2807 }
 0x222   :  { %2769 = vst.msk [vmem:[#allocation3 + $0x188] sm:$0xff] %vm2761_vm6, %v2749_v50  ;;  %v5878_v52 = vpop.f32.mrb[153].mxu0  ;;  %6038 = vmatprep.mubr.msk.f32.mxu0 %vm6652_vm0, %v6653_v6  ;;  %v2953_v55 = vld [vmem:[#allocation2 + $0x250] sm:$0xff]  ;;  %v166_v50 = vld [vmem:[%s9404_s0 + $0x448] sm:$0xff] }
 0x223   :  { %2834 = vst.msk [vmem:[#allocation3 + $0x8] sm:$0xff] %vm2651_vm4, %v2808_v51  ;;  %2921 = vrot.lane.b32.xlu0 %v2900_v53, %s6654_s29  ;;  %v2063_v51 = vpop.f32.mrb[142].mxu1 }
 0x224   :  { %2439 = vst.msk [vmem:[#allocation2 + $0x260] sm:$0xff] %vm2362_vm3, %v2213_v49  ;;  %2962 = vst.msk [vmem:[#allocation3 + $0x80] sm:$0xff] %vm2362_vm3, %v2953_v55  ;;  %v1398_v56 = vpop.f32.mrb[154].mxu0  ;;  %v2347_v53 = vmax.f32 %v2063_v51, 0.0 }
 0x225   :  { %v2214_v57 = vmax.f32 %v1398_v56, 0.0  ;;  %6039 = vmatmul.mubr.msk.f32.gmra.mrb[4].mxu0 %vm267_vm2, %v159_v54  ;;  %v3460_v58 = vpop.permute.xlu1 %3459  ;;  %v2810_v59 = vpop.permute.xlu0 %2809 }
 0x226   :  { %3484 = vst.msk [vmem:[#allocation3 + $0x90] sm:$0xff] %vm2761_vm6, %v3460_v58  ;;  %v5881_v61 = vpop.f32.mrb[155].mxu0  ;;  %6041 = vmatprep.mubr.msk.f32.mxu0 %vm6652_vm0, %v6653_v6  ;;  %v2954_v1 = vld [vmem:[#allocation2 + $0x258] sm:$0xff]  ;;  %v6280_v54 = vpop.f32.mrb[143].mxu1 }
 0x227   :  { %2835 = vst.msk [vmem:[#allocation3 + $0x40] sm:$0xff] %vm2651_vm4, %v2810_v59  ;;  %2923 = vrot.lane.b32.xlu0 %v2901_v62, %s6654_s29  ;;  %v2905_v58 = vld [vmem:[#allocation2 + $0x238] sm:$0xff]  ;;  %v167_v61 = vld [vmem:[%s9404_s0 + $0x450] sm:$0xff] }
 0x228   :  { %2440 = vst.msk [vmem:[#allocation2 + $0x268] sm:$0xff] %vm2362_vm3, %v2214_v57  ;;  %2963 = vst.msk [vmem:[#allocation3 + $0xb8] sm:$0xff] %vm2362_vm3, %v2954_v1  ;;  %v1403_v2 = vpop.f32.mrb[156].mxu0 }
 0x229   :  { %v2215_v3 = vmax.f32 %v1403_v2, 0.0  ;;  %6042 = vmatmul.mubr.msk.f32.gmra.mrb[6].mxu0 %vm267_vm2, %v160_v63  ;;  %v2751_v4 = vpop.permute.xlu1 %2750  ;;  %v2812_v5 = vpop.permute.xlu0 %2811  ;;  %2573 = vst.msk [vmem:[#allocation2 + $0x690] sm:$0xff] %vm2362_vm3, %v2347_v53 }
 0x22a   :  { %2770 = vst.msk [vmem:[#allocation3 + $0x1c0] sm:$0xff] %vm2761_vm6, %v2751_v4  ;;  %v5884_v7 = vpop.f32.mrb[157].mxu0  ;;  %6044 = vmatprep.mubr.msk.f32.mxu0 %vm6652_vm0, %v6653_v6 }
 0x22b   :  { %2836 = vst.msk [vmem:[#allocation3 + $0x78] sm:$0xff] %vm2651_vm4, %v2812_v5  ;;  %v2955_v10 = vld [vmem:[#allocation2 + $0x260] sm:$0xff]  ;;  %2925 = vrot.lane.b32.xlu0 %v2902_v8, %s6654_s29 }
 0x22c   :  { %2441 = vst.msk [vmem:[#allocation2 + $0x270] sm:$0xff] %vm2362_vm3, %v2215_v3  ;;  %2964 = vst.msk [vmem:[#allocation3 + $0xf0] sm:$0xff] %vm2362_vm3, %v2955_v10  ;;  %v1408_v11 = vpop.f32.mrb[158].mxu0 }
 0x22d   :  { %v2216_v14 = vmax.f32 %v1408_v11, 0.0  ;;  %6045 = vmatmul.mubr.msk.f32.gmra.mrb[8].mxu0 %vm267_vm2, %v161_v9  ;;  %v2814_v15 = vpop.permute.xlu0 %2813  ;;  %v5887_v16 = vpop.f32.mrb[159].mxu0 }
 0x22e   :  { %2837 = vst.msk [vmem:[#allocation3 + $0xb0] sm:$0xff] %vm2651_vm4, %v2814_v15  ;;  %6047 = vmatprep.mubr.msk.f32.mxu0 %vm6652_vm0, %v6653_v6  ;;  %v3462_v18 = vpop.permute.xlu1 %3461 }
 0x22f   :  { %v2956_v19 = vld [vmem:[#allocation2 + $0x268] sm:$0xff]  ;;  %2442 = vst.msk [vmem:[#allocation2 + $0x278] sm:$0xff] %vm2362_vm3, %v2216_v14  ;;  %3635 = vrot.lane.b32.xlu0 %v3617_v13, %s6654_s29 }
 0x230   :  { %3485 = vst.msk [vmem:[#allocation3 + $0xc8] sm:$0xff] %vm2761_vm6, %v3462_v18  ;;  %v1413_v20 = vpop.f32.mrb[160].mxu0  ;;  %v3620_v11 = vld [vmem:[#allocation2 + $0x690] sm:$0xff] }
 0x231   :  { %2965 = vst.msk [vmem:[#allocation3 + $0x128] sm:$0xff] %vm2362_vm3, %v2956_v19  ;;  %v2217_v21 = vmax.f32 %v1413_v20, 0.0  ;;  %6048 = vmatmul.mubr.msk.f32.gmra.mrb[10].mxu0 %vm267_vm2, %v162_v17  ;;  %v2816_v22 = vpop.permute.xlu0 %2815  ;;  %v5890_v23 = vpop.f32.mrb[161].mxu0 }
 0x232   :  { %2838 = vst.msk [vmem:[#allocation3 + $0xe8] sm:$0xff] %vm2651_vm4, %v2816_v22  ;;  %6050 = vmatprep.mubr.msk.f32.mxu0 %vm6652_vm0, %v6653_v6 }
 0x233   :  { %v2957_v27 = vld [vmem:[#allocation2 + $0x270] sm:$0xff]  ;;  %2443 = vst.msk [vmem:[#allocation2 + $0x280] sm:$0xff] %vm2362_vm3, %v2217_v21  ;;  %2927 = vrot.lane.b32.xlu0 %v2903_v25, %s6654_s29 }
 0x234   :  { %2966 = vst.msk [vmem:[#allocation3 + $0x160] sm:$0xff] %vm2362_vm3, %v2957_v27  ;;  %v1418_v28 = vpop.f32.mrb[162].mxu0 }
 0x235   :  { %v2218_v30 = vmax.f32 %v1418_v28, 0.0  ;;  %6051 = vmatmul.mubr.msk.f32.gmra.mrb[12].mxu0 %vm267_vm2, %v163_v26  ;;  %v2818_v31 = vpop.permute.xlu0 %2817  ;;  %v5893_v32 = vpop.f32.mrb[163].mxu0 }
 0x236   :  { %2839 = vst.msk [vmem:[#allocation3 + $0x120] sm:$0xff] %vm2651_vm4, %v2818_v31  ;;  %6053 = vmatprep.mubr.msk.f32.mxu0 %vm6652_vm0, %v6653_v6  ;;  %v2958_v34 = vld [vmem:[#allocation2 + $0x278] sm:$0xff] }
 0x237   :  { %2444 = vst.msk [vmem:[#allocation2 + $0x288] sm:$0xff] %vm2362_vm3, %v2218_v30  ;;  %3637 = vrot.lane.b32.xlu0 %v3618_v29, %s6654_s29  ;;  %2967 = vst.msk [vmem:[#allocation3 + $0x198] sm:$0xff] %vm2362_vm3, %v2958_v34 }
 0x238   :  { %v1423_v35 = vpop.f32.mrb[164].mxu0 }
 0x239   :  { %v2219_v36 = vmax.f32 %v1423_v35, 0.0  ;;  %6054 = vmatmul.mubr.msk.f32.gmra.mrb[14].mxu0 %vm267_vm2, %v164_v33  ;;  %v3528_v37 = vpop.permute.xlu0 %3527  ;;  %v5896_v38 = vpop.f32.mrb[165].mxu0 }
 0x23a   :  { %3554 = vst.msk [vmem:[#allocation3 + $0x28] sm:$0xff] %vm2651_vm4, %v3528_v37  ;;  %6056 = vmatprep.mubr.msk.f32.mxu0 %vm6652_vm0, %v6653_v6  ;;  %v2959_v41 = vld [vmem:[#allocation2 + $0x280] sm:$0xff] }
 0x23b   :  { %2445 = vst.msk [vmem:[#allocation2 + $0x290] sm:$0xff] %vm2362_vm3, %v2219_v36  ;;  %2929 = vrot.lane.b32.xlu0 %v2904_v39, %s6654_s29  ;;  %2968 = vst.msk [vmem:[#allocation3 + $0x1d0] sm:$0xff] %vm2362_vm3, %v2959_v41 }
 0x23c   :  { %v1428_v43 = vpop.f32.mrb[166].mxu0 }
 0x23d   :  { %v2220_v45 = vmax.f32 %v1428_v43, 0.0  ;;  %6057 = vmatmul.mubr.msk.f32.gmra.mrb[16].mxu0 %vm267_vm2, %v165_v40  ;;  %v2820_v46 = vpop.permute.xlu0 %2819  ;;  %v5899_v48 = vpop.f32.mrb[167].mxu0 }
 0x23e   :  { %2840 = vst.msk [vmem:[#allocation3 + $0x158] sm:$0xff] %vm2651_vm4, %v2820_v46  ;;  %v2969_v49 = vld [vmem:[#allocation2 + $0x288] sm:$0xff]  ;;  %6059 = vmatprep.mubr.msk.f32.mxu0 %vm6652_vm0, %v6653_v6 }
 0x23f   :  { %2446 = vst.msk [vmem:[#allocation2 + $0x298] sm:$0xff] %vm2362_vm3, %v2220_v45  ;;  %3639 = vrot.lane.b32.xlu0 %v3619_v44, %s6654_s29  ;;  %2987 = vrot.lane.b32.xlu1 %v2969_v49, %s6655_s21 }
 0x240   :  { %v1433_v52 = vpop.f32.mrb[168].mxu0 }
 0x241   :  { %v2221_v55 = vmax.f32 %v1433_v52, 0.0  ;;  %6060 = vmatmul.mubr.msk.f32.gmra.mrb[18].mxu0 %vm267_vm2, %v166_v50  ;;  %v3530_v56 = vpop.permute.xlu0 %3529  ;;  %v5902_v57 = vpop.f32.mrb[169].mxu0 }
 0x242   :  { %3555 = vst.msk [vmem:[#allocation3 + $0x60] sm:$0xff] %vm2651_vm4, %v3530_v56  ;;  %v2970_v59 = vld [vmem:[#allocation2 + $0x290] sm:$0xff]  ;;  %6062 = vmatprep.mubr.msk.f32.mxu0 %vm6652_vm0, %v6653_v6 }
 0x243   :  { %2447 = vst.msk [vmem:[#allocation2 + $0x2a0] sm:$0xff] %vm2362_vm3, %v2221_v55  ;;  %2931 = vrot.lane.b32.xlu0 %v2905_v58, %s6654_s29  ;;  %2989 = vrot.lane.b32.xlu1 %v2970_v59, %s6655_s21 }
 0x244   :  { %v1438_v62 = vpop.f32.mrb[170].mxu0 }
 0x245   :  { %v2222_v63 = vmax.f32 %v1438_v62, 0.0  ;;  %6063 = vmatmul.mubr.msk.f32.gmra.mrb[20].mxu0 %vm267_vm2, %v167_v61  ;;  %v2822_v1 = vpop.permute.xlu0 %2821  ;;  %v2862_v2 = vpop.permute.xlu1 %2861 }
 0x246   :  { %2841 = vst.msk [vmem:[#allocation3 + $0x190] sm:$0xff] %vm2651_vm4, %v2822_v1  ;;  %v5905_v3 = vpop.f32.mrb[171].mxu0  ;;  %v2971_v4 = vld [vmem:[#allocation2 + $0x298] sm:$0xff] }
 0x247   :  { %2888 = vst.msk [vmem:[#allocation3 + $0x8] sm:$0xff] %vm2706_vm5, %v2862_v2  ;;  %2991 = vrot.lane.b32.xlu1 %v2971_v4, %s6655_s21  ;;  %3641 = vrot.lane.b32.xlu0 %v3620_v11, %s6654_s29 }
 0x248   :  { %2448 = vst.msk [vmem:[#allocation2 + $0x2a8] sm:$0xff] %vm2362_vm3, %v2222_v63  ;;  %v1443_v5 = vpop.f32.mrb[172].mxu0 }
 0x249   :  { %v2223_v7 = vmax.f32 %v1443_v5, 0.0  ;;  %v3532_v8 = vpop.permute.xlu0 %3531  ;;  %v5908_v9 = vpop.f32.mrb[173].mxu0 }
 0x24a   :  { %3556 = vst.msk [vmem:[#allocation3 + $0x98] sm:$0xff] %vm2651_vm4, %v3532_v8  ;;  %v2972_v10 = vld [vmem:[#allocation2 + $0x2a0] sm:$0xff] }
 0x24b   :  { %2449 = vst.msk [vmem:[#allocation2 + $0x2b0] sm:$0xff] %vm2362_vm3, %v2223_v7  ;;  %2993 = vrot.lane.b32.xlu1 %v2972_v10, %s6655_s21 }
 0x24c   :  { %v1448_v13 = vpop.f32.mrb[174].mxu0 }
 0x24d   :  { %v2224_v14 = vmax.f32 %v1448_v13, 0.0  ;;  %v2824_v15 = vpop.permute.xlu0 %2823  ;;  %v5911_v16 = vpop.f32.mrb[175].mxu0 }
 0x24e   :  { %2842 = vst.msk [vmem:[#allocation3 + $0x1c8] sm:$0xff] %vm2651_vm4, %v2824_v15 }
 0x24f   :  { %v2973_v17 = vld [vmem:[#allocation2 + $0x2a8] sm:$0xff]  ;;  %2450 = vst.msk [vmem:[#allocation2 + $0x2b8] sm:$0xff] %vm2362_vm3, %v2224_v14 }
 0x250   :  { %2995 = vrot.lane.b32.xlu1 %v2973_v17, %s6655_s21  ;;  %v1453_v18 = vpop.f32.mrb[176].mxu0 }
 0x251   :  { %v2225_v19 = vmax.f32 %v1453_v18, 0.0  ;;  %v3534_v20 = vpop.permute.xlu0 %3533  ;;  %v5914_v21 = vpop.f32.mrb[177].mxu0 }
 0x252   :  { %3557 = vst.msk [vmem:[#allocation3 + $0xd0] sm:$0xff] %vm2651_vm4, %v3534_v20  ;;  %v2974_v22 = vld [vmem:[#allocation2 + $0x2b0] sm:$0xff] }
 0x253   :  { %2451 = vst.msk [vmem:[#allocation2 + $0x2c0] sm:$0xff] %vm2362_vm3, %v2225_v19 }
 0x254   :  { %2997 = vrot.lane.b32.xlu1 %v2974_v22, %s6655_s21  ;;  %v1458_v23 = vpop.f32.mrb[178].mxu0 }
 0x255   :  { %v2226_v25 = vmax.f32 %v1458_v23, 0.0  ;;  %v3536_v26 = vpop.permute.xlu0 %3535  ;;  %v5917_v27 = vpop.f32.mrb[179].mxu0 }
 0x256   :  { %3558 = vst.msk [vmem:[#allocation3 + $0x108] sm:$0xff] %vm2651_vm4, %v3536_v26  ;;  %v2975_v28 = vld [vmem:[#allocation2 + $0x2b8] sm:$0xff] }
 0x257   :  { %2452 = vst.msk [vmem:[#allocation2 + $0x2c8] sm:$0xff] %vm2362_vm3, %v2226_v25 }
 0x258   :  { %2999 = vrot.lane.b32.xlu1 %v2975_v28, %s6655_s21  ;;  %v1463_v29 = vpop.f32.mrb[180].mxu0 }
 0x259   :  { %v2227_v30 = vmax.f32 %v1463_v29, 0.0  ;;  %v2864_v31 = vpop.permute.xlu0 %2863  ;;  %v5920_v32 = vpop.f32.mrb[181].mxu0 }
 0x25a   :  { %2889 = vst.msk [vmem:[#allocation3 + $0x40] sm:$0xff] %vm2706_vm5, %v2864_v31  ;;  %v2976_v33 = vld [vmem:[#allocation2 + $0x2c0] sm:$0xff] }
 0x25b   :  { %2453 = vst.msk [vmem:[#allocation2 + $0x2d0] sm:$0xff] %vm2362_vm3, %v2227_v30 }
 0x25c   :  { %3001 = vrot.lane.b32.xlu1 %v2976_v33, %s6655_s21  ;;  %v1468_v34 = vpop.f32.mrb[182].mxu0 }
 0x25d   :  { %v2228_v35 = vmax.f32 %v1468_v34, 0.0  ;;  %v2866_v36 = vpop.permute.xlu0 %2865  ;;  %v5923_v37 = vpop.f32.mrb[183].mxu0 }
 0x25e   :  { %2890 = vst.msk [vmem:[#allocation3 + $0x78] sm:$0xff] %vm2706_vm5, %v2866_v36  ;;  %v2977_v38 = vld [vmem:[#allocation2 + $0x2c8] sm:$0xff] }
 0x25f   :  { %2454 = vst.msk [vmem:[#allocation2 + $0x2d8] sm:$0xff] %vm2362_vm3, %v2228_v35 }
 0x260   :  { %3003 = vrot.lane.b32.xlu1 %v2977_v38, %s6655_s21  ;;  %v1473_v39 = vpop.f32.mrb[184].mxu0 }
 0x261   :  { %v2229_v40 = vmax.f32 %v1473_v39, 0.0  ;;  %v2868_v41 = vpop.permute.xlu0 %2867  ;;  %v5926_v43 = vpop.f32.mrb[185].mxu0 }
 0x262   :  { %2891 = vst.msk [vmem:[#allocation3 + $0xb0] sm:$0xff] %vm2706_vm5, %v2868_v41  ;;  %v3023_v44 = vld [vmem:[#allocation2 + $0x2d0] sm:$0xff] }
 0x263   :  { %2455 = vst.msk [vmem:[#allocation2 + $0x2e0] sm:$0xff] %vm2362_vm3, %v2229_v40 }
 0x264   :  { %3041 = vrot.lane.b32.xlu1 %v3023_v44, %s6656_s15  ;;  %v1478_v45 = vpop.f32.mrb[186].mxu0 }
 0x265   :  { %v2230_v46 = vmax.f32 %v1478_v45, 0.0  ;;  %v2870_v48 = vpop.permute.xlu0 %2869  ;;  %v5929_v49 = vpop.f32.mrb[187].mxu0 }
 0x266   :  { %2892 = vst.msk [vmem:[#allocation3 + $0xe8] sm:$0xff] %vm2706_vm5, %v2870_v48  ;;  %v3024_v50 = vld [vmem:[#allocation2 + $0x2d8] sm:$0xff]  ;;  %v3689_v49 = vld [vmem:[#allocation3] sm:$0xff] }
 0x267   :  { %2456 = vst.msk [vmem:[#allocation2 + $0x2e8] sm:$0xff] %vm2362_vm3, %v2230_v46 }
 0x268   :  { %3043 = vrot.lane.b32.xlu1 %v3024_v50, %s6656_s15  ;;  %v1483_v51 = vpop.f32.mrb[188].mxu0 }
 0x269   :  { %v2231_v52 = vmax.f32 %v1483_v51, 0.0  ;;  %v2872_v53 = vpop.permute.xlu0 %2871  ;;  %v5932_v54 = vpop.f32.mrb[189].mxu0 }
 0x26a   :  { %2893 = vst.msk [vmem:[#allocation3 + $0x120] sm:$0xff] %vm2706_vm5, %v2872_v53  ;;  %v3025_v55 = vld [vmem:[#allocation2 + $0x2e0] sm:$0xff] }
 0x26b   :  { %2457 = vst.msk [vmem:[#allocation2 + $0x2f0] sm:$0xff] %vm2362_vm3, %v2231_v52 }
 0x26c   :  { %3045 = vrot.lane.b32.xlu1 %v3025_v55, %s6656_s15  ;;  %v1488_v56 = vpop.f32.mrb[190].mxu0 }
 0x26d   :  { %v2232_v57 = vmax.f32 %v1488_v56, 0.0  ;;  %v3582_v58 = vpop.permute.xlu0 %3581  ;;  %v5935_v59 = vpop.f32.mrb[191].mxu0  ;;  %v3696_v56 = vld [vmem:[#allocation3 + $0x38] sm:$0xff] }
 0x26e   :  { %3608 = vst.msk [vmem:[#allocation3 + $0x28] sm:$0xff] %vm2706_vm5, %v3582_v58  ;;  %v3026_v61 = vld [vmem:[#allocation2 + $0x2e8] sm:$0xff] }
 0x26f   :  { %2458 = vst.msk [vmem:[#allocation2 + $0x2f8] sm:$0xff] %vm2362_vm3, %v2232_v57 }
 0x270   :  { %3047 = vrot.lane.b32.xlu1 %v3026_v61, %s6656_s15  ;;  %v1493_v62 = vpop.f32.mrb[192].mxu0 }
 0x271   :  { %v2233_v63 = vmax.f32 %v1493_v62, 0.0  ;;  %v2874_v1 = vpop.permute.xlu0 %2873  ;;  %v5938_v2 = vpop.f32.mrb[193].mxu0 }
 0x272   :  { %2894 = vst.msk [vmem:[#allocation3 + $0x158] sm:$0xff] %vm2706_vm5, %v2874_v1  ;;  %v3027_v3 = vld [vmem:[#allocation2 + $0x2f0] sm:$0xff]  ;;  %v3703_v1 = vld [vmem:[#allocation3 + $0x70] sm:$0xff] }
 0x273   :  { %2459 = vst.msk [vmem:[#allocation2 + $0x300] sm:$0xff] %vm2362_vm3, %v2233_v63 }
 0x274   :  { %3049 = vrot.lane.b32.xlu1 %v3027_v3, %s6656_s15  ;;  %v1498_v4 = vpop.f32.mrb[194].mxu0 }
 0x275   :  { %v2234_v5 = vmax.f32 %v1498_v4, 0.0  ;;  %v3584_v7 = vpop.permute.xlu0 %3583  ;;  %v5941_v8 = vpop.f32.mrb[195].mxu0 }
 0x276   :  { %3609 = vst.msk [vmem:[#allocation3 + $0x60] sm:$0xff] %vm2706_vm5, %v3584_v7  ;;  %v3028_v9 = vld [vmem:[#allocation2 + $0x2f8] sm:$0xff] }
 0x277   :  { %2460 = vst.msk [vmem:[#allocation2 + $0x308] sm:$0xff] %vm2362_vm3, %v2234_v5 }
 0x278   :  { %3051 = vrot.lane.b32.xlu1 %v3028_v9, %s6656_s15  ;;  %v1503_v10 = vpop.f32.mrb[196].mxu0  ;;  %v3710_v9 = vld [vmem:[#allocation3 + $0xa8] sm:$0xff] }
 0x279   :  { %v2235_v11 = vmax.f32 %v1503_v10, 0.0  ;;  %v2876_v13 = vpop.permute.xlu0 %2875  ;;  %v5944_v14 = vpop.f32.mrb[197].mxu0 }
 0x27a   :  { %2895 = vst.msk [vmem:[#allocation3 + $0x190] sm:$0xff] %vm2706_vm5, %v2876_v13  ;;  %v3029_v15 = vld [vmem:[#allocation2 + $0x300] sm:$0xff] }
 0x27b   :  { %2461 = vst.msk [vmem:[#allocation2 + $0x310] sm:$0xff] %vm2362_vm3, %v2235_v11 }
 0x27c   :  { %3053 = vrot.lane.b32.xlu1 %v3029_v15, %s6656_s15  ;;  %v1508_v16 = vpop.f32.mrb[198].mxu0 }
 0x27d   :  { %v2236_v17 = vmax.f32 %v1508_v16, 0.0  ;;  %v3586_v18 = vpop.permute.xlu0 %3585  ;;  %v5947_v19 = vpop.f32.mrb[199].mxu0 }
 0x27e   :  { %3610 = vst.msk [vmem:[#allocation3 + $0x98] sm:$0xff] %vm2706_vm5, %v3586_v18  ;;  %v3030_v20 = vld [vmem:[#allocation2 + $0x308] sm:$0xff] }
 0x27f   :  { %2462 = vst.msk [vmem:[#allocation2 + $0x318] sm:$0xff] %vm2362_vm3, %v2236_v17  ;;  %v3717_v19 = vld [vmem:[#allocation3 + $0xe0] sm:$0xff] }
 0x280   :  { %3055 = vrot.lane.b32.xlu1 %v3030_v20, %s6656_s15  ;;  %v1513_v21 = vpop.f32.mrb[200].mxu0 }
 0x281   :  { %v2237_v22 = vmax.f32 %v1513_v21, 0.0  ;;  %v2878_v23 = vpop.permute.xlu0 %2877  ;;  %v5950_v25 = vpop.f32.mrb[201].mxu0 }
 0x282   :  { %2896 = vst.msk [vmem:[#allocation3 + $0x1c8] sm:$0xff] %vm2706_vm5, %v2878_v23  ;;  %v3031_v26 = vld [vmem:[#allocation2 + $0x310] sm:$0xff] }
 0x283   :  { %2463 = vst.msk [vmem:[#allocation2 + $0x320] sm:$0xff] %vm2362_vm3, %v2237_v22 }
 0x284   :  { %3057 = vrot.lane.b32.xlu1 %v3031_v26, %s6656_s15  ;;  %v1518_v27 = vpop.f32.mrb[202].mxu0 }
 0x285   :  { %v2238_v28 = vmax.f32 %v1518_v27, 0.0  ;;  %v3588_v29 = vpop.permute.xlu0 %3587  ;;  %v5953_v30 = vpop.f32.mrb[203].mxu0 }
 0x286   :  { %3611 = vst.msk [vmem:[#allocation3 + $0xd0] sm:$0xff] %vm2706_vm5, %v3588_v29  ;;  %v3077_v31 = vld [vmem:[#allocation2 + $0x318] sm:$0xff] }
 0x287   :  { %2464 = vst.msk [vmem:[#allocation2 + $0x328] sm:$0xff] %vm2362_vm3, %v2238_v28  ;;  %v3724_v28 = vld [vmem:[#allocation3 + $0x118] sm:$0xff] }
 0x288   :  { %3095 = vrot.lane.b32.xlu1 %v3077_v31, %s6654_s29  ;;  %v1523_v32 = vpop.f32.mrb[204].mxu0 }
 0x289   :  { %v2239_v33 = vmax.f32 %v1523_v32, 0.0  ;;  %v2916_v34 = vpop.permute.xlu0 %2915  ;;  %v5956_v35 = vpop.f32.mrb[205].mxu0 }
 0x28a   :  { %2942 = vst.msk [vmem:[#allocation3 + $0x8] sm:$0xff] %vm2761_vm6, %v2916_v34  ;;  %v3078_v36 = vld [vmem:[#allocation2 + $0x320] sm:$0xff]  ;;  %v3387_v34 = vld [vmem:[#allocation2 + $0x530] sm:$0xff] }
 0x28b   :  { %2465 = vst.msk [vmem:[#allocation2 + $0x330] sm:$0xff] %vm2362_vm3, %v2239_v33 }
 0x28c   :  { %3097 = vrot.lane.b32.xlu1 %v3078_v36, %s6654_s29  ;;  %v1528_v37 = vpop.f32.mrb[206].mxu0 }
 0x28d   :  { %v2240_v38 = vmax.f32 %v1528_v37, 0.0  ;;  %v2918_v39 = vpop.permute.xlu0 %2917  ;;  %v5959_v40 = vpop.f32.mrb[207].mxu0 }
 0x28e   :  { %2943 = vst.msk [vmem:[#allocation3 + $0x40] sm:$0xff] %vm2761_vm6, %v2918_v39  ;;  %v3079_v41 = vld [vmem:[#allocation2 + $0x328] sm:$0xff] }
 0x28f   :  { %2466 = vst.msk [vmem:[#allocation2 + $0x338] sm:$0xff] %vm2362_vm3, %v2240_v38  ;;  %v2068_v13 = vpop.f32.mrb[144].mxu1 }
 0x290   :  { %3099 = vrot.lane.b32.xlu1 %v3079_v41, %s6654_s29  ;;  %v1533_v43 = vpop.f32.mrb[208].mxu0  ;;  %v2348_v18 = vmax.f32 %v2068_v13, 0.0  ;;  %v6283_v21 = vpop.f32.mrb[145].mxu1 }
 0x291   :  { %v2241_v44 = vmax.f32 %v1533_v43, 0.0  ;;  %v2920_v45 = vpop.permute.xlu0 %2919  ;;  %v5962_v46 = vpop.f32.mrb[209].mxu0  ;;  %v3690_v48 = vld [vmem:[#allocation3 + $0x8] sm:$0xff] }
 0x292   :  { %2944 = vst.msk [vmem:[#allocation3 + $0x78] sm:$0xff] %vm2761_vm6, %v2920_v45  ;;  %3950 = vmatprep.mubr.f32.mxu1 %v3690_v48  ;;  %v3080_v50 = vld [vmem:[#allocation2 + $0x330] sm:$0xff]  ;;  %v3441_v45 = vld [vmem:[#allocation2 + $0x578] sm:$0xff] }
 0x293   :  { %2467 = vst.msk [vmem:[#allocation2 + $0x340] sm:$0xff] %vm2362_vm3, %v2241_v44  ;;  %3951 = vmatmul.mubr.f32.vlgmr.msra.gmra.mrb[172].mxu1 %v3689_v49  ;;  %2574 = vst.msk [vmem:[#allocation2 + $0x698] sm:$0xff] %vm2362_vm3, %v2348_v18  ;;  %v2073_v37 = vpop.f32.mrb[146].mxu1  ;;  %v3731_v44 = vld [vmem:[#allocation3 + $0x150] sm:$0xff] }
 0x294   :  { %3101 = vrot.lane.b32.xlu1 %v3080_v50, %s6654_s29  ;;  %v1538_v51 = vpop.f32.mrb[210].mxu0  ;;  %v2349_v43 = vmax.f32 %v2073_v37, 0.0  ;;  %v6286_v46 = vpop.f32.mrb[147].mxu1  ;;  %v3443_v37 = vld [vmem:[#allocation2 + $0x588] sm:$0xff] }
 0x295   :  { %v2242_v52 = vmax.f32 %v1538_v51, 0.0  ;;  %v2922_v53 = vpop.permute.xlu0 %2921  ;;  %v5965_v54 = vpop.f32.mrb[211].mxu0  ;;  %v3697_v55 = vld [vmem:[#allocation3 + $0x40] sm:$0xff] }
 0x296   :  { %2945 = vst.msk [vmem:[#allocation3 + $0xb0] sm:$0xff] %vm2761_vm6, %v2922_v53  ;;  %3955 = vmatprep.mubr.f32.mxu1 %v3697_v55  ;;  %v3081_v57 = vld [vmem:[#allocation2 + $0x338] sm:$0xff]  ;;  %v3334_v54 = vld [vmem:[#allocation2 + $0x4f0] sm:$0xff] }
 0x297   :  { %2468 = vst.msk [vmem:[#allocation2 + $0x348] sm:$0xff] %vm2362_vm3, %v2242_v52  ;;  %3956 = vmatmul.mubr.f32.gmra.mrb[174].mxu1 %v3696_v56  ;;  %2575 = vst.msk [vmem:[#allocation2 + $0x6a0] sm:$0xff] %vm2362_vm3, %v2349_v43 }
 0x298   :  { %3103 = vrot.lane.b32.xlu1 %v3081_v57, %s6654_s29  ;;  %v1543_v58 = vpop.f32.mrb[212].mxu0 }
 0x299   :  { %v2243_v59 = vmax.f32 %v1543_v58, 0.0  ;;  %v2924_v61 = vpop.permute.xlu0 %2923  ;;  %v5968_v62 = vpop.f32.mrb[213].mxu0  ;;  %v3704_v63 = vld [vmem:[#allocation3 + $0x78] sm:$0xff] }
 0x29a   :  { %2946 = vst.msk [vmem:[#allocation3 + $0xe8] sm:$0xff] %vm2761_vm6, %v2924_v61  ;;  %3960 = vmatprep.mubr.f32.mxu1 %v3704_v63  ;;  %v3082_v2 = vld [vmem:[#allocation2 + $0x340] sm:$0xff]  ;;  %v3738_v63 = vld [vmem:[#allocation3 + $0x188] sm:$0xff] }
 0x29b   :  { %2469 = vst.msk [vmem:[#allocation2 + $0x350] sm:$0xff] %vm2362_vm3, %v2243_v59  ;;  %3961 = vmatmul.mubr.f32.gmra.mrb[176].mxu1 %v3703_v1  ;;  %v3388_v1 = vld [vmem:[#allocation2 + $0x538] sm:$0xff] }
 0x29c   :  { %3105 = vrot.lane.b32.xlu1 %v3082_v2, %s6654_s29  ;;  %v1548_v3 = vpop.f32.mrb[214].mxu0 }
 0x29d   :  { %v2244_v4 = vmax.f32 %v1548_v3, 0.0  ;;  %v2926_v5 = vpop.permute.xlu0 %2925  ;;  %v5971_v7 = vpop.f32.mrb[215].mxu0  ;;  %v3711_v8 = vld [vmem:[#allocation3 + $0xb0] sm:$0xff] }
 0x29e   :  { %2947 = vst.msk [vmem:[#allocation3 + $0x120] sm:$0xff] %vm2761_vm6, %v2926_v5  ;;  %3965 = vmatprep.mubr.f32.mxu1 %v3711_v8  ;;  %v3083_v10 = vld [vmem:[#allocation2 + $0x348] sm:$0xff] }
 0x29f   :  { %2470 = vst.msk [vmem:[#allocation2 + $0x358] sm:$0xff] %vm2362_vm3, %v2244_v4  ;;  %3966 = vmatmul.mubr.f32.gmra.mrb[178].mxu1 %v3710_v9 }
 0x2a0   :  { %3107 = vrot.lane.b32.xlu1 %v3083_v10, %s6654_s29  ;;  %v1553_v11 = vpop.f32.mrb[216].mxu0 }
 0x2a1   :  { %v2245_v14 = vmax.f32 %v1553_v11, 0.0  ;;  %v3636_v15 = vpop.permute.xlu0 %3635  ;;  %v5974_v16 = vpop.f32.mrb[217].mxu0  ;;  %v3718_v17 = vld [vmem:[#allocation3 + $0xe8] sm:$0xff]  ;;  %v3442_v11 = vld [vmem:[#allocation2 + $0x580] sm:$0xff] }
 0x2a2   :  { %3662 = vst.msk [vmem:[#allocation3 + $0x28] sm:$0xff] %vm2761_vm6, %v3636_v15  ;;  %3970 = vmatprep.mubr.f32.mxu1 %v3718_v17  ;;  %v3084_v20 = vld [vmem:[#allocation2 + $0x350] sm:$0xff]  ;;  %v2078_v3 = vpop.f32.mrb[148].mxu1 }
 0x2a3   :  { %2471 = vst.msk [vmem:[#allocation2 + $0x360] sm:$0xff] %vm2362_vm3, %v2245_v14  ;;  %3971 = vmatmul.mubr.f32.gmra.mrb[180].mxu1 %v3717_v19  ;;  %v2350_v5 = vmax.f32 %v2078_v3, 0.0  ;;  %v6289_v7 = vpop.f32.mrb[149].mxu1  ;;  %v3745_v19 = vld [vmem:[#allocation3 + $0x1c0] sm:$0xff] }
 0x2a4   :  { %3109 = vrot.lane.b32.xlu1 %v3084_v20, %s6654_s29  ;;  %v1558_v22 = vpop.f32.mrb[218].mxu0  ;;  %v3335_v20 = vld [vmem:[#allocation2 + $0x4f8] sm:$0xff] }
 0x2a5   :  { %v2246_v23 = vmax.f32 %v1558_v22, 0.0  ;;  %v2928_v25 = vpop.permute.xlu0 %2927  ;;  %v5977_v26 = vpop.f32.mrb[219].mxu0  ;;  %v3725_v27 = vld [vmem:[#allocation3 + $0x120] sm:$0xff]  ;;  %2576 = vst.msk [vmem:[#allocation2 + $0x6a8] sm:$0xff] %vm2362_vm3, %v2350_v5 }
 0x2a6   :  { %2948 = vst.msk [vmem:[#allocation3 + $0x158] sm:$0xff] %vm2761_vm6, %v2928_v25  ;;  %3975 = vmatprep.mubr.f32.mxu1 %v3725_v27  ;;  %v3085_v29 = vld [vmem:[#allocation2 + $0x358] sm:$0xff] }
 0x2a7   :  { %2472 = vst.msk [vmem:[#allocation2 + $0x368] sm:$0xff] %vm2362_vm3, %v2246_v23  ;;  %3976 = vmatmul.mubr.f32.gmra.mrb[182].mxu1 %v3724_v28  ;;  %v3389_v28 = vld [vmem:[#allocation2 + $0x540] sm:$0xff] }
 0x2a8   :  { %3111 = vrot.lane.b32.xlu1 %v3085_v29, %s6654_s29  ;;  %v1563_v30 = vpop.f32.mrb[220].mxu0  ;;  %v2083_v29 = vpop.f32.mrb[150].mxu1 }
 0x2a9   :  { %v2247_v31 = vmax.f32 %v1563_v30, 0.0  ;;  %v3638_v32 = vpop.permute.xlu0 %3637  ;;  %v5980_v33 = vpop.f32.mrb[221].mxu0 }
 0x2aa   :  { %3663 = vst.msk [vmem:[#allocation3 + $0x60] sm:$0xff] %vm2761_vm6, %v3638_v32  ;;  %v3131_v35 = vld [vmem:[#allocation2 + $0x360] sm:$0xff]  ;;  %v6292_v32 = vpop.f32.mrb[151].mxu1 }
 0x2ab   :  { %2473 = vst.msk [vmem:[#allocation2 + $0x370] sm:$0xff] %vm2362_vm3, %v2247_v31  ;;  %3140 = vst.msk [vmem:[#allocation3 + $0x18] sm:$0xff] %vm2362_vm3, %v3131_v35  ;;  %v2351_v31 = vmax.f32 %v2083_v29, 0.0  ;;  %v3445_v32 = vld [vmem:[#allocation2 + $0x598] sm:$0xff] }
 0x2ac   :  { %3409 = vrot.lane.b32.xlu1 %v3387_v34, %s6656_s15  ;;  %v1568_v36 = vpop.f32.mrb[222].mxu0 }
 0x2ad   :  { %v2248_v38 = vmax.f32 %v1568_v36, 0.0  ;;  %v2930_v39 = vpop.permute.xlu0 %2929  ;;  %v5983_v40 = vpop.f32.mrb[223].mxu0  ;;  %v3732_v41 = vld [vmem:[#allocation3 + $0x158] sm:$0xff]  ;;  %2577 = vst.msk [vmem:[#allocation2 + $0x6b0] sm:$0xff] %vm2362_vm3, %v2351_v31 }
 0x2ae   :  { %2949 = vst.msk [vmem:[#allocation3 + $0x190] sm:$0xff] %vm2761_vm6, %v2930_v39  ;;  %3980 = vmatprep.mubr.f32.mxu1 %v3732_v41  ;;  %v3132_v48 = vld [vmem:[#allocation2 + $0x368] sm:$0xff] }
 0x2af   :  { %2474 = vst.msk [vmem:[#allocation2 + $0x378] sm:$0xff] %vm2362_vm3, %v2248_v38  ;;  %3981 = vmatmul.mubr.f32.gmra.mrb[184].mxu1 %v3731_v44  ;;  %3141 = vst.msk [vmem:[#allocation3 + $0x50] sm:$0xff] %vm2362_vm3, %v3132_v48  ;;  %v3336_v44 = vld [vmem:[#allocation2 + $0x500] sm:$0xff] }
 0x2b0   :  { %3463 = vrot.lane.b32.xlu1 %v3441_v45, %s6654_s29  ;;  %v1573_v49 = vpop.f32.mrb[224].mxu0 }
 0x2b1   :  { %v2249_v50 = vmax.f32 %v1573_v49, 0.0  ;;  %v3640_v51 = vpop.permute.xlu0 %3639  ;;  %v2988_v52 = vpop.permute.xlu1 %2987 }
 0x2b2   :  { %3664 = vst.msk [vmem:[#allocation3 + $0x98] sm:$0xff] %vm2761_vm6, %v3640_v51  ;;  %v5986_v53 = vpop.f32.mrb[225].mxu0  ;;  %v3133_v55 = vld [vmem:[#allocation2 + $0x370] sm:$0xff]  ;;  %v3390_v51 = vld [vmem:[#allocation2 + $0x548] sm:$0xff] }
 0x2b3   :  { %3014 = vst.msk [vmem:[#allocation3 + $0x10] sm:$0xff] %vm2651_vm4, %v2988_v52  ;;  %v2088_v53 = vpop.f32.mrb[152].mxu1 }
 0x2b4   :  { %2475 = vst.msk [vmem:[#allocation2 + $0x380] sm:$0xff] %vm2362_vm3, %v2249_v50  ;;  %3357 = vrot.lane.b32.xlu1 %v3334_v54, %s6655_s21  ;;  %3142 = vst.msk [vmem:[#allocation3 + $0x88] sm:$0xff] %vm2362_vm3, %v3133_v55  ;;  %v1578_v56 = vpop.f32.mrb[226].mxu0  ;;  %v2352_v54 = vmax.f32 %v2088_v53, 0.0  ;;  %v6295_v55 = vpop.f32.mrb[153].mxu1 }
 0x2b5   :  { %v2250_v57 = vmax.f32 %v1578_v56, 0.0  ;;  %v2932_v58 = vpop.permute.xlu0 %2931  ;;  %v2990_v59 = vpop.permute.xlu1 %2989  ;;  %v3739_v61 = vld [vmem:[#allocation3 + $0x190] sm:$0xff] }
 0x2b6   :  { %2950 = vst.msk [vmem:[#allocation3 + $0x1c8] sm:$0xff] %vm2761_vm6, %v2932_v58  ;;  %v5989_v62 = vpop.f32.mrb[227].mxu0  ;;  %3985 = vmatprep.mubr.f32.mxu1 %v3739_v61  ;;  %v3134_v2 = vld [vmem:[#allocation2 + $0x378] sm:$0xff]  ;;  %v3444_v61 = vld [vmem:[#allocation2 + $0x590] sm:$0xff] }
 0x2b7   :  { %3015 = vst.msk [vmem:[#allocation3 + $0x48] sm:$0xff] %vm2651_vm4, %v2990_v59  ;;  %3986 = vmatmul.mubr.f32.gmra.mrb[186].mxu1 %v3738_v63  ;;  %v2093_v63 = vpop.f32.mrb[154].mxu1 }
 0x2b8   :  { %2476 = vst.msk [vmem:[#allocation2 + $0x388] sm:$0xff] %vm2362_vm3, %v2250_v57  ;;  %3411 = vrot.lane.b32.xlu1 %v3388_v1, %s6656_s15  ;;  %3143 = vst.msk [vmem:[#allocation3 + $0xc0] sm:$0xff] %vm2362_vm3, %v3134_v2  ;;  %v1583_v4 = vpop.f32.mrb[228].mxu0  ;;  %v2353_v2 = vmax.f32 %v2093_v63, 0.0  ;;  %v6298_v3 = vpop.f32.mrb[155].mxu1 }
 0x2b9   :  { %v2251_v8 = vmax.f32 %v1583_v4, 0.0  ;;  %v2992_v9 = vpop.permute.xlu1 %2991  ;;  %v5992_v10 = vpop.f32.mrb[229].mxu0  ;;  %2578 = vst.msk [vmem:[#allocation2 + $0x6b8] sm:$0xff] %vm2362_vm3, %v2352_v54 }
 0x2ba   :  { %3016 = vst.msk [vmem:[#allocation3 + $0x80] sm:$0xff] %vm2651_vm4, %v2992_v9  ;;  %v3642_v21 = vpop.permute.xlu0 %3641  ;;  %v2098_v10 = vpop.f32.mrb[156].mxu1 }
 0x2bb   :  { %v3135_v13 = vld [vmem:[#allocation2 + $0x380] sm:$0xff]  ;;  %2477 = vst.msk [vmem:[#allocation2 + $0x390] sm:$0xff] %vm2362_vm3, %v2251_v8  ;;  %v3337_v8 = vld [vmem:[#allocation2 + $0x508] sm:$0xff]  ;;  %2579 = vst.msk [vmem:[#allocation2 + $0x6c0] sm:$0xff] %vm2362_vm3, %v2353_v2 }
 0x2bc   :  { %3465 = vrot.lane.b32.xlu1 %v3442_v11, %s6654_s29  ;;  %3144 = vst.msk [vmem:[#allocation3 + $0xf8] sm:$0xff] %vm2362_vm3, %v3135_v13  ;;  %v1588_v14 = vpop.f32.mrb[230].mxu0  ;;  %v2354_v11 = vmax.f32 %v2098_v10, 0.0  ;;  %v6301_v13 = vpop.f32.mrb[157].mxu1 }
 0x2bd   :  { %v2252_v15 = vmax.f32 %v1588_v14, 0.0  ;;  %v2994_v16 = vpop.permute.xlu1 %2993  ;;  %v5995_v17 = vpop.f32.mrb[231].mxu0  ;;  %v3746_v18 = vld [vmem:[#allocation3 + $0x1c8] sm:$0xff]  ;;  %3665 = vst.msk [vmem:[#allocation3 + $0xd0] sm:$0xff] %vm2761_vm6, %v3642_v21 }
 0x2be   :  { %3017 = vst.msk [vmem:[#allocation3 + $0xb8] sm:$0xff] %vm2651_vm4, %v2994_v16  ;;  %3990 = vmatprep.mubr.f32.mxu1 %v3746_v18 }
 0x2bf   :  { %v3136_v22 = vld [vmem:[#allocation2 + $0x388] sm:$0xff]  ;;  %2478 = vst.msk [vmem:[#allocation2 + $0x398] sm:$0xff] %vm2362_vm3, %v2252_v15  ;;  %3991 = vmatmul.mubr.f32.gmra.mrb[188].mxu1 %v3745_v19  ;;  %v2103_v15 = vpop.f32.mrb[158].mxu1  ;;  %2580 = vst.msk [vmem:[#allocation2 + $0x6c8] sm:$0xff] %vm2362_vm3, %v2354_v11 }
 0x2c0   :  { %3359 = vrot.lane.b32.xlu1 %v3335_v20, %s6655_s21  ;;  %3145 = vst.msk [vmem:[#allocation3 + $0x130] sm:$0xff] %vm2362_vm3, %v3136_v22  ;;  %v1593_v23 = vpop.f32.mrb[232].mxu0  ;;  %v2355_v19 = vmax.f32 %v2103_v15, 0.0  ;;  %v3391_v20 = vld [vmem:[#allocation2 + $0x550] sm:$0xff]  ;;  %v6304_v22 = vpop.f32.mrb[159].mxu1 }
 0x2c1   :  { %v2253_v25 = vmax.f32 %v1593_v23, 0.0  ;;  %v5998_v27 = vpop.f32.mrb[233].mxu0  ;;  %v2108_v23 = vpop.f32.mrb[160].mxu1 }
 0x2c2   :  { %v2996_v26 = vpop.permute.xlu1 %2995  ;;  %v3137_v30 = vld [vmem:[#allocation2 + $0x390] sm:$0xff]  ;;  %2581 = vst.msk [vmem:[#allocation2 + $0x6d0] sm:$0xff] %vm2362_vm3, %v2355_v19  ;;  %v6307_v27 = vpop.f32.mrb[161].mxu1  ;;  %v3671_v31 = vld [vmem:[#allocation2 + $0x6c0] sm:$0xff] }
 0x2c3   :  { %3018 = vst.msk [vmem:[#allocation3 + $0xf0] sm:$0xff] %vm2651_vm4, %v2996_v26  ;;  %v2356_v26 = vmax.f32 %v2108_v23, 0.0 }
 0x2c4   :  { %2479 = vst.msk [vmem:[#allocation2 + $0x3a0] sm:$0xff] %vm2362_vm3, %v2253_v25  ;;  %3413 = vrot.lane.b32.xlu1 %v3389_v28, %s6656_s15  ;;  %3146 = vst.msk [vmem:[#allocation3 + $0x168] sm:$0xff] %vm2362_vm3, %v3137_v30  ;;  %v1598_v33 = vpop.f32.mrb[234].mxu0 }
 0x2c5   :  { %v2254_v34 = vmax.f32 %v1598_v33, 0.0  ;;  %v6001_v36 = vpop.f32.mrb[235].mxu0  ;;  %3680 = vst.msk [vmem:[#allocation3 + $0x30] sm:$0xff] %vm2362_vm3, %v3671_v31  ;;  %2582 = vst.msk [vmem:[#allocation2 + $0x6d8] sm:$0xff] %vm2362_vm3, %v2356_v26 }
 0x2c6   :  { %v2998_v35 = vpop.permute.xlu1 %2997  ;;  %v3138_v38 = vld [vmem:[#allocation2 + $0x398] sm:$0xff] }
 0x2c7   :  { %3019 = vst.msk [vmem:[#allocation3 + $0x128] sm:$0xff] %vm2651_vm4, %v2998_v35 }
 0x2c8   :  { %2480 = vst.msk [vmem:[#allocation2 + $0x3a8] sm:$0xff] %vm2362_vm3, %v2254_v34  ;;  %3467 = vrot.lane.b32.xlu1 %v3443_v37, %s6654_s29  ;;  %3147 = vst.msk [vmem:[#allocation3 + $0x1a0] sm:$0xff] %vm2362_vm3, %v3138_v38  ;;  %v1603_v39 = vpop.f32.mrb[236].mxu0  ;;  %v2113_v34 = vpop.f32.mrb[162].mxu1  ;;  %v3672_v38 = vld [vmem:[#allocation2 + $0x6c8] sm:$0xff] }
 0x2c9   :  { %v2255_v40 = vmax.f32 %v1603_v39, 0.0  ;;  %v6004_v43 = vpop.f32.mrb[237].mxu0  ;;  %v2357_v35 = vmax.f32 %v2113_v34, 0.0  ;;  %v6310_v36 = vpop.f32.mrb[163].mxu1  ;;  %3681 = vst.msk [vmem:[#allocation3 + $0x68] sm:$0xff] %vm2362_vm3, %v3672_v38 }
 0x2ca   :  { %v3000_v41 = vpop.permute.xlu1 %2999  ;;  %v2118_v39 = vpop.f32.mrb[164].mxu1  ;;  %v3803_v36 = vld [vmem:[%s9405_s2 + $0x198] sm:$0xff] }
 0x2cb   :  { %3020 = vst.msk [vmem:[#allocation3 + $0x160] sm:$0xff] %vm2651_vm4, %v3000_v41  ;;  %v3139_v45 = vld [vmem:[#allocation2 + $0x3a0] sm:$0xff] }
 0x2cc   :  { %2481 = vst.msk [vmem:[#allocation2 + $0x3b0] sm:$0xff] %vm2362_vm3, %v2255_v40  ;;  %3361 = vrot.lane.b32.xlu1 %v3336_v44, %s6655_s21  ;;  %3148 = vst.msk [vmem:[#allocation3 + $0x1d8] sm:$0xff] %vm2362_vm3, %v3139_v45  ;;  %v1608_v46 = vpop.f32.mrb[238].mxu0  ;;  %v2358_v44 = vmax.f32 %v2118_v39, 0.0  ;;  %v3786_v39 = vld [vmem:[%s9405_s2 + $0x110] sm:$0xff] }
 0x2cd   :  { %v2256_v48 = vmax.f32 %v1608_v46, 0.0  ;;  %v6007_v50 = vpop.f32.mrb[239].mxu0  ;;  %2583 = vst.msk [vmem:[#allocation2 + $0x6e0] sm:$0xff] %vm2362_vm3, %v2357_v35  ;;  %v3673_v46 = vld [vmem:[#allocation2 + $0x6d0] sm:$0xff] }
 0x2ce   :  { %v3002_v49 = vpop.permute.xlu1 %3001  ;;  %3682 = vst.msk [vmem:[#allocation3 + $0xa0] sm:$0xff] %vm2362_vm3, %v3673_v46  ;;  %2584 = vst.msk [vmem:[#allocation2 + $0x6e8] sm:$0xff] %vm2362_vm3, %v2358_v44  ;;  %v3802_v35 = vld [vmem:[%s9405_s2 + $0x190] sm:$0xff] }
 0x2cf   :  { %3021 = vst.msk [vmem:[#allocation3 + $0x198] sm:$0xff] %vm2651_vm4, %v3002_v49  ;;  %v3149_v52 = vld [vmem:[#allocation2 + $0x3a8] sm:$0xff]  ;;  %v6450_v38 = vpack.c.bf16 %v3803_v36, %v3802_v35 }
 0x2d0   :  { %2482 = vst.msk [vmem:[#allocation2 + $0x3b8] sm:$0xff] %vm2362_vm3, %v2256_v48  ;;  %3415 = vrot.lane.b32.xlu1 %v3390_v51, %s6656_s15  ;;  %3167 = vrot.lane.b32.xlu0 %v3149_v52, %s6655_s21  ;;  %v1613_v56 = vpop.f32.mrb[240].mxu0  ;;  %v6313_v48 = vpop.f32.mrb[165].mxu1 }
 0x2d1   :  { %v2257_v57 = vmax.f32 %v1613_v56, 0.0  ;;  %v6010_v59 = vpop.f32.mrb[241].mxu0  ;;  %v2123_v49 = vpop.f32.mrb[166].mxu1  ;;  %v3674_v56 = vld [vmem:[#allocation2 + $0x6d8] sm:$0xff]  ;;  %v3804_v48 = vld [vmem:[%s9405_s2 + $0x1a0] sm:$0xff] }
 0x2d2   :  { %v3004_v58 = vpop.permute.xlu1 %3003  ;;  %v2359_v51 = vmax.f32 %v2123_v49, 0.0  ;;  %v6316_v52 = vpop.f32.mrb[167].mxu1  ;;  %3683 = vst.msk [vmem:[#allocation3 + $0xd8] sm:$0xff] %vm2362_vm3, %v3674_v56  ;;  %v3805_v49 = vld [vmem:[%s9405_s2 + $0x1a8] sm:$0xff] }
 0x2d3   :  { %3022 = vst.msk [vmem:[#allocation3 + $0x1d0] sm:$0xff] %vm2651_vm4, %v3004_v58  ;;  %v3150_v62 = vld [vmem:[#allocation2 + $0x3b0] sm:$0xff]  ;;  %v2128_v58 = vpop.f32.mrb[168].mxu1  ;;  %v3788_v52 = vld [vmem:[%s9405_s2 + $0x120] sm:$0xff] }
 0x2d4   :  { %2483 = vst.msk [vmem:[#allocation2 + $0x3c0] sm:$0xff] %vm2362_vm3, %v2257_v57  ;;  %3469 = vrot.lane.b32.xlu1 %v3444_v61, %s6654_s29  ;;  %3169 = vrot.lane.b32.xlu0 %v3150_v62, %s6655_s21  ;;  %v1618_v1 = vpop.f32.mrb[242].mxu0  ;;  %2585 = vst.msk [vmem:[#allocation2 + $0x6f0] sm:$0xff] %vm2362_vm3, %v2359_v51  ;;  %v2360_v59 = vmax.f32 %v2128_v58, 0.0  ;;  %v6319_v61 = vpop.f32.mrb[169].mxu1  ;;  %v3675_v63 = vld [vmem:[#allocation2 + $0x6e0] sm:$0xff]  ;;  %v6454_v51 = vpack.c.bf16 %v3805_v49, %v3804_v48 }
 0x2d5   :  { %v2258_v4 = vmax.f32 %v1618_v1, 0.0  ;;  %v6013_v7 = vpop.f32.mrb[243].mxu0  ;;  %3684 = vst.msk [vmem:[#allocation3 + $0x110] sm:$0xff] %vm2362_vm3, %v3675_v63  ;;  %v3807_v61 = vld [vmem:[%s9405_s2 + $0x1b8] sm:$0xff] }
 0x2d6   :  { %v3042_v5 = vpop.permute.xlu1 %3041  ;;  %2586 = vst.msk [vmem:[#allocation2 + $0x6f8] sm:$0xff] %vm2362_vm3, %v2360_v59  ;;  %v3806_v59 = vld [vmem:[%s9405_s2 + $0x1b0] sm:$0xff] }
 0x2d7   :  { %3068 = vst.msk [vmem:[#allocation3 + $0x10] sm:$0xff] %vm2706_vm5, %v3042_v5  ;;  %v3151_v9 = vld [vmem:[#allocation2 + $0x3b8] sm:$0xff]  ;;  %v6458_v63 = vpack.c.bf16 %v3807_v61, %v3806_v59  ;;  %v3833_v59 = vld [vmem:[%s9405_s2 + $0x288] sm:$0xff] }
 0x2d8   :  { %2484 = vst.msk [vmem:[#allocation2 + $0x3c8] sm:$0xff] %vm2362_vm3, %v2258_v4  ;;  %3363 = vrot.lane.b32.xlu1 %v3337_v8, %s6655_s21  ;;  %3171 = vrot.lane.b32.xlu0 %v3151_v9, %s6655_s21  ;;  %v1623_v14 = vpop.f32.mrb[244].mxu0  ;;  %v3676_v8 = vld [vmem:[#allocation2 + $0x6e8] sm:$0xff] }
 0x2d9   :  { %v2259_v16 = vmax.f32 %v1623_v14, 0.0  ;;  %v6016_v18 = vpop.f32.mrb[245].mxu0  ;;  %v2133_v1 = vpop.f32.mrb[170].mxu1  ;;  %3685 = vst.msk [vmem:[#allocation3 + $0x148] sm:$0xff] %vm2362_vm3, %v3676_v8 }
 0x2da   :  { %v3044_v17 = vpop.permute.xlu1 %3043  ;;  %v2361_v5 = vmax.f32 %v2133_v1, 0.0  ;;  %v6322_v9 = vpop.f32.mrb[171].mxu1  ;;  %v3801_v18 = vld [vmem:[%s9405_s2 + $0x188] sm:$0xff]  ;;  %v3790_v1 = vld [vmem:[%s9405_s2 + $0x130] sm:$0xff] }
 0x2db   :  { %3069 = vst.msk [vmem:[#allocation3 + $0x48] sm:$0xff] %vm2706_vm5, %v3044_v17  ;;  %v3152_v21 = vld [vmem:[#allocation2 + $0x3c0] sm:$0xff]  ;;  %v3677_v15 = vld [vmem:[#allocation2 + $0x6f0] sm:$0xff] }
 0x2dc   :  { %2485 = vst.msk [vmem:[#allocation2 + $0x3d0] sm:$0xff] %vm2362_vm3, %v2259_v16  ;;  %3417 = vrot.lane.b32.xlu1 %v3391_v20, %s6656_s15  ;;  %3173 = vrot.lane.b32.xlu0 %v3152_v21, %s6655_s21  ;;  %v1628_v25 = vpop.f32.mrb[246].mxu0  ;;  %2587 = vst.msk [vmem:[#allocation2 + $0x700] sm:$0xff] %vm2362_vm3, %v2361_v5  ;;  %v3800_v17 = vld [vmem:[%s9405_s2 + $0x180] sm:$0xff]  ;;  %v3809_v5 = vld [vmem:[%s9405_s2 + $0x1c8] sm:$0xff] }
 0x2dd   :  { %v2260_v28 = vmax.f32 %v1628_v25, 0.0  ;;  %v6019_v30 = vpop.f32.mrb[247].mxu0  ;;  %3686 = vst.msk [vmem:[#allocation3 + $0x180] sm:$0xff] %vm2362_vm3, %v3677_v15  ;;  %v6446_v19 = vpack.c.bf16 %v3801_v18, %v3800_v17  ;;  %v3678_v21 = vld [vmem:[#allocation2 + $0x6f8] sm:$0xff] }
 0x2de   :  { %v3046_v29 = vpop.permute.xlu1 %3045  ;;  %3687 = vst.msk [vmem:[#allocation3 + $0x1b8] sm:$0xff] %vm2362_vm3, %v3678_v21  ;;  %v3810_v21 = vld [vmem:[%s9405_s2 + $0x1d0] sm:$0xff] }
 0x2df   :  { %3070 = vst.msk [vmem:[#allocation3 + $0x80] sm:$0xff] %vm2706_vm5, %v3046_v29  ;;  %v3153_v33 = vld [vmem:[#allocation2 + $0x3c8] sm:$0xff]  ;;  %6447 = vmatprep.subr.bf16.mxu1 %v6446_v19 }
 0x2e0   :  { %2486 = vst.msk [vmem:[#allocation2 + $0x3d8] sm:$0xff] %vm2362_vm3, %v2260_v28  ;;  %3471 = vrot.lane.b32.xlu1 %v3445_v32, %s6654_s29  ;;  %3175 = vrot.lane.b32.xlu0 %v3153_v33, %s6655_s21  ;;  %v1633_v37 = vpop.f32.mrb[248].mxu0  ;;  %v3784_v28 = vld [vmem:[%s9405_s2 + $0x100] sm:$0xff]  ;;  %v3785_v29 = vld [vmem:[%s9405_s2 + $0x108] sm:$0xff] }
 0x2e1   :  { %v2261_v40 = vmax.f32 %v1633_v37, 0.0  ;;  %v6022_v43 = vpop.f32.mrb[249].mxu0  ;;  %v6448_v31 = vpack.c.bf16 %v3785_v29, %v3784_v28  ;;  %v3812_v29 = vld [vmem:[%s9405_s2 + $0x1e0] sm:$0xff] }
 0x2e2   :  { %v3048_v41 = vpop.permute.xlu1 %3047 }
 0x2e3   :  { %3071 = vst.msk [vmem:[#allocation3 + $0xb8] sm:$0xff] %vm2706_vm5, %v3048_v41  ;;  %v3154_v45 = vld [vmem:[#allocation2 + $0x3d0] sm:$0xff]  ;;  %v3679_v27 = vld [vmem:[#allocation2 + $0x700] sm:$0xff]  ;;  %6449 = vmatpush3.bf16.msra.mxu1 %v6448_v31 }
 0x2e4   :  { %2487 = vst.msk [vmem:[#allocation2 + $0x3e0] sm:$0xff] %vm2362_vm3, %v2261_v40  ;;  %3177 = vrot.lane.b32.xlu0 %v3154_v45, %s6655_s21  ;;  %v1638_v50 = vpop.f32.mrb[250].mxu0  ;;  %3688 = vst.msk [vmem:[#allocation3 + $0x1f0] sm:$0xff] %vm2362_vm3, %v3679_v27  ;;  %v3787_v40 = vld [vmem:[%s9405_s2 + $0x118] sm:$0xff]  ;;  %6451 = vmatprep.subr.bf16.mxu1 %v6450_v38  ;;  %v3797_v38 = vld [vmem:[%s9405_s2 + $0x168] sm:$0xff] }
 0x2e5   :  { %v2262_v53 = vmax.f32 %v1638_v50, 0.0  ;;  %v6025_v55 = vpop.f32.mrb[251].mxu0  ;;  %v6452_v41 = vpack.c.bf16 %v3787_v40, %v3786_v39  ;;  %v3795_v27 = vld [vmem:[%s9405_s2 + $0x158] sm:$0xff] }
 0x2e6   :  { %v3050_v54 = vpop.permute.xlu1 %3049 }
 0x2e7   :  { %3072 = vst.msk [vmem:[#allocation3 + $0xf0] sm:$0xff] %vm2706_vm5, %v3050_v54  ;;  %v3155_v57 = vld [vmem:[#allocation2 + $0x3d8] sm:$0xff]  ;;  %6453 = vmatpush3.bf16.msra.mxu1 %v6452_v41 }
 0x2e8   :  { %2488 = vst.msk [vmem:[#allocation2 + $0x3e8] sm:$0xff] %vm2362_vm3, %v2262_v53  ;;  %3179 = vrot.lane.b32.xlu0 %v3155_v57, %s6655_s21  ;;  %v1643_v62 = vpop.f32.mrb[252].mxu0  ;;  %v3789_v53 = vld [vmem:[%s9405_s2 + $0x128] sm:$0xff]  ;;  %6455 = vmatprep.subr.bf16.mxu1 %v6454_v51  ;;  %v3799_v51 = vld [vmem:[%s9405_s2 + $0x178] sm:$0xff] }
 0x2e9   :  { %v2263_v2 = vmax.f32 %v1643_v62, 0.0  ;;  %v6028_v4 = vpop.f32.mrb[253].mxu0  ;;  %v6456_v54 = vpack.c.bf16 %v3789_v53, %v3788_v52 }
 0x2ea   :  { %v3052_v3 = vpop.permute.xlu1 %3051  ;;  %v3808_v4 = vld [vmem:[%s9405_s2 + $0x1c0] sm:$0xff] }
 0x2eb   :  { %3073 = vst.msk [vmem:[#allocation3 + $0x128] sm:$0xff] %vm2706_vm5, %v3052_v3  ;;  %v3156_v7 = vld [vmem:[#allocation2 + $0x3e0] sm:$0xff]  ;;  %6457 = vmatpush3.bf16.msra.mxu1 %v6456_v54  ;;  %v6462_v9 = vpack.c.bf16 %v3809_v5, %v3808_v4 }
 0x2ec   :  { %2489 = vst.msk [vmem:[#allocation2 + $0x3f0] sm:$0xff] %vm2362_vm3, %v2263_v2  ;;  %3181 = vrot.lane.b32.xlu0 %v3156_v7, %s6655_s21  ;;  %v1648_v10 = vpop.f32.mrb[254].mxu0  ;;  %v3791_v2 = vld [vmem:[%s9405_s2 + $0x138] sm:$0xff]  ;;  %v3792_v7 = vld [vmem:[%s9405_s2 + $0x140] sm:$0xff]  ;;  %6459 = vmatprep.subr.bf16.mxu1 %v6458_v63 }
 0x2ed   :  { %v2264_v11 = vmax.f32 %v1648_v10, 0.0  ;;  %v6031_v14 = vpop.f32.mrb[255].mxu0  ;;  %v6460_v3 = vpack.c.bf16 %v3791_v2, %v3790_v1  ;;  %v3793_v10 = vld [vmem:[%s9405_s2 + $0x148] sm:$0xff] }
 0x2ee   :  { %v3054_v13 = vpop.permute.xlu1 %3053 }
 0x2ef   :  { %3074 = vst.msk [vmem:[#allocation3 + $0x160] sm:$0xff] %vm2706_vm5, %v3054_v13  ;;  %v3157_v16 = vld [vmem:[#allocation2 + $0x3e8] sm:$0xff]  ;;  %6461 = vmatpush3.bf16.msra.mxu1 %v6460_v3 }
 0x2f0   :  { %2490 = vst.msk [vmem:[#allocation2 + $0x3f8] sm:$0xff] %vm2362_vm3, %v2264_v11  ;;  %3183 = vrot.lane.b32.xlu0 %v3157_v16, %s6655_s21  ;;  %v1653_v20 = vpop.f32.mrb[0].mxu0  ;;  %v6464_v16 = vpack.c.bf16 %v3793_v10, %v3792_v7  ;;  %6463 = vmatprep.subr.bf16.mxu1 %v6462_v9 }
 0x2f1   :  { %v2265_v22 = vmax.f32 %v1653_v20, 0.0  ;;  %v6034_v25 = vpop.f32.mrb[1].mxu0 }
 0x2f2   :  { %v3056_v23 = vpop.permute.xlu1 %3055 }
 0x2f3   :  { %3075 = vst.msk [vmem:[#allocation3 + $0x198] sm:$0xff] %vm2706_vm5, %v3056_v23  ;;  %v3203_v26 = vld [vmem:[#allocation2 + $0x3f0] sm:$0xff]  ;;  %6465 = vmatpush3.bf16.msra.mxu1 %v6464_v16 }
 0x2f4   :  { %2491 = vst.msk [vmem:[#allocation2 + $0x400] sm:$0xff] %vm2362_vm3, %v2265_v22  ;;  %3221 = vrot.lane.b32.xlu0 %v3203_v26, %s6656_s15  ;;  %v1658_v30 = vpop.f32.mrb[2].mxu0  ;;  %v3811_v22 = vld [vmem:[%s9405_s2 + $0x1d8] sm:$0xff]  ;;  %v3794_v26 = vld [vmem:[%s9405_s2 + $0x150] sm:$0xff] }
 0x2f5   :  { %v2266_v32 = vmax.f32 %v1658_v30, 0.0  ;;  %v6037_v34 = vpop.f32.mrb[3].mxu0  ;;  %v6466_v25 = vpack.c.bf16 %v3811_v22, %v3810_v21  ;;  %v6468_v28 = vpack.c.bf16 %v3795_v27, %v3794_v26  ;;  %v3813_v30 = vld [vmem:[%s9405_s2 + $0x1e8] sm:$0xff]  ;;  %v3567_v16 = vld [vmem:[#allocation2 + $0x650] sm:$0xff]  ;;  %v3568_v22 = vld [vmem:[#allocation2 + $0x658] sm:$0xff] }
 0x2f6   :  { %v3058_v33 = vpop.permute.xlu1 %3057  ;;  %v3515_v27 = vld [vmem:[#allocation2 + $0x618] sm:$0xff] }
 0x2f7   :  { %3076 = vst.msk [vmem:[#allocation3 + $0x1d0] sm:$0xff] %vm2706_vm5, %v3058_v33  ;;  %v3204_v37 = vld [vmem:[#allocation2 + $0x3f8] sm:$0xff]  ;;  %6467 = vmatprep.subr.bf16.mxu1 %v6466_v25 }
 0x2f8   :  { %2492 = vst.msk [vmem:[#allocation2 + $0x408] sm:$0xff] %vm2362_vm3, %v2266_v32  ;;  %3223 = vrot.lane.b32.xlu0 %v3204_v37, %s6656_s15  ;;  %v1663_v43 = vpop.f32.mrb[4].mxu0  ;;  %v6470_v32 = vpack.c.bf16 %v3813_v30, %v3812_v29  ;;  %6469 = vmatpush3.bf16.msra.mxu1 %v6468_v28  ;;  %v3796_v37 = vld [vmem:[%s9405_s2 + $0x160] sm:$0xff]  ;;  %v3623_v30 = vld [vmem:[#allocation2 + $0x6a8] sm:$0xff] }
 0x2f9   :  { %v2267_v44 = vmax.f32 %v1663_v43, 0.0  ;;  %v6040_v46 = vpop.f32.mrb[5].mxu0  ;;  %v6472_v39 = vpack.c.bf16 %v3797_v38, %v3796_v37  ;;  %v3569_v29 = vld [vmem:[#allocation2 + $0x660] sm:$0xff]  ;;  %v3570_v38 = vld [vmem:[#allocation2 + $0x668] sm:$0xff] }
 0x2fa   :  { %v3096_v45 = vpop.permute.xlu1 %3095  ;;  %6471 = vmatprep.subr.bf16.mxu1 %v6470_v32  ;;  %v3815_v46 = vld [vmem:[%s9405_s2 + $0x1f8] sm:$0xff] }
 0x2fb   :  { %3122 = vst.msk [vmem:[#allocation3 + $0x10] sm:$0xff] %vm2761_vm6, %v3096_v45  ;;  %v3205_v50 = vld [vmem:[#allocation2 + $0x400] sm:$0xff]  ;;  %v3814_v45 = vld [vmem:[%s9405_s2 + $0x1f0] sm:$0xff] }
 0x2fc   :  { %2493 = vst.msk [vmem:[#allocation2 + $0x410] sm:$0xff] %vm2362_vm3, %v2267_v44  ;;  %3225 = vrot.lane.b32.xlu0 %v3205_v50, %s6656_s15  ;;  %v1668_v55 = vpop.f32.mrb[6].mxu0  ;;  %6473 = vmatpush3.bf16.msra.mxu1 %v6472_v39  ;;  %v6474_v49 = vpack.c.bf16 %v3815_v46, %v3814_v45  ;;  %v3798_v50 = vld [vmem:[%s9405_s2 + $0x170] sm:$0xff]  ;;  %v3517_v45 = vld [vmem:[#allocation2 + $0x628] sm:$0xff] }
 0x2fd   :  { %v2268_v56 = vmax.f32 %v1668_v55, 0.0  ;;  %v6043_v58 = vpop.f32.mrb[7].mxu0  ;;  %v6476_v52 = vpack.c.bf16 %v3799_v51, %v3798_v50  ;;  %v3624_v39 = vld [vmem:[#allocation2 + $0x6b0] sm:$0xff] }
 0x2fe   :  { %v3098_v57 = vpop.permute.xlu1 %3097  ;;  %6475 = vmatprep.subr.bf16.mxu1 %v6474_v49  ;;  %v3832_v58 = vld [vmem:[%s9405_s2 + $0x280] sm:$0xff]  ;;  %v3625_v49 = vld [vmem:[#allocation2 + $0x6b8] sm:$0xff] }
 0x2ff   :  { %3123 = vst.msk [vmem:[#allocation3 + $0x48] sm:$0xff] %vm2761_vm6, %v3098_v57  ;;  %v3206_v62 = vld [vmem:[#allocation2 + $0x408] sm:$0xff]  ;;  %v6478_v61 = vpack.c.bf16 %v3833_v59, %v3832_v58 }
 0x300   :  { %2494 = vst.msk [vmem:[#allocation2 + $0x418] sm:$0xff] %vm2362_vm3, %v2268_v56  ;;  %3227 = vrot.lane.b32.xlu0 %v3206_v62, %s6656_s15  ;;  %v1673_v8 = vpop.f32.mrb[8].mxu0  ;;  %6477 = vmatpush3.bf16.msra.mxu1 %v6476_v52 }
 0x301   :  { %v2269_v11 = vmax.f32 %v1673_v8, 0.0  ;;  %v6046_v14 = vpop.f32.mrb[9].mxu0  ;;  %6479 = vmatprep.subr.bf16.mxu1 %v6478_v61 }
 0x302   :  { %v3100_v13 = vpop.permute.xlu1 %3099 }
 0x303   :  { %3124 = vst.msk [vmem:[#allocation3 + $0x80] sm:$0xff] %vm2761_vm6, %v3100_v13  ;;  %v3207_v15 = vld [vmem:[#allocation2 + $0x410] sm:$0xff] }
 0x304   :  { %2495 = vst.msk [vmem:[#allocation2 + $0x420] sm:$0xff] %vm2362_vm3, %v2269_v11  ;;  %3229 = vrot.lane.b32.xlu0 %v3207_v15, %s6656_s15  ;;  %v1678_v17 = vpop.f32.mrb[10].mxu0 }
 0x305   :  { %v2270_v18 = vmax.f32 %v1678_v17, 0.0  ;;  %v6049_v20 = vpop.f32.mrb[11].mxu0  ;;  %v3621_v17 = vld [vmem:[#allocation2 + $0x698] sm:$0xff] }
 0x306   :  { %v3102_v19 = vpop.permute.xlu1 %3101  ;;  %v3514_v20 = vld [vmem:[#allocation2 + $0x610] sm:$0xff] }
 0x307   :  { %3125 = vst.msk [vmem:[#allocation3 + $0xb8] sm:$0xff] %vm2761_vm6, %v3102_v19  ;;  %v3208_v23 = vld [vmem:[#allocation2 + $0x418] sm:$0xff] }
 0x308   :  { %2496 = vst.msk [vmem:[#allocation2 + $0x428] sm:$0xff] %vm2362_vm3, %v2270_v18  ;;  %3231 = vrot.lane.b32.xlu0 %v3208_v23, %s6656_s15  ;;  %v1683_v31 = vpop.f32.mrb[12].mxu0  ;;  %v3622_v23 = vld [vmem:[#allocation2 + $0x6a0] sm:$0xff] }
 0x309   :  { %v2271_v33 = vmax.f32 %v1683_v31, 0.0  ;;  %v6052_v35 = vpop.f32.mrb[13].mxu0 }
 0x30a   :  { %v3104_v34 = vpop.permute.xlu1 %3103  ;;  %v3516_v35 = vld [vmem:[#allocation2 + $0x620] sm:$0xff] }
 0x30b   :  { %3126 = vst.msk [vmem:[#allocation3 + $0xf0] sm:$0xff] %vm2761_vm6, %v3104_v34  ;;  %v3209_v36 = vld [vmem:[#allocation2 + $0x420] sm:$0xff] }
 0x30c   :  { %2497 = vst.msk [vmem:[#allocation2 + $0x430] sm:$0xff] %vm2362_vm3, %v2271_v33  ;;  %3233 = vrot.lane.b32.xlu0 %v3209_v36, %s6656_s15  ;;  %v1688_v40 = vpop.f32.mrb[14].mxu0 }
 0x30d   :  { %v2272_v41 = vmax.f32 %v1688_v40, 0.0  ;;  %v6055_v44 = vpop.f32.mrb[15].mxu0 }
 0x30e   :  { %v3106_v43 = vpop.permute.xlu1 %3105 }
 0x30f   :  { %3127 = vst.msk [vmem:[#allocation3 + $0x128] sm:$0xff] %vm2761_vm6, %v3106_v43  ;;  %v3210_v48 = vld [vmem:[#allocation2 + $0x428] sm:$0xff] }
 0x310   :  { %2498 = vst.msk [vmem:[#allocation2 + $0x438] sm:$0xff] %vm2362_vm3, %v2272_v41  ;;  %3235 = vrot.lane.b32.xlu0 %v3210_v48, %s6656_s15  ;;  %v1693_v53 = vpop.f32.mrb[16].mxu0  ;;  %v3571_v48 = vld [vmem:[#allocation2 + $0x670] sm:$0xff] }
 0x311   :  { %v2273_v54 = vmax.f32 %v1693_v53, 0.0  ;;  %v6058_v56 = vpop.f32.mrb[17].mxu0 }
 0x312   :  { %v3108_v55 = vpop.permute.xlu1 %3107 }
 0x313   :  { %3128 = vst.msk [vmem:[#allocation3 + $0x160] sm:$0xff] %vm2761_vm6, %v3108_v55  ;;  %v3211_v57 = vld [vmem:[#allocation2 + $0x430] sm:$0xff] }
 0x314   :  { %2499 = vst.msk [vmem:[#allocation2 + $0x440] sm:$0xff] %vm2362_vm3, %v2273_v54  ;;  %3237 = vrot.lane.b32.xlu0 %v3211_v57, %s6656_s15  ;;  %v1698_v62 = vpop.f32.mrb[18].mxu0 }
 0x315   :  { %v2274_v63 = vmax.f32 %v1698_v62, 0.0  ;;  %v6061_v2 = vpop.f32.mrb[19].mxu0 }
 0x316   :  { %v3110_v1 = vpop.permute.xlu1 %3109 }
 0x317   :  { %3129 = vst.msk [vmem:[#allocation3 + $0x198] sm:$0xff] %vm2761_vm6, %v3110_v1  ;;  %v3257_v3 = vld [vmem:[#allocation2 + $0x438] sm:$0xff] }
 0x318   :  { %2500 = vst.msk [vmem:[#allocation2 + $0x448] sm:$0xff] %vm2362_vm3, %v2274_v63  ;;  %3275 = vrot.lane.b32.xlu0 %v3257_v3, %s6654_s29  ;;  %v1703_v4 = vpop.f32.mrb[20].mxu0 }
 0x319   :  { %v2275_v5 = vmax.f32 %v1703_v4, 0.0  ;;  %v6064_v8 = vpop.f32.mrb[21].mxu0 }
 0x31a   :  { %v3112_v7 = vpop.permute.xlu1 %3111 }
 0x31b   :  { %3130 = vst.msk [vmem:[#allocation3 + $0x1d0] sm:$0xff] %vm2761_vm6, %v3112_v7  ;;  %v3258_v9 = vld [vmem:[#allocation2 + $0x440] sm:$0xff] }
 0x31c   :  { %2501 = vst.msk [vmem:[#allocation2 + $0x450] sm:$0xff] %vm2362_vm3, %v2275_v5  ;;  %3277 = vrot.lane.b32.xlu0 %v3258_v9, %s6654_s29 }
 0x31e   :  { %v3410_v10 = vpop.permute.xlu1 %3409 }
 0x31f   :  { %3432 = vst.msk [vmem:[#allocation3 + $0x100] sm:$0xff] %vm2706_vm5, %v3410_v10  ;;  %v3259_v11 = vld [vmem:[#allocation2 + $0x448] sm:$0xff] }
 0x320   :  { %3279 = vrot.lane.b32.xlu0 %v3259_v11, %s6654_s29 }
 0x322   :  { %v3464_v13 = vpop.permute.xlu1 %3463 }
 0x323   :  { %3486 = vst.msk [vmem:[#allocation3 + $0x100] sm:$0xff] %vm2761_vm6, %v3464_v13  ;;  %v3260_v14 = vld [vmem:[#allocation2 + $0x450] sm:$0xff] }
 0x324   :  { %3281 = vrot.lane.b32.xlu0 %v3260_v14, %s6654_s29 }
 0x326   :  { %v3358_v15 = vpop.permute.xlu1 %3357 }
 0x327   :  { %3379 = vst.msk [vmem:[#allocation3 + $0x138] sm:$0xff] %vm2651_vm4, %v3358_v15 }
 0x328   :  { %3589 = vrot.lane.b32.xlu0 %v3567_v16, %s6656_s15 }
 0x32a   :  { %v3412_v18 = vpop.permute.xlu1 %3411 }
 0x32b   :  { %3433 = vst.msk [vmem:[#allocation3 + $0x138] sm:$0xff] %vm2706_vm5, %v3412_v18 }
 0x32c   :  { %3643 = vrot.lane.b32.xlu0 %v3621_v17, %s6654_s29 }
 0x32e   :  { %v3466_v19 = vpop.permute.xlu1 %3465 }
 0x32f   :  { %3487 = vst.msk [vmem:[#allocation3 + $0x138] sm:$0xff] %vm2761_vm6, %v3466_v19 }
 0x330   :  { %3537 = vrot.lane.b32.xlu0 %v3514_v20, %s6655_s21 }
 0x332   :  { %v3360_v21 = vpop.permute.xlu1 %3359 }
 0x333   :  { %3380 = vst.msk [vmem:[#allocation3 + $0x170] sm:$0xff] %vm2651_vm4, %v3360_v21 }
 0x334   :  { %3591 = vrot.lane.b32.xlu0 %v3568_v22, %s6656_s15 }
 0x336   :  { %v3414_v25 = vpop.permute.xlu1 %3413 }
 0x337   :  { %3434 = vst.msk [vmem:[#allocation3 + $0x170] sm:$0xff] %vm2706_vm5, %v3414_v25 }
 0x338   :  { %3645 = vrot.lane.b32.xlu0 %v3622_v23, %s6654_s29 }
 0x33a   :  { %v3468_v26 = vpop.permute.xlu1 %3467 }
 0x33b   :  { %3488 = vst.msk [vmem:[#allocation3 + $0x170] sm:$0xff] %vm2761_vm6, %v3468_v26  ;;  %v3817_v26 = vld [vmem:[%s9405_s2 + $0x208] sm:$0xff] }
 0x33c   :  { %3539 = vrot.lane.b32.xlu0 %v3515_v27, %s6655_s21  ;;  %v3835_v27 = vld [vmem:[%s9405_s2 + $0x298] sm:$0xff] }
 0x33e   :  { %v3362_v28 = vpop.permute.xlu1 %3361 }
 0x33f   :  { %3381 = vst.msk [vmem:[#allocation3 + $0x1a8] sm:$0xff] %vm2651_vm4, %v3362_v28 }
 0x340   :  { %3593 = vrot.lane.b32.xlu0 %v3569_v29, %s6656_s15 }
 0x342   :  { %v3416_v31 = vpop.permute.xlu1 %3415  ;;  %v3168_v32 = vpop.permute.xlu0 %3167 }
 0x343   :  { %3435 = vst.msk [vmem:[#allocation3 + $0x1a8] sm:$0xff] %vm2706_vm5, %v3416_v31 }
 0x344   :  { %3194 = vst.msk [vmem:[#allocation3 + $0x18] sm:$0xff] %vm2651_vm4, %v3168_v32  ;;  %3647 = vrot.lane.b32.xlu0 %v3623_v30, %s6654_s29  ;;  %v3818_v32 = vld [vmem:[%s9405_s2 + $0x210] sm:$0xff] }
 0x346   :  { %v3470_v33 = vpop.permute.xlu1 %3469  ;;  %v3170_v34 = vpop.permute.xlu0 %3169 }
 0x347   :  { %3489 = vst.msk [vmem:[#allocation3 + $0x1a8] sm:$0xff] %vm2761_vm6, %v3470_v33  ;;  %v3819_v33 = vld [vmem:[%s9405_s2 + $0x218] sm:$0xff] }
 0x348   :  { %3195 = vst.msk [vmem:[#allocation3 + $0x50] sm:$0xff] %vm2651_vm4, %v3170_v34  ;;  %3541 = vrot.lane.b32.xlu0 %v3516_v35, %s6655_s21  ;;  %v3691_v35 = vld [vmem:[#allocation3 + $0x10] sm:$0xff] }
 0x34a   :  { %v3364_v36 = vpop.permute.xlu1 %3363  ;;  %v3172_v37 = vpop.permute.xlu0 %3171 }
 0x34b   :  { %3382 = vst.msk [vmem:[#allocation3 + $0x1e0] sm:$0xff] %vm2651_vm4, %v3364_v36  ;;  %3196 = vst.msk [vmem:[#allocation3 + $0x88] sm:$0xff] %vm2651_vm4, %v3172_v37  ;;  %v3836_v36 = vld [vmem:[%s9405_s2 + $0x2a0] sm:$0xff]  ;;  %v3837_v37 = vld [vmem:[%s9405_s2 + $0x2a8] sm:$0xff] }
 0x34c   :  { %3595 = vrot.lane.b32.xlu0 %v3570_v38, %s6656_s15 }
 0x34e   :  { %v3418_v40 = vpop.permute.xlu1 %3417  ;;  %v3174_v41 = vpop.permute.xlu0 %3173 }
 0x34f   :  { %3436 = vst.msk [vmem:[#allocation3 + $0x1e0] sm:$0xff] %vm2706_vm5, %v3418_v40  ;;  %v6484_v40 = vpack.c.bf16 %v3819_v33, %v3818_v32 }
 0x350   :  { %3197 = vst.msk [vmem:[#allocation3 + $0xc0] sm:$0xff] %vm2651_vm4, %v3174_v41  ;;  %3649 = vrot.lane.b32.xlu0 %v3624_v39, %s6654_s29 }
 0x352   :  { %v3472_v43 = vpop.permute.xlu1 %3471  ;;  %v3176_v44 = vpop.permute.xlu0 %3175 }
 0x353   :  { %3490 = vst.msk [vmem:[#allocation3 + $0x1e0] sm:$0xff] %vm2761_vm6, %v3472_v43 }
 0x354   :  { %3198 = vst.msk [vmem:[#allocation3 + $0xf8] sm:$0xff] %vm2651_vm4, %v3176_v44  ;;  %3543 = vrot.lane.b32.xlu0 %v3517_v45, %s6655_s21  ;;  %v6486_v44 = vpack.c.bf16 %v3837_v37, %v3836_v36  ;;  %v3820_v45 = vld [vmem:[%s9405_s2 + $0x220] sm:$0xff]  ;;  %v3831_v36 = vld [vmem:[%s9405_s2 + $0x278] sm:$0xff]  ;;  %v3733_v37 = vld [vmem:[#allocation3 + $0x160] sm:$0xff] }
 0x356   :  { %v3178_v46 = vpop.permute.xlu0 %3177 }
 0x357   :  { %3199 = vst.msk [vmem:[#allocation3 + $0x130] sm:$0xff] %vm2651_vm4, %v3178_v46  ;;  %v3821_v46 = vld [vmem:[%s9405_s2 + $0x228] sm:$0xff] }
 0x358   :  { %3597 = vrot.lane.b32.xlu0 %v3571_v48, %s6656_s15  ;;  %v3698_v48 = vld [vmem:[#allocation3 + $0x48] sm:$0xff] }
 0x35a   :  { %v3180_v50 = vpop.permute.xlu0 %3179 }
 0x35b   :  { %3200 = vst.msk [vmem:[#allocation3 + $0x168] sm:$0xff] %vm2651_vm4, %v3180_v50  ;;  %v3839_v50 = vld [vmem:[%s9405_s2 + $0x2b8] sm:$0xff] }
 0x35c   :  { %3651 = vrot.lane.b32.xlu0 %v3625_v49, %s6654_s29  ;;  %v3838_v49 = vld [vmem:[%s9405_s2 + $0x2b0] sm:$0xff] }
 0x35e   :  { %v3182_v51 = vpop.permute.xlu0 %3181 }
 0x35f   :  { %3201 = vst.msk [vmem:[#allocation3 + $0x1a0] sm:$0xff] %vm2651_vm4, %v3182_v51  ;;  %v6488_v51 = vpack.c.bf16 %v3821_v46, %v3820_v45  ;;  %v3848_v46 = vld [vmem:[%s9405_s2 + $0x300] sm:$0xff] }
 0x362   :  { %v3184_v52 = vpop.permute.xlu0 %3183 }
 0x363   :  { %3202 = vst.msk [vmem:[#allocation3 + $0x1d8] sm:$0xff] %vm2651_vm4, %v3184_v52 }
 0x366   :  { %v3222_v53 = vpop.permute.xlu0 %3221  ;;  %v5376_v54 = vpop.f32.mrb[172].mxu1 }
 0x367   :  { %3248 = vst.msk [vmem:[#allocation3 + $0x18] sm:$0xff] %vm2706_vm5, %v3222_v53  ;;  %v5377_v55 = vpop.f32.mrb[173].mxu1 }
 0x368   :  { %v8901_v56 = vadd.f32 %v5377_v55, %v5376_v54  ;;  %v6490_v54 = vpack.c.bf16 %v3839_v50, %v3838_v49  ;;  %v3822_v55 = vld [vmem:[%s9405_s2 + $0x230] sm:$0xff]  ;;  %v3747_v49 = vld [vmem:[#allocation3 + $0x1d0] sm:$0xff] }
 0x369   :  { %v3694_v50 = vld [vmem:[#allocation3 + $0x28] sm:$0xff] }
 0x36a   :  { %v3224_v57 = vpop.permute.xlu0 %3223  ;;  %v5379_v58 = vpop.f32.mrb[174].mxu1 }
 0x36b   :  { %3249 = vst.msk [vmem:[#allocation3 + $0x50] sm:$0xff] %vm2706_vm5, %v3224_v57  ;;  %v5380_v59 = vpop.f32.mrb[175].mxu1  ;;  %v3823_v57 = vld [vmem:[%s9405_s2 + $0x238] sm:$0xff] }
 0x36c   :  { %v8904_v61 = vadd.f32 %v5380_v59, %v5379_v58  ;;  %v3705_v58 = vld [vmem:[#allocation3 + $0x80] sm:$0xff]  ;;  %v3840_v59 = vld [vmem:[%s9405_s2 + $0x2c0] sm:$0xff] }
 0x36e   :  { %v3226_v62 = vpop.permute.xlu0 %3225  ;;  %v5382_v63 = vpop.f32.mrb[176].mxu1 }
 0x36f   :  { %3250 = vst.msk [vmem:[#allocation3 + $0x88] sm:$0xff] %vm2706_vm5, %v3226_v62  ;;  %v5383_v1 = vpop.f32.mrb[177].mxu1  ;;  %v3841_v62 = vld [vmem:[%s9405_s2 + $0x2c8] sm:$0xff] }
 0x370   :  { %v8907_v2 = vadd.f32 %v5383_v1, %v5382_v63  ;;  %v6492_v63 = vpack.c.bf16 %v3823_v57, %v3822_v55  ;;  %v3693_v55 = vld [vmem:[#allocation3 + $0x20] sm:$0xff] }
 0x371   :  { %v3701_v57 = vld [vmem:[#allocation3 + $0x60] sm:$0xff] }
 0x372   :  { %v3228_v3 = vpop.permute.xlu0 %3227  ;;  %v5385_v4 = vpop.f32.mrb[178].mxu1 }
 0x373   :  { %3251 = vst.msk [vmem:[#allocation3 + $0xc0] sm:$0xff] %vm2706_vm5, %v3228_v3  ;;  %v5386_v5 = vpop.f32.mrb[179].mxu1 }
 0x374   :  { %v8910_v7 = vadd.f32 %v5386_v5, %v5385_v4  ;;  %v6494_v4 = vpack.c.bf16 %v3841_v62, %v3840_v59  ;;  %v3824_v5 = vld [vmem:[%s9405_s2 + $0x240] sm:$0xff] }
 0x375   :  { %v3700_v62 = vld [vmem:[#allocation3 + $0x58] sm:$0xff] }
 0x376   :  { %v3230_v8 = vpop.permute.xlu0 %3229  ;;  %v5388_v9 = vpop.f32.mrb[180].mxu1 }
 0x377   :  { %3252 = vst.msk [vmem:[#allocation3 + $0xf8] sm:$0xff] %vm2706_vm5, %v3230_v8  ;;  %v5389_v10 = vpop.f32.mrb[181].mxu1  ;;  %v3825_v8 = vld [vmem:[%s9405_s2 + $0x248] sm:$0xff] }
 0x378   :  { %3306 = vst.msk [vmem:[#allocation3 + $0xf8] sm:$0xff] %vm2761_vm6, %v7820_v47  ;;  %v8915_v11 = vadd.f32 %v5389_v10, %v5388_v9  ;;  %v3712_v9 = vld [vmem:[#allocation3 + $0xb8] sm:$0xff]  ;;  %v3842_v10 = vld [vmem:[%s9405_s2 + $0x2d0] sm:$0xff] }
 0x37a   :  { %v3232_v13 = vpop.permute.xlu0 %3231  ;;  %v5391_v14 = vpop.f32.mrb[182].mxu1 }
 0x37b   :  { %3253 = vst.msk [vmem:[#allocation3 + $0x130] sm:$0xff] %vm2706_vm5, %v3232_v13  ;;  %v5392_v15 = vpop.f32.mrb[183].mxu1  ;;  %v3843_v13 = vld [vmem:[%s9405_s2 + $0x2d8] sm:$0xff] }
 0x37c   :  { %3307 = vst.msk [vmem:[#allocation3 + $0x130] sm:$0xff] %vm2761_vm6, %v7838_v60  ;;  %v8920_v16 = vadd.f32 %v5392_v15, %v5391_v14  ;;  %v6496_v15 = vpack.c.bf16 %v3825_v8, %v3824_v5  ;;  %v3714_v8 = vld [vmem:[#allocation3 + $0xc8] sm:$0xff] }
 0x37e   :  { %v3234_v17 = vpop.permute.xlu0 %3233 }
 0x37f   :  { %3254 = vst.msk [vmem:[#allocation3 + $0x168] sm:$0xff] %vm2706_vm5, %v3234_v17  ;;  %v3720_v14 = vld [vmem:[#allocation3 + $0xf8] sm:$0xff] }
 0x380   :  { %3308 = vst.msk [vmem:[#allocation3 + $0x168] sm:$0xff] %vm2761_vm6, %v7851_v12 }
 0x382   :  { %v3236_v47 = vpop.permute.xlu0 %3235  ;;  %v5394_v18 = vpop.f32.mrb[184].mxu1 }
 0x383   :  { %3255 = vst.msk [vmem:[#allocation3 + $0x1a0] sm:$0xff] %vm2706_vm5, %v3236_v47  ;;  %v5395_v19 = vpop.f32.mrb[185].mxu1  ;;  %v6498_v47 = vpack.c.bf16 %v3843_v13, %v3842_v10  ;;  %v3721_v13 = vld [vmem:[#allocation3 + $0x100] sm:$0xff] }
 0x384   :  { %3309 = vst.msk [vmem:[#allocation3 + $0x1a0] sm:$0xff] %vm2761_vm6, %v7869_v24  ;;  %v8928_v20 = vadd.f32 %v5395_v19, %v5394_v18  ;;  %v3816_v24 = vld [vmem:[%s9405_s2 + $0x200] sm:$0xff]  ;;  %v3826_v18 = vld [vmem:[%s9405_s2 + $0x250] sm:$0xff]  ;;  %v3827_v19 = vld [vmem:[%s9405_s2 + $0x258] sm:$0xff] }
 0x385   :  { %v6480_v28 = vpack.c.bf16 %v3817_v26, %v3816_v24 }
 0x386   :  { %v3238_v60 = vpop.permute.xlu0 %3237 }
 0x387   :  { %3256 = vst.msk [vmem:[#allocation3 + $0x1d8] sm:$0xff] %vm2706_vm5, %v3238_v60  ;;  %v3719_v60 = vld [vmem:[#allocation3 + $0xf0] sm:$0xff] }
 0x388   :  { %3310 = vst.msk [vmem:[#allocation3 + $0x1d8] sm:$0xff] %vm2761_vm6, %v7889_v42  ;;  %v3834_v42 = vld [vmem:[%s9405_s2 + $0x290] sm:$0xff] }
 0x389   :  { %v6482_v31 = vpack.c.bf16 %v3835_v27, %v3834_v42  ;;  %v3828_v42 = vld [vmem:[%s9405_s2 + $0x260] sm:$0xff]  ;;  %v3829_v27 = vld [vmem:[%s9405_s2 + $0x268] sm:$0xff] }
 0x38a   :  { %v3276_v21 = vpop.permute.xlu0 %3275  ;;  %v5397_v12 = vpop.f32.mrb[186].mxu1  ;;  %v6504_v32 = vpack.c.bf16 %v3829_v27, %v3828_v42  ;;  %v3716_v42 = vld [vmem:[#allocation3 + $0xd8] sm:$0xff]  ;;  %v3723_v27 = vld [vmem:[#allocation3 + $0x110] sm:$0xff] }
 0x38b   :  { %3302 = vst.msk [vmem:[#allocation3 + $0x18] sm:$0xff] %vm2761_vm6, %v3276_v21  ;;  %v5398_v22 = vpop.f32.mrb[187].mxu1  ;;  %v3844_v21 = vld [vmem:[%s9405_s2 + $0x2e0] sm:$0xff] }
 0x38c   :  { %v8934_v23 = vadd.f32 %v5398_v22, %v5397_v12  ;;  %v3845_v12 = vld [vmem:[%s9405_s2 + $0x2e8] sm:$0xff]  ;;  %v3727_v22 = vld [vmem:[#allocation3 + $0x130] sm:$0xff] }
 0x38d   :  { %v6502_v26 = vpack.c.bf16 %v3845_v12, %v3844_v21  ;;  %v3742_v21 = vld [vmem:[#allocation3 + $0x1a8] sm:$0xff] }
 0x38e   :  { %v3278_v25 = vpop.permute.xlu0 %3277 }
 0x38f   :  { %3303 = vst.msk [vmem:[#allocation3 + $0x50] sm:$0xff] %vm2761_vm6, %v3278_v25  ;;  %v6500_v25 = vpack.c.bf16 %v3827_v19, %v3826_v18  ;;  %v3735_v19 = vld [vmem:[#allocation3 + $0x170] sm:$0xff] }
 0x392   :  { %v3280_v29 = vpop.permute.xlu0 %3279  ;;  %v3692_v30 = vld [vmem:[#allocation3 + $0x18] sm:$0xff]  ;;  %v5400_v34 = vpop.f32.mrb[188].mxu1 }
 0x393   :  { %3304 = vst.msk [vmem:[#allocation3 + $0x88] sm:$0xff] %vm2761_vm6, %v3280_v29  ;;  %4060 = vmatprep.mubr.f32.mxu1 %v3692_v30  ;;  %v5401_v38 = vpop.f32.mrb[189].mxu1  ;;  %v3846_v29 = vld [vmem:[%s9405_s2 + $0x2f0] sm:$0xff]  ;;  %v3847_v30 = vld [vmem:[%s9405_s2 + $0x2f8] sm:$0xff] }
 0x394   :  { %4061 = vmatmul.mubr.f32.vlgmr.msra.gmra.mrb[190].mxu1 %v3691_v35  ;;  %v8962_v39 = vadd.f32 %v5401_v38, %v5400_v34  ;;  %v6506_v34 = vpack.c.bf16 %v3847_v30, %v3846_v29  ;;  %v3830_v35 = vld [vmem:[%s9405_s2 + $0x270] sm:$0xff]  ;;  %v3741_v38 = vld [vmem:[#allocation3 + $0x1a0] sm:$0xff]  ;;  %v3744_v30 = vld [vmem:[#allocation3 + $0x1b8] sm:$0xff] }
 0x395   :  { %6481 = vmatpush3.bf16.msra.mxu1 %v6480_v28  ;;  %v3726_v28 = vld [vmem:[#allocation3 + $0x128] sm:$0xff]  ;;  %v3737_v29 = vld [vmem:[#allocation3 + $0x180] sm:$0xff] }
 0x396   :  { %v3282_v41 = vpop.permute.xlu0 %3281  ;;  %v3699_v43 = vld [vmem:[#allocation3 + $0x50] sm:$0xff]  ;;  %6483 = vmatprep.subr.bf16.mxu1 %v6482_v31  ;;  %v3734_v31 = vld [vmem:[#allocation3 + $0x168] sm:$0xff] }
 0x397   :  { %3305 = vst.msk [vmem:[#allocation3 + $0xc0] sm:$0xff] %vm2761_vm6, %v3282_v41  ;;  %4065 = vmatprep.mubr.f32.mxu1 %v3699_v43  ;;  %v3740_v43 = vld [vmem:[#allocation3 + $0x198] sm:$0xff] }
 0x398   :  { %4066 = vmatmul.mubr.f32.gmra.mrb[192].mxu1 %v3698_v48  ;;  %v3849_v48 = vld [vmem:[%s9405_s2 + $0x308] sm:$0xff] }
 0x399   :  { %6485 = vmatpush3.bf16.msra.mxu1 %v6484_v40  ;;  %v6508_v40 = vpack.c.bf16 %v3831_v36, %v3830_v35  ;;  %v4368_v36 = vld [vmem:[%s9406_s4 + $0x8] sm:$0xff] }
 0x39a   :  { %v3590_v52 = vpop.permute.xlu0 %3589  ;;  %v3706_v53 = vld [vmem:[#allocation3 + $0x88] sm:$0xff]  ;;  %6487 = vmatprep.subr.bf16.mxu1 %v6486_v44  ;;  %v3748_v44 = vld [vmem:[#allocation3 + $0x1d8] sm:$0xff] }
 0x39b   :  { %3612 = vst.msk [vmem:[#allocation3 + $0x108] sm:$0xff] %vm2706_vm5, %v3590_v52  ;;  %4070 = vmatprep.mubr.f32.mxu1 %v3706_v53  ;;  %v3850_v53 = vld [vmem:[%s9405_s2 + $0x310] sm:$0xff] }
 0x39c   :  { %4071 = vmatmul.mubr.f32.gmra.mrb[194].mxu1 %v3705_v58 }
 0x39d   :  { %6489 = vmatpush3.bf16.msra.mxu1 %v6488_v51  ;;  %v6511_v51 = vpack.c.bf16 %v3849_v48, %v3848_v46  ;;  %v4388_v46 = vld [vmem:[%s9406_s4 + $0xa8] sm:$0xff] }
 0x39e   :  { %v3644_v1 = vpop.permute.xlu0 %3643  ;;  %v3713_v3 = vld [vmem:[#allocation3 + $0xc0] sm:$0xff]  ;;  %6491 = vmatprep.subr.bf16.mxu1 %v6490_v54  ;;  %v3851_v54 = vld [vmem:[%s9405_s2 + $0x318] sm:$0xff]  ;;  %s6657_s2 = smov 112  }
 0x39f   :  { %3666 = vst.msk [vmem:[#allocation3 + $0x108] sm:$0xff] %vm2761_vm6, %v3644_v1  ;;  %4075 = vmatprep.mubr.f32.mxu1 %v3713_v3  ;;  %v6514_v58 = vpack.c.bf16 %v3851_v54, %v3850_v53  ;;  %v3707_v3 = vld [vmem:[#allocation3 + $0x90] sm:$0xff] }
 0x3a0   :  { %4076 = vmatmul.mubr.f32.gmra.mrb[196].mxu1 %v3712_v9  ;;  %v4390_v53 = vld [vmem:[%s9406_s4 + $0xb8] sm:$0xff] }
 0x3a1   :  { %4080 = vmatprep.mubr.f32.mxu1 %v3720_v14  ;;  %6493 = vmatpush3.bf16.msra.mxu1 %v6492_v63  ;;  %v3708_v63 = vld [vmem:[#allocation3 + $0x98] sm:$0xff] }
 0x3a2   :  { %v3538_v17 = vpop.permute.xlu0 %3537  ;;  %6495 = vmatprep.subr.bf16.mxu1 %v6494_v4  ;;  %v3715_v4 = vld [vmem:[#allocation3 + $0xd0] sm:$0xff] }
 0x3a3   :  { %3559 = vst.msk [vmem:[#allocation3 + $0x140] sm:$0xff] %vm2651_vm4, %v3538_v17  ;;  %v3728_v17 = vld [vmem:[#allocation3 + $0x138] sm:$0xff] }
 0x3a4   :  { %4081 = vmatmul.mubr.f32.gmra.mrb[198].mxu1 %v3719_v60 }
 0x3a5   :  { %4085 = vmatprep.mubr.f32.mxu1 %v3727_v22  ;;  %6497 = vmatpush3.bf16.msra.mxu1 %v6496_v15  ;;  %v3749_v22 = vld [vmem:[#allocation3 + $0x1e0] sm:$0xff] }
 0x3a6   :  { %v3592_v24 = vpop.permute.xlu0 %3591  ;;  %6499 = vmatprep.subr.bf16.mxu1 %v6498_v47  ;;  %v3722_v9 = vld [vmem:[#allocation3 + $0x108] sm:$0xff] }
 0x3a7   :  { %3613 = vst.msk [vmem:[#allocation3 + $0x140] sm:$0xff] %vm2706_vm5, %v3592_v24  ;;  %v3702_v24 = vld [vmem:[#allocation3 + $0x68] sm:$0xff] }
 0x3a8   :  { %4086 = vmatmul.mubr.f32.gmra.mrb[200].mxu1 %v3726_v28  ;;  %v3730_v28 = vld [vmem:[#allocation3 + $0x148] sm:$0xff] }
 0x3a9   :  { %4090 = vmatprep.mubr.f32.mxu1 %v3734_v31  ;;  %6501 = vmatpush3.bf16.msra.mxu1 %v6500_v25  ;;  %v3695_v25 = vld [vmem:[#allocation3 + $0x30] sm:$0xff] }
 0x3aa   :  { %v3646_v33 = vpop.permute.xlu0 %3645  ;;  %6503 = vmatprep.subr.bf16.mxu1 %v6502_v26  ;;  %v3709_v26 = vld [vmem:[#allocation3 + $0xa0] sm:$0xff]  ;;  %v3751_v31 = vld [vmem:[#allocation3 + $0x1f0] sm:$0xff] }
 0x3ab   :  { %3667 = vst.msk [vmem:[#allocation3 + $0x140] sm:$0xff] %vm2761_vm6, %v3646_v33  ;;  %v4384_v33 = vld [vmem:[%s9406_s4 + $0x88] sm:$0xff] }
 0x3ac   :  { %4091 = vmatmul.mubr.f32.gmra.mrb[202].mxu1 %v3733_v37  ;;  %v4385_v37 = vld [vmem:[%s9406_s4 + $0x90] sm:$0xff] }
 0x3ad   :  { %4095 = vmatprep.mubr.f32.mxu1 %v3741_v38  ;;  %6505 = vmatpush3.bf16.msra.mxu1 %v6504_v32  ;;  %v4383_v32 = vld [vmem:[%s9406_s4 + $0x80] sm:$0xff]  ;;  %v4386_v38 = vld [vmem:[%s9406_s4 + $0x98] sm:$0xff] }
 0x3ae   :  { %v3540_v41 = vpop.permute.xlu0 %3539  ;;  %6507 = vmatprep.subr.bf16.mxu1 %v6506_v34  ;;  %v4367_v34 = vld [vmem:[%s9406_s4] sm:$0xff]  ;;  %v6516_v35 = vpack.c.bf16 %v4384_v33, %v4383_v32 }
 0x3af   :  { %3560 = vst.msk [vmem:[#allocation3 + $0x178] sm:$0xff] %vm2651_vm4, %v3540_v41  ;;  %v6520_v41 = vpack.c.bf16 %v4386_v38, %v4385_v37 }
 0x3b0   :  { %4096 = vmatmul.mubr.f32.gmra.mrb[204].mxu1 %v3740_v43  ;;  %v4369_v43 = vld [vmem:[%s9406_s4 + $0x10] sm:$0xff] }
 0x3b1   :  { %4100 = vmatprep.mubr.f32.mxu1 %v3748_v44  ;;  %6509 = vmatpush3.bf16.msra.mxu1 %v6508_v40  ;;  %v6518_v40 = vpack.c.bf16 %v4368_v36, %v4367_v34  ;;  %v4370_v44 = vld [vmem:[%s9406_s4 + $0x18] sm:$0xff] }
 0x3b2   :  { %v3594_v45 = vpop.permute.xlu0 %3593  ;;  %6510 = vmatprep.subr.bf16.mxu1 %v6651_v0  ;;  %v3729_v14 = vld [vmem:[#allocation3 + $0x140] sm:$0xff]  ;;  %v6522_v48 = vpack.c.bf16 %v4370_v44, %v4369_v43 }
 0x3b3   :  { %3614 = vst.msk [vmem:[#allocation3 + $0x178] sm:$0xff] %vm2706_vm5, %v3594_v45  ;;  %v4387_v45 = vld [vmem:[%s9406_s4 + $0xa0] sm:$0xff] }
 0x3b4   :  { %4101 = vmatmul.mubr.f32.gmra.mrb[206].mxu1 %v3747_v49  ;;  %v6524_v49 = vpack.c.bf16 %v4388_v46, %v4387_v45 }
 0x3b5   :  { %4170 = vmatprep.mubr.f32.mxu1 %v3694_v50  ;;  %v4371_v50 = vld [vmem:[%s9406_s4 + $0x20] sm:$0xff] }
 0x3b6   :  { %v3648_v52 = vpop.permute.xlu0 %3647 }
 0x3b7   :  { %3668 = vst.msk [vmem:[#allocation3 + $0x178] sm:$0xff] %vm2761_vm6, %v3648_v52  ;;  %v4389_v52 = vld [vmem:[%s9406_s4 + $0xb0] sm:$0xff] }
 0x3b8   :  { %4171 = vmatmul.mubr.f32.vlgmr.msra.gmra.mrb[208].mxu1 %v3693_v55  ;;  %v6528_v55 = vpack.c.bf16 %v4390_v53, %v4389_v52 }
 0x3b9   :  { %6512 = vmatpush3.bf16.msra.mxu1 %v6511_v51  ;;  %4175 = vmatprep.mubr.f32.mxu1 %v3701_v57  ;;  %v4372_v51 = vld [vmem:[%s9406_s4 + $0x28] sm:$0xff]  ;;  %v4373_v57 = vld [vmem:[%s9406_s4 + $0x30] sm:$0xff] }
 0x3ba   :  { %v3542_v59 = vpop.permute.xlu0 %3541  ;;  %6513 = vmatprep.subr.bf16.mxu1 %v6651_v0  ;;  %v6526_v54 = vpack.c.bf16 %v4372_v51, %v4371_v50 }
 0x3bb   :  { %3561 = vst.msk [vmem:[#allocation3 + $0x1b0] sm:$0xff] %vm2651_vm4, %v3542_v59  ;;  %v4391_v59 = vld [vmem:[%s9406_s4 + $0xc0] sm:$0xff] }
 0x3bc   :  { %4176 = vmatmul.mubr.f32.gmra.mrb[210].mxu1 %v3700_v62  ;;  %v4392_v62 = vld [vmem:[%s9406_s4 + $0xc8] sm:$0xff] }
 0x3bd   :  { %4180 = vmatprep.mubr.f32.mxu1 %v3708_v63  ;;  %6515 = vmatpush3.bf16.msra.mxu1 %v6514_v58  ;;  %v4374_v58 = vld [vmem:[%s9406_s4 + $0x38] sm:$0xff] }
 0x3be   :  { %v3596_v1 = vpop.permute.xlu0 %3595  ;;  %v3736_v47 = vld [vmem:[#allocation3 + $0x178] sm:$0xff]  ;;  %6517 = vmatprep.subr.bf16.mxu1 %v6516_v35  ;;  %v6530_v63 = vpack.c.bf16 %v4374_v58, %v4373_v57 }
 0x3bf   :  { %3615 = vst.msk [vmem:[#allocation3 + $0x1b0] sm:$0xff] %vm2706_vm5, %v3596_v1  ;;  %v6532_v1 = vpack.c.bf16 %v4392_v62, %v4391_v59 }
 0x3c0   :  { %4181 = vmatmul.mubr.f32.gmra.mrb[212].mxu1 %v3707_v3  ;;  %v4375_v3 = vld [vmem:[%s9406_s4 + $0x40] sm:$0xff] }
 0x3c1   :  { %4185 = vmatprep.mubr.f32.mxu1 %v3715_v4  ;;  %v4376_v4 = vld [vmem:[%s9406_s4 + $0x48] sm:$0xff] }
 0x3c2   :  { %v3650_v5 = vpop.permute.xlu0 %3649 }
 0x3c3   :  { %3669 = vst.msk [vmem:[#allocation3 + $0x1b0] sm:$0xff] %vm2761_vm6, %v3650_v5  ;;  %v6534_v5 = vpack.c.bf16 %v4376_v4, %v4375_v3 }
 0x3c4   :  { %4186 = vmatmul.mubr.f32.gmra.mrb[214].mxu1 %v3714_v8  ;;  %v5092_v8 = vld [vmem:[%s9407_s3] ss:$0 sm:$0xff] }
 0x3c5   :  { %4190 = vmatprep.mubr.f32.mxu1 %v3722_v9  ;;  %v3978_v35 = vadd.f32 %v8920_v16, %v5092_v8  ;;  %v3988_v45 = vadd.f32 %v8934_v23, %v5092_v8  ;;  %v3993_v50 = vadd.f32 %v8962_v39, %v5092_v8 }
 0x3c6   :  { %v3544_v10 = vpop.permute.xlu0 %3543 }
 0x3c7   :  { %3562 = vst.msk [vmem:[#allocation3 + $0x1e8] sm:$0xff] %vm2651_vm4, %v3544_v10 }
 0x3c8   :  { %4191 = vmatmul.mubr.f32.gmra.mrb[216].mxu1 %v3721_v13  ;;  %v3953_v13 = vadd.f32 %v8901_v56, %v5092_v8 }
 0x3c9   :  { %4195 = vmatprep.mubr.f32.mxu1 %v3729_v14 }
 0x3ca   :  { %v3598_v15 = vpop.permute.xlu0 %3597  ;;  %v3743_v60 = vld [vmem:[#allocation3 + $0x1b0] sm:$0xff] }
 0x3cb   :  { %3616 = vst.msk [vmem:[#allocation3 + $0x1e8] sm:$0xff] %vm2706_vm5, %v3598_v15 }
 0x3cc   :  { %4196 = vmatmul.mubr.f32.gmra.mrb[218].mxu1 %v3728_v17 }
 0x3cd   :  { %4200 = vmatprep.mubr.f32.mxu1 %v3736_v47 }
 0x3ce   :  { %v3652_v18 = vpop.permute.xlu0 %3651 }
 0x3cf   :  { %3670 = vst.msk [vmem:[#allocation3 + $0x1e8] sm:$0xff] %vm2761_vm6, %v3652_v18  ;;  %v3958_v18 = vadd.f32 %v8904_v61, %v5092_v8 }
 0x3d0   :  { %4201 = vmatmul.mubr.f32.gmra.mrb[220].mxu1 %v3735_v19 }
 0x3d1   :  { %4205 = vmatprep.mubr.f32.mxu1 %v3743_v60 }
 0x3d4   :  { %4206 = vmatmul.mubr.f32.gmra.mrb[222].mxu1 %v3742_v21 }
 0x3d6   :  { %v3750_v12 = vld [vmem:[#allocation3 + $0x1e8] sm:$0xff] }
 0x3d7   :  { %4210 = vmatprep.mubr.f32.mxu1 %v3750_v12 }
 0x3d8   :  { %4211 = vmatmul.mubr.f32.gmra.mrb[224].mxu1 %v3749_v22  ;;  %v3963_v22 = vadd.f32 %v8907_v2, %v5092_v8 }
 0x3d9   :  { %6331 = vmatprep.mubr.msk.f32.mxu1 %vm6652_vm0, %v6653_v6 }
 0x3dc   :  { %6332 = vmatmul.mubr.msk.f32.vlgmr.msra.gmra.mrb[226].mxu1 %vm2362_vm3, %v3695_v25 }
 0x3dd   :  { %6334 = vmatprep.mubr.msk.f32.mxu1 %vm6652_vm0, %v6653_v6  ;;  %6519 = vmatpush3.bf16.msra.mxu1 %v6518_v40  ;;  %v3983_v40 = vadd.f32 %v8928_v20, %v5092_v8 }
 0x3de   :  { %6521 = vmatprep.subr.bf16.mxu1 %v6520_v41 }
 0x3e0   :  { %6335 = vmatmul.mubr.msk.f32.gmra.mrb[228].mxu1 %vm2362_vm3, %v3702_v24 }
 0x3e1   :  { %6337 = vmatprep.mubr.msk.f32.mxu1 %vm6652_vm0, %v6653_v6  ;;  %6523 = vmatpush3.bf16.msra.mxu1 %v6522_v48 }
 0x3e2   :  { %6525 = vmatprep.subr.bf16.mxu1 %v6524_v49 }
 0x3e4   :  { %6338 = vmatmul.mubr.msk.f32.gmra.mrb[230].mxu1 %vm2362_vm3, %v3709_v26 }
 0x3e5   :  { %6340 = vmatprep.mubr.msk.f32.mxu1 %vm6652_vm0, %v6653_v6  ;;  %6527 = vmatpush3.bf16.msra.mxu1 %v6526_v54 }
 0x3e6   :  { %6529 = vmatprep.subr.bf16.mxu1 %v6528_v55 }
 0x3e8   :  { %6341 = vmatmul.mubr.msk.f32.gmra.mrb[232].mxu1 %vm2362_vm3, %v3716_v42 }
 0x3e9   :  { %6343 = vmatprep.mubr.msk.f32.mxu1 %vm6652_vm0, %v6653_v6  ;;  %6531 = vmatpush3.bf16.msra.mxu1 %v6530_v63 }
 0x3ea   :  { %6533 = vmatprep.subr.bf16.mxu1 %v6532_v1 }
 0x3ec   :  { %6344 = vmatmul.mubr.msk.f32.gmra.mrb[234].mxu1 %vm2362_vm3, %v3723_v27  ;;  %v3968_v27 = vadd.f32 %v8910_v7, %v5092_v8 }
 0x3ed   :  { %6346 = vmatprep.mubr.msk.f32.mxu1 %vm6652_vm0, %v6653_v6  ;;  %6535 = vmatpush3.bf16.msra.mxu1 %v6534_v5 }
 0x3f0   :  { %6347 = vmatmul.mubr.msk.f32.gmra.mrb[236].mxu1 %vm2362_vm3, %v3730_v28 }
 0x3f1   :  { %6349 = vmatprep.mubr.msk.f32.mxu1 %vm6652_vm0, %v6653_v6 }
 0x3f4   :  { %6350 = vmatmul.mubr.msk.f32.gmra.mrb[238].mxu1 %vm2362_vm3, %v3737_v29 }
 0x3f5   :  { %6352 = vmatprep.mubr.msk.f32.mxu1 %vm6652_vm0, %v6653_v6 }
 0x3f8   :  { %6353 = vmatmul.mubr.msk.f32.gmra.mrb[240].mxu1 %vm2362_vm3, %v3744_v30 }
 0x3f9   :  { %6355 = vmatprep.mubr.msk.f32.mxu1 %vm6652_vm0, %v6653_v6 }
 0x3fc   :  { %6356 = vmatmul.mubr.msk.f32.gmra.mrb[242].mxu1 %vm2362_vm3, %v3751_v31  ;;  %v3973_v31 = vadd.f32 %v8915_v11, %v5092_v8 }
 0x467   :  { %v5435_v9 = vpop.f32.mrb[190].mxu1 }
 0x468   :  { %v5436_v10 = vpop.f32.mrb[191].mxu1 }
 0x469   :  { %v5437_v14 = vadd.f32 %v5436_v10, %v5435_v9 }
 0x46b   :  { %v4063_v15 = vadd.f32 %v5437_v14, %v3953_v13  ;;  %v5438_v17 = vpop.f32.mrb[192].mxu1 }
 0x46c   :  { %v5439_v47 = vpop.f32.mrb[193].mxu1 }
 0x46d   :  { %v5440_v19 = vadd.f32 %v5439_v47, %v5438_v17 }
 0x46f   :  { %v4068_v60 = vadd.f32 %v5440_v19, %v3958_v18  ;;  %v5441_v21 = vpop.f32.mrb[194].mxu1 }
 0x470   :  { %v5442_v12 = vpop.f32.mrb[195].mxu1 }
 0x471   :  { %v5443_v25 = vadd.f32 %v5442_v12, %v5441_v21 }
 0x473   :  { %v4073_v24 = vadd.f32 %v5443_v25, %v3963_v22  ;;  %v5444_v26 = vpop.f32.mrb[196].mxu1 }
 0x474   :  { %v5445_v42 = vpop.f32.mrb[197].mxu1 }
 0x475   :  { %v5446_v56 = vadd.f32 %v5445_v42, %v5444_v26  ;;  %v4393_v42 = vld [vmem:[%s9406_s4 + $0xd0] sm:$0xff] }
 0x477   :  { %v4078_v28 = vadd.f32 %v5446_v56, %v3968_v27  ;;  %v5447_v29 = vpop.f32.mrb[198].mxu1  ;;  %v4394_v27 = vld [vmem:[%s9406_s4 + $0xd8] sm:$0xff]  ;;  %v4377_v56 = vld [vmem:[%s9406_s4 + $0x50] sm:$0xff] }
 0x478   :  { %v5448_v30 = vpop.f32.mrb[199].mxu1 }
 0x479   :  { %v5449_v32 = vadd.f32 %v5448_v30, %v5447_v29  ;;  %v6536_v29 = vpack.c.bf16 %v4394_v27, %v4393_v42  ;;  %v4378_v30 = vld [vmem:[%s9406_s4 + $0x58] sm:$0xff]  ;;  %v4400_v27 = vld [vmem:[%s9406_s4 + $0x108] sm:$0xff] }
 0x47b   :  { %v4083_v61 = vadd.f32 %v5449_v32, %v3973_v31  ;;  %v5450_v33 = vpop.f32.mrb[200].mxu1  ;;  %v4395_v31 = vld [vmem:[%s9406_s4 + $0xe0] sm:$0xff]  ;;  %v4396_v32 = vld [vmem:[%s9406_s4 + $0xe8] sm:$0xff]  ;;  %6537 = vmatprep.subr.bf16.mxu1 %v6536_v29 }
 0x47c   :  { %v5451_v34 = vpop.f32.mrb[201].mxu1 }
 0x47d   :  { %v5452_v36 = vadd.f32 %v5451_v34, %v5450_v33  ;;  %v6538_v33 = vpack.c.bf16 %v4378_v30, %v4377_v56  ;;  %v6540_v34 = vpack.c.bf16 %v4396_v32, %v4395_v31  ;;  %v4417_v56 = vld [vmem:[%s9406_s4 + $0x190] sm:$0xff] }
 0x47f   :  { %v4088_v2 = vadd.f32 %v5452_v36, %v3978_v35  ;;  %v5453_v37 = vpop.f32.mrb[202].mxu1  ;;  %6539 = vmatpush3.bf16.msra.mxu1 %v6538_v33  ;;  %v4402_v33 = vld [vmem:[%s9406_s4 + $0x118] sm:$0xff] }
 0x480   :  { %v5454_v38 = vpop.f32.mrb[203].mxu1  ;;  %6541 = vmatprep.subr.bf16.mxu1 %v6540_v34 }
 0x481   :  { %v5455_v41 = vadd.f32 %v5454_v38, %v5453_v37 }
 0x483   :  { %v4093_v7 = vadd.f32 %v5455_v41, %v3983_v40  ;;  %v5456_v43 = vpop.f32.mrb[204].mxu1  ;;  %v4379_v40 = vld [vmem:[%s9406_s4 + $0x60] sm:$0xff]  ;;  %v4380_v41 = vld [vmem:[%s9406_s4 + $0x68] sm:$0xff] }
 0x484   :  { %v5457_v44 = vpop.f32.mrb[205].mxu1 }
 0x485   :  { %v5458_v46 = vadd.f32 %v5457_v44, %v5456_v43  ;;  %v6542_v43 = vpack.c.bf16 %v4380_v41, %v4379_v40  ;;  %v4397_v44 = vld [vmem:[%s9406_s4 + $0xf0] sm:$0xff]  ;;  %v4404_v40 = vld [vmem:[%s9406_s4 + $0x128] sm:$0xff] }
 0x486   :  { %v4421_v41 = vld [vmem:[%s9406_s4 + $0x1b0] sm:$0xff] }
 0x487   :  { %v4098_v11 = vadd.f32 %v5458_v46, %v3988_v45  ;;  %v5459_v48 = vpop.f32.mrb[206].mxu1  ;;  %v4398_v45 = vld [vmem:[%s9406_s4 + $0xf8] sm:$0xff]  ;;  %v4381_v46 = vld [vmem:[%s9406_s4 + $0x70] sm:$0xff]  ;;  %6543 = vmatpush3.bf16.msra.mxu1 %v6542_v43 }
 0x488   :  { %v5460_v49 = vpop.f32.mrb[207].mxu1 }
 0x489   :  { %v5461_v51 = vadd.f32 %v5460_v49, %v5459_v48  ;;  %v6544_v49 = vpack.c.bf16 %v4398_v45, %v4397_v44 }
 0x48b   :  { %v4103_v16 = vadd.f32 %v5461_v51, %v3993_v50  ;;  %v5494_v52 = vpop.f32.mrb[208].mxu1  ;;  %v4382_v50 = vld [vmem:[%s9406_s4 + $0x78] sm:$0xff]  ;;  %6545 = vmatprep.subr.bf16.mxu1 %v6544_v49  ;;  %v4424_v49 = vld [vmem:[%s9406_s4 + $0x1c8] sm:$0xff] }
 0x48c   :  { %v5495_v53 = vpop.f32.mrb[209].mxu1  ;;  %v6546_v51 = vpack.c.bf16 %v4382_v50, %v4381_v46  ;;  %v4405_v46 = vld [vmem:[%s9406_s4 + $0x130] sm:$0xff] }
 0x48d   :  { %v5496_v54 = vadd.f32 %v5495_v53, %v5494_v52 }
 0x48e   :  { %6547 = vmatpush3.bf16.msra.mxu1 %v6546_v51 }
 0x48f   :  { %v5497_v55 = vpop.f32.mrb[210].mxu1  ;;  %v4173_v57 = vadd.f32 %v5496_v54, %v4063_v15 }
 0x490   :  { %v5498_v20 = vpop.f32.mrb[211].mxu1 }
 0x491   :  { %v5499_v58 = vadd.f32 %v5498_v20, %v5497_v55  ;;  %v4415_v55 = vld [vmem:[%s9406_s4 + $0x180] sm:$0xff] }
 0x493   :  { %v5500_v59 = vpop.f32.mrb[212].mxu1  ;;  %v4178_v62 = vadd.f32 %v5499_v58, %v4068_v60 }
 0x494   :  { %v5501_v63 = vpop.f32.mrb[213].mxu1 }
 0x495   :  { %v5502_v1 = vadd.f32 %v5501_v63, %v5500_v59 }
 0x497   :  { %v5503_v23 = vpop.f32.mrb[214].mxu1  ;;  %v4183_v3 = vadd.f32 %v5502_v1, %v4073_v24 }
 0x498   :  { %v5504_v4 = vpop.f32.mrb[215].mxu1 }
 0x499   :  { %v5505_v5 = vadd.f32 %v5504_v4, %v5503_v23 }
 0x49b   :  { %v5506_v9 = vpop.f32.mrb[216].mxu1  ;;  %v9158_v10 = vadd.f32 %v5505_v5, %v4078_v28 }
 0x49c   :  { %v5507_v39 = vpop.f32.mrb[217].mxu1 }
 0x49d   :  { %v5508_v8 = vadd.f32 %v5507_v39, %v5506_v9 }
 0x49f   :  { %v5509_v13 = vpop.f32.mrb[218].mxu1  ;;  %v9160_v14 = vadd.f32 %v5508_v8, %v4083_v61 }
 0x4a0   :  { %v5510_v17 = vpop.f32.mrb[219].mxu1 }
 0x4a1   :  { %v5511_v15 = vadd.f32 %v5510_v17, %v5509_v13 }
 0x4a3   :  { %v5512_v47 = vpop.f32.mrb[220].mxu1  ;;  %v9162_v18 = vadd.f32 %v5511_v15, %v4088_v2 }
 0x4a4   :  { %v5513_v19 = vpop.f32.mrb[221].mxu1 }
 0x4a5   :  { %v5514_v60 = vadd.f32 %v5513_v19, %v5512_v47 }
 0x4a7   :  { %v5515_v21 = vpop.f32.mrb[222].mxu1  ;;  %v9164_v12 = vadd.f32 %v5514_v60, %v4093_v7 }
 0x4a8   :  { %v5516_v22 = vpop.f32.mrb[223].mxu1 }
 0x4a9   :  { %v5517_v25 = vadd.f32 %v5516_v22, %v5515_v21 }
 0x4ab   :  { %v5518_v24 = vpop.f32.mrb[224].mxu1  ;;  %v9166_v26 = vadd.f32 %v5517_v25, %v4098_v11 }
 0x4ac   :  { %v5519_v28 = vpop.f32.mrb[225].mxu1 }
 0x4ad   :  { %v5520_v61 = vadd.f32 %v5519_v28, %v5518_v24  ;;  %v4418_v28 = vld [vmem:[%s9406_s4 + $0x198] sm:$0xff] }
 0x4ae   :  { %v6552_v32 = vpack.c.bf16 %v4418_v28, %v4417_v56  ;;  %v4660_v56 = vld [vmem:[%s9408_s6] sm:$0xff]  ;;  %v4661_v28 = vld [vmem:[%s9408_s6 + $0x8] sm:$0xff] }
 0x4af   :  { %v4282_v35 = vpop.f32.mrb[226].mxu1  ;;  %v4213_v36 = vadd.f32 %v5520_v61, %v4103_v16  ;;  %v4401_v61 = vld [vmem:[%s9406_s4 + $0x110] sm:$0xff] }
 0x4b0   :  { %v4283_v2 = vadd.f32 %v4282_v35, %v4173_v57  ;;  %v6333_v37 = vpop.f32.mrb[227].mxu1  ;;  %v4416_v57 = vld [vmem:[%s9406_s4 + $0x188] sm:$0xff]  ;;  %v4419_v35 = vld [vmem:[%s9406_s4 + $0x1a0] sm:$0xff] }
 0x4b1   :  { %v6548_v58 = vpack.c.bf16 %v4416_v57, %v4415_v55 }
 0x4b2   :  { %v4326_v38 = vmax.f32 %v4283_v2, 0.0  ;;  %v6554_v2 = vpack.c.bf16 %v4402_v33, %v4401_v61  ;;  %v4665_v61 = vld [vmem:[%s9408_s6 + $0x28] sm:$0xff] }
 0x4b3   :  { %v4287_v7 = vpop.f32.mrb[228].mxu1  ;;  %6549 = vmatprep.subr.bf16.mxu1 %v6548_v58  ;;  %v4409_v58 = vld [vmem:[%s9406_s4 + $0x150] sm:$0xff] }
 0x4b4   :  { %4336 = vst.msk [vmem:[#allocation4] sm:$0xff] %vm4335_vm7, %v4326_v38  ;;  %v4288_v11 = vadd.f32 %v4287_v7, %v4178_v62  ;;  %v6336_v48 = vpop.f32.mrb[229].mxu1  ;;  %v4403_v38 = vld [vmem:[%s9406_s4 + $0x120] sm:$0xff]  ;;  %v4422_v7 = vld [vmem:[%s9406_s4 + $0x1b8] sm:$0xff] }
 0x4b5   :  { %v6558_v43 = vpack.c.bf16 %v4404_v40, %v4403_v38  ;;  %v6560_v45 = vpack.c.bf16 %v4422_v7, %v4421_v41  ;;  %v4423_v48 = vld [vmem:[%s9406_s4 + $0x1c0] sm:$0xff] }
 0x4b6   :  { %v4327_v16 = vmax.f32 %v4288_v11, 0.0  ;;  %v4406_v11 = vld [vmem:[%s9406_s4 + $0x138] sm:$0xff]  ;;  %v6564_v51 = vpack.c.bf16 %v4424_v49, %v4423_v48  ;;  %v5102_v40 = vld [vmem:[%s9409_s5] ss:$0 sm:$0xff]  ;;  %s6658_s5 = smov 120  }
 0x4b7   :  { %v4292_v52 = vpop.f32.mrb[230].mxu1  ;;  %v6562_v50 = vpack.c.bf16 %v4406_v11, %v4405_v46  ;;  %v5104_v49 = vld [vmem:[%s9410_s7] ss:$0 sm:$0xff]  ;;  %s6661_s7 = smov 16  }
 0x4b8   :  { %v4293_v53 = vadd.f32 %v4292_v52, %v4183_v3  ;;  %4338 = vrot.lane.b32.xlu1 %v4327_v16, %s6656_s15  ;;  %v6339_v54 = vpop.f32.mrb[231].mxu1  ;;  %v4407_v16 = vld [vmem:[%s9406_s4 + $0x140] sm:$0xff]  ;;  %v4408_v52 = vld [vmem:[%s9406_s4 + $0x148] sm:$0xff] }
 0x4b9   :  { %v4426_v54 = vld [vmem:[%s9406_s4 + $0x1d8] sm:$0xff]  ;;  %v6566_v55 = vpack.c.bf16 %v4408_v52, %v4407_v16 }
 0x4ba   :  { %v4328_v20 = vmax.f32 %v4293_v53, 0.0  ;;  %v4425_v53 = vld [vmem:[%s9406_s4 + $0x1d0] sm:$0xff] }
 0x4bb   :  { %v4297_v59 = vpop.f32.mrb[232].mxu1 }
 0x4bc   :  { %4343 = vst.msk [vmem:[#allocation4 + $0x8] sm:$0xff] %vm4335_vm7, %v4328_v20  ;;  %v4298_v62 = vadd.f32 %v4297_v59, %v9158_v10  ;;  %v6342_v63 = vpop.f32.mrb[233].mxu1  ;;  %v6568_v20 = vpack.c.bf16 %v4426_v54, %v4425_v53  ;;  %v4410_v59 = vld [vmem:[%s9406_s4 + $0x158] sm:$0xff] }
 0x4bd   :  { %v4428_v63 = vld [vmem:[%s9406_s4 + $0x1e8] sm:$0xff] }
 0x4be   :  { %v4329_v1 = vmax.f32 %v4298_v62, 0.0  ;;  %v4427_v62 = vld [vmem:[%s9406_s4 + $0x1e0] sm:$0xff] }
 0x4bf   :  { %v4302_v23 = vpop.f32.mrb[234].mxu1 }
 0x4c0   :  { %v4303_v3 = vadd.f32 %v4302_v23, %v9160_v14  ;;  %4345 = vrot.lane.b32.xlu0 %v4329_v1, %s6656_s15  ;;  %v6345_v4 = vpop.f32.mrb[235].mxu1  ;;  %v6570_v1 = vpack.c.bf16 %v4410_v59, %v4409_v58  ;;  %v6572_v23 = vpack.c.bf16 %v4428_v63, %v4427_v62 }
 0x4c1   :  { %v4412_v4 = vld [vmem:[%s9406_s4 + $0x168] sm:$0xff] }
 0x4c2   :  { %v4330_v5 = vmax.f32 %v4303_v3, 0.0  ;;  %v4411_v3 = vld [vmem:[%s9406_s4 + $0x160] sm:$0xff] }
 0x4c3   :  { %v4307_v9 = vpop.f32.mrb[236].mxu1 }
 0x4c4   :  { %4349 = vst.msk [vmem:[#allocation4 + $0x10] sm:$0xff] %vm4335_vm7, %v4330_v5  ;;  %v4308_v39 = vadd.f32 %v4307_v9, %v9162_v18  ;;  %v6348_v8 = vpop.f32.mrb[237].mxu1  ;;  %v4429_v5 = vld [vmem:[%s9406_s4 + $0x1f0] sm:$0xff]  ;;  %v4430_v9 = vld [vmem:[%s9406_s4 + $0x1f8] sm:$0xff] }
 0x4c5   :  { %v6576_v8 = vpack.c.bf16 %v4430_v9, %v4429_v5 }
 0x4c6   :  { %v4331_v13 = vmax.f32 %v4308_v39, 0.0  ;;  %v6574_v39 = vpack.c.bf16 %v4412_v4, %v4411_v3 }
 0x4c7   :  { %v4312_v17 = vpop.f32.mrb[238].mxu1 }
 0x4c8   :  { %v4313_v10 = vadd.f32 %v4312_v17, %v9164_v12  ;;  %4351 = vrot.lane.b32.xlu1 %v4331_v13, %s6656_s15  ;;  %v6351_v15 = vpop.f32.mrb[239].mxu1  ;;  %v4413_v13 = vld [vmem:[%s9406_s4 + $0x170] sm:$0xff]  ;;  %v4414_v17 = vld [vmem:[%s9406_s4 + $0x178] sm:$0xff] }
 0x4c9   :  { %v4431_v15 = vld [vmem:[%s9406_s4 + $0x200] sm:$0xff] }
 0x4ca   :  { %v4332_v47 = vmax.f32 %v4313_v10, 0.0  ;;  %v6578_v10 = vpack.c.bf16 %v4414_v17, %v4413_v13 }
 0x4cb   :  { %v4317_v19 = vpop.f32.mrb[240].mxu1 }
 0x4cc   :  { %4355 = vst.msk [vmem:[#allocation4 + $0x18] sm:$0xff] %vm4335_vm7, %v4332_v47  ;;  %v4318_v14 = vadd.f32 %v4317_v19, %v9166_v26  ;;  %v6354_v60 = vpop.f32.mrb[241].mxu1  ;;  %v4399_v26 = vld [vmem:[%s9406_s4 + $0x100] sm:$0xff]  ;;  %v4432_v47 = vld [vmem:[%s9406_s4 + $0x208] sm:$0xff] }
 0x4cd   :  { %v6550_v29 = vpack.c.bf16 %v4400_v27, %v4399_v26  ;;  %v6581_v19 = vpack.c.bf16 %v4432_v47, %v4431_v15  ;;  %v4434_v60 = vld [vmem:[%s9406_s4 + $0x218] sm:$0xff] }
 0x4ce   :  { %v4333_v21 = vmax.f32 %v4318_v14, 0.0  ;;  %v4433_v14 = vld [vmem:[%s9406_s4 + $0x210] sm:$0xff] }
 0x4cf   :  { %v4322_v22 = vpop.f32.mrb[242].mxu1 }
 0x4d0   :  { %v4323_v25 = vadd.f32 %v4322_v22, %v4213_v36  ;;  %4357 = vrot.lane.b32.xlu0 %v4333_v21, %s6656_s15  ;;  %v6357_v18 = vpop.f32.mrb[243].mxu1  ;;  %v4420_v36 = vld [vmem:[%s9406_s4 + $0x1a8] sm:$0xff]  ;;  %v6584_v22 = vpack.c.bf16 %v4434_v60, %v4433_v14 }
 0x4d1   :  { %v6556_v37 = vpack.c.bf16 %v4420_v36, %v4419_v35  ;;  %v4436_v18 = vld [vmem:[%s9406_s4 + $0x228] sm:$0xff]  ;;  %v4667_v35 = vld [vmem:[%s9408_s6 + $0x38] sm:$0xff] }
 0x4d2   :  { %v4334_v24 = vmax.f32 %v4323_v25, 0.0  ;;  %v4435_v25 = vld [vmem:[%s9406_s4 + $0x220] sm:$0xff] }
 0x4d4   :  { %4361 = vst.msk [vmem:[#allocation4 + $0x20] sm:$0xff] %vm4335_vm7, %v4334_v24  ;;  %v6587_v24 = vpack.c.bf16 %v4436_v18, %v4435_v25 }
 0x4db   :  { %v4366_v27 = vld [vmem:[#allocation4 + $0x20] sm:$0xff] }
 0x52a   :  { %v4339_v12 = vpop.permute.xlu1 %4338 }
 0x52b   :  { %4342 = vst.msk [vmem:[#allocation4] sm:$0xff] %vm4341_vm8, %v4339_v12  ;;  %v4437_v12 = vld [vmem:[%s9406_s4 + $0x230] sm:$0xff] }
 0x532   :  { %v4346_v42 = vpop.permute.xlu0 %4345  ;;  %v4362_v34 = vld [vmem:[#allocation4] sm:$0xff] }
 0x533   :  { %4348 = vst.msk [vmem:[#allocation4 + $0x8] sm:$0xff] %vm4341_vm8, %v4346_v42  ;;  %v4438_v42 = vld [vmem:[%s9406_s4 + $0x238] sm:$0xff] }
 0x534   :  { %v6590_v26 = vpack.c.bf16 %v4438_v42, %v4437_v12 }
 0x53a   :  { %v4352_v30 = vpop.permute.xlu1 %4351  ;;  %v4363_v31 = vld [vmem:[#allocation4 + $0x8] sm:$0xff] }
 0x53b   :  { %4354 = vst.msk [vmem:[#allocation4 + $0x10] sm:$0xff] %vm4341_vm8, %v4352_v30  ;;  %4513 = vmatprep.mubr.f32.mxu1 %v4363_v31  ;;  %v6593_v30 = vpack.c.bf16 %v4661_v28, %v4660_v56  ;;  %v4663_v31 = vld [vmem:[%s9408_s6 + $0x18] sm:$0xff] }
 0x53c   :  { %4514 = vmatmul.mubr.f32.vlgmr.msra.gmra.mrb[244].mxu1 %v4362_v34  ;;  %v4666_v34 = vld [vmem:[%s9408_s6 + $0x30] sm:$0xff] }
 0x53d   :  { %6551 = vmatpush3.bf16.msra.mxu1 %v6550_v29  ;;  %v4662_v29 = vld [vmem:[%s9408_s6 + $0x10] sm:$0xff]  ;;  %v6602_v36 = vpack.c.bf16 %v4667_v35, %v4666_v34 }
 0x53e   :  { %6553 = vmatprep.subr.bf16.mxu1 %v6552_v32  ;;  %v6596_v32 = vpack.c.bf16 %v4663_v31, %v4662_v29 }
 0x541   :  { %6555 = vmatpush3.bf16.msra.mxu1 %v6554_v2 }
 0x542   :  { %v4358_v44 = vpop.permute.xlu0 %4357  ;;  %6557 = vmatprep.subr.bf16.mxu1 %v6556_v37  ;;  %v4364_v21 = vld [vmem:[#allocation4 + $0x10] sm:$0xff] }
 0x543   :  { %4360 = vst.msk [vmem:[#allocation4 + $0x18] sm:$0xff] %vm4341_vm8, %v4358_v44 }
 0x545   :  { %6559 = vmatpush3.bf16.msra.mxu1 %v6558_v43 }
 0x546   :  { %6561 = vmatprep.subr.bf16.mxu1 %v6560_v45 }
 0x549   :  { %6563 = vmatpush3.bf16.msra.mxu1 %v6562_v50 }
 0x54a   :  { %6565 = vmatprep.subr.bf16.mxu1 %v6564_v51  ;;  %v4365_v57 = vld [vmem:[#allocation4 + $0x18] sm:$0xff] }
 0x54b   :  { %4583 = vmatprep.mubr.f32.mxu1 %v4365_v57 }
 0x54d   :  { %6567 = vmatpush3.bf16.msra.mxu1 %v6566_v55 }
 0x54e   :  { %6569 = vmatprep.subr.bf16.mxu1 %v6568_v20 }
 0x551   :  { %6571 = vmatpush3.bf16.msra.mxu1 %v6570_v1 }
 0x552   :  { %6573 = vmatprep.subr.bf16.mxu1 %v6572_v23 }
 0x555   :  { %6575 = vmatpush3.bf16.msra.mxu1 %v6574_v39 }
 0x556   :  { %6577 = vmatprep.subr.bf16.mxu1 %v6576_v8 }
 0x559   :  { %6579 = vmatpush3.bf16.msra.mxu1 %v6578_v10 }
 0x55a   :  { %6580 = vmatprep.subr.bf16.mxu1 %v6651_v0 }
 0x55c   :  { %4584 = vmatmul.mubr.f32.vlgmr.msra.gmra.mrb[246].mxu1 %v4364_v21 }
 0x55d   :  { %6582 = vmatpush3.bf16.msra.mxu1 %v6581_v19  ;;  %6374 = vmatprep.mubr.msk.f32.mxu1 %vm6652_vm0, %v6653_v6 }
 0x55e   :  { %6583 = vmatprep.subr.bf16.mxu1 %v6651_v0 }
 0x561   :  { %6585 = vmatpush3.bf16.msra.mxu1 %v6584_v22 }
 0x562   :  { %6586 = vmatprep.subr.bf16.mxu1 %v6651_v0 }
 0x565   :  { %6588 = vmatpush3.bf16.msra.mxu1 %v6587_v24 }
 0x566   :  { %6589 = vmatprep.subr.bf16.mxu1 %v6651_v0 }
 0x569   :  { %6591 = vmatpush3.bf16.msra.mxu1 %v6590_v26 }
 0x56a   :  { %6592 = vmatprep.subr.bf16.mxu1 %v6651_v0 }
 0x56c   :  { %6375 = vmatmul.mubr.msk.f32.vlgmr.msra.gmra.mrb[248].mxu1 %vm4335_vm7, %v4366_v27 }
 0x56d   :  { %6393 = vmatprep.mubr.msk.f32.mxu1 %vm6652_vm0, %v6653_v6  ;;  %6594 = vmatpush3.bf16.msra.mxu1 %v6593_v30  ;;  %v4664_v6 = vld [vmem:[%s9408_s6 + $0x20] sm:$0xff] }
 0x56e   :  { %6595 = vmatprep.subr.bf16.mxu1 %v6651_v0  ;;  %v6599_v33 = vpack.c.bf16 %v4665_v61, %v4664_v6 }
 0x571   :  { %6597 = vmatpush3.bf16.msra.mxu1 %v6596_v32 }
 0x572   :  { %6598 = vmatprep.subr.bf16.mxu1 %v6651_v0 }
 0x575   :  { %6600 = vmatpush3.bf16.msra.mxu1 %v6599_v33 }
 0x576   :  { %6601 = vmatprep.subr.bf16.mxu1 %v6651_v0 }
 0x579   :  { %6603 = vmatpush3.bf16.msra.mxu1 %v6602_v36 }
 0x60f   :  { %v5566_v2 = vpop.f32.mrb[244].mxu1 }
 0x610   :  { %v5567_v37 = vpop.f32.mrb[245].mxu1 }
 0x611   :  { %v5568_v38 = vadd.f32 %v5567_v37, %v5566_v2 }
 0x613   :  { %v4516_v0 = vadd.f32 %v5568_v38, %v5102_v40 }
 0x62f   :  { %v5601_v41 = vpop.f32.mrb[246].mxu1 }
 0x630   :  { %v5602_v7 = vpop.f32.mrb[247].mxu1 }
 0x631   :  { %v5603_v43 = vadd.f32 %v5602_v7, %v5601_v41 }
 0x633   :  { %v4586_v44 = vadd.f32 %v5603_v43, %v4516_v0 }
 0x63f   :  { %v4655_v45 = vpop.f32.mrb[248].mxu1 }
 0x640   :  { %v4656_v46 = vadd.f32 %v4655_v45, %v4586_v44  ;;  %v6376_v11 = vpop.f32.mrb[249].mxu1 }
 0x642   :  { %v4659_v48 = vmax.f32 %v4656_v46, 0.0 }
 0x644   :  { %6394 = vmatmul.mubr.msk.f32.vlgmr.msra.gmra.mrb[250].mxu1 %vm4335_vm7, %v4659_v48 }
 0x717   :  { %v4744_v50 = vpop.f32.mrb[250].mxu1 }
 0x718   :  { %v4745_v51 = vadd.f32 %v5104_v49, %v4744_v50  ;;  %v6395_v16 = vpop.f32.mrb[251].mxu1 }
 0x71a   :  { %4753 = vrot.lane.b32.xlu1 %v4745_v51, %s6657_s2  ;;  %4749 = vrot.lane.b32.xlu0 %v4745_v51, %s6658_s5 }
 0x71e   :  { %4761 = vrot.lane.b32.xlu1 %v4745_v51, %s6654_s29  ;;  %4757 = vrot.lane.b32.xlu0 %v4745_v51, %s6659_s19  ;;  %s6662_s29 = smov 8  }
 0x722   :  { %4822 = vrot.lane.b32.xlu1 %v4745_v51, %s6660_s20 }
 0x78c   :  { %v4754_v52 = vpop.permute.xlu1 %4753  ;;  %v4750_v53 = vpop.permute.xlu0 %4749 }
 0x78d   :  { %v4752_v54 = vadd.f32 %v4750_v53, %v4745_v51  ;;  %v4783_v63 = vadd.f32 %v4754_v52, %v4745_v51 }
 0x78f   :  { %v4756_v55 = vadd.f32 %v4754_v52, %v4752_v54 }
 0x790   :  { %v4758_v57 = vpop.permute.xlu0 %4757  ;;  %v4762_v58 = vpop.permute.xlu1 %4761 }
 0x791   :  { %v4760_v20 = vadd.f32 %v4758_v57, %v4756_v55  ;;  %v4796_v1 = vadd.f32 %v4758_v57, %v4745_v51  ;;  %v4809_v3 = vadd.f32 %v4762_v58, %v4745_v51 }
 0x793   :  { %v4764_v59 = vadd.f32 %v4762_v58, %v4760_v20 }
 0x794   :  { %v4823_v9 = vpop.permute.xlu1 %4822 }
 0x795   :  { %v4765_v62 = vmul.f32 0.2, %v4764_v59  ;;  %v4825_v10 = vadd.f32 %v4823_v9, %v4745_v51 }
 0x797   :  { %4767 = vrot.lane.b32.xlu0 %v4765_v62, %s6658_s5 }
 0x809   :  { %v4768_v23 = vpop.permute.xlu0 %4767 }
 0x80a   :  { %v4797_v4 = vsub.f32 %v4796_v1, %v4768_v23  ;;  %v4784_v5 = vsub.f32 %v4783_v63, %v4768_v23  ;;  %v4810_v13 = vsub.f32 %v4809_v3, %v4768_v23  ;;  %v4770_v17 = vsub.f32 %v4752_v54, %v4768_v23 }
 0x80b   :  { %v4826_v19 = vsub.f32 %v4825_v10, %v4768_v23 }
 0x80c   :  { %v4798_v39 = vsel %vm4771_vm9, %v4797_v4, -inf  ;;  %v4785_v8 = vsel %vm4771_vm9, %v4784_v5, -inf  ;;  %v4811_v15 = vsel %vm4771_vm9, %v4810_v13, -inf  ;;  %v4772_v47 = vsel %vm4771_vm9, %v4770_v17, -inf }
 0x80d   :  { %4799 = vmax.xlane.f32.xlu1 %v4798_v39  ;;  %4786 = vmax.xlane.f32.xlu0 %v4785_v8  ;;  %v4827_v14 = vsel %vm4771_vm9, %v4826_v19, -inf }
 0x811   :  { %4812 = vmax.xlane.f32.xlu0 %v4811_v15  ;;  %4773 = vmax.xlane.f32.xlu1 %v4772_v47 }
 0x815   :  { %4828 = vmax.xlane.f32.xlu0 %v4827_v14 }
 0x89a   :  { %v4800_v60 = vpop.xlane.xlu1 %4799  ;;  %v4787_v21 = vpop.xlane.xlu0 %4786 }
 0x89b   :  { %v4801_v22 = vsub.f32 %v4797_v4, %v4800_v60  ;;  %v4788_v25 = vsub.f32 %v4784_v5, %v4787_v21 }
 0x89d   :  { %v4802_v18 = vmul.f32 1.442695, %v4801_v22  ;;  %v4789_v24 = vmul.f32 1.442695, %v4788_v25 }
 0x89e   :  { %v4813_v12 = vpop.xlane.xlu0 %4812  ;;  %v4774_v42 = vpop.xlane.xlu1 %4773 }
 0x89f   :  { %6631 = vpow2.f32 %v4802_v18  ;;  %v4814_v26 = vsub.f32 %v4810_v13, %v4813_v12  ;;  %v4775_v27 = vsub.f32 %v4770_v17, %v4774_v42 }
 0x8a0   :  { %6633 = vpow2.f32 %v4789_v24 }
 0x8a1   :  { %v4815_v56 = vmul.f32 1.442695, %v4814_v26  ;;  %v4776_v28 = vmul.f32 1.442695, %v4775_v27 }
 0x8a2   :  { %v4829_v29 = vpop.xlane.xlu0 %4828 }
 0x8a3   :  { %6635 = vpow2.f32 %v4815_v56  ;;  %v4830_v30 = vsub.f32 %v4826_v19, %v4829_v29 }
 0x8a4   :  { %6637 = vpow2.f32 %v4776_v28 }
 0x8a5   :  { %v4831_v31 = vmul.f32 1.442695, %v4830_v30 }
 0x8a7   :  { %6639 = vpow2.f32 %v4831_v31 }
 0x8a9   :  { %v6632_v32 = vpop.eup %6631 }
 0x8aa   :  { %v6634_v6 = vpop.eup %6633  ;;  %v4804_v61 = vsel %vm4771_vm9, %v6632_v32, 0.0 }
 0x8ab   :  { %v4791_v33 = vsel %vm4771_vm9, %v6634_v6, 0.0  ;;  %4805 = vadd.xlane.f32.xlu1 %v4804_v61 }
 0x8ac   :  { %4792 = vadd.xlane.f32.xlu0 %v4791_v33 }
 0x8ad   :  { %v6636_v34 = vpop.eup %6635 }
 0x8ae   :  { %v4817_v35 = vsel %vm4771_vm9, %v6636_v34, 0.0  ;;  %v6638_v36 = vpop.eup %6637 }
 0x8af   :  { %v4778_v38 = vsel %vm4771_vm9, %v6638_v36, 0.0 }
 0x8b0   :  { %4818 = vadd.xlane.f32.xlu0 %v4817_v35 }
 0x8b1   :  { %v6640_v2 = vpop.eup %6639 }
 0x8b2   :  { %v4833_v37 = vsel %vm4771_vm9, %v6640_v2, 0.0 }
 0x8b3   :  { %4834 = vadd.xlane.f32.xlu1 %v4833_v37 }
 0x8b4   :  { %4779 = vadd.xlane.f32.xlu0 %v4778_v38 }
 0x938   :  { %v4806_v40 = vpop.xlane.xlu1 %4805 }
 0x939   :  { %v4793_v41 = vpop.xlane.xlu0 %4792  ;;  %6641 = vrcp.f32 %v4806_v40 }
 0x93a   :  { %6643 = vrcp.f32 %v4793_v41 }
 0x93d   :  { %v4819_v7 = vpop.xlane.xlu0 %4818 }
 0x93e   :  { %6645 = vrcp.f32 %v4819_v7 }
 0x940   :  { %v4835_v0 = vpop.xlane.xlu1 %4834 }
 0x941   :  { %6647 = vrcp.f32 %v4835_v0  ;;  %v4780_v51 = vpop.xlane.xlu0 %4779 }
 0x942   :  { %6649 = vrcp.f32 %v4780_v51 }
 0x943   :  { %v6642_v43 = vpop.eup %6641 }
 0x944   :  { %v6644_v44 = vpop.eup %6643  ;;  %v4808_v45 = vmul.f32 %v6642_v43, %v6632_v32 }
 0x945   :  { %v4795_v46 = vmul.f32 %v6644_v44, %v6634_v6 }
 0x946   :  { %4843 = vrot.lane.b32.xlu0 %v4808_v45, %s6661_s7 }
 0x947   :  { %4839 = vrot.lane.b32.xlu1 %v4795_v46, %s6662_s29 }
 0x948   :  { %v6646_v11 = vpop.eup %6645 }
 0x949   :  { %v4821_v48 = vmul.f32 %v6646_v11, %v6636_v34 }
 0x94b   :  { %v6648_v49 = vpop.eup %6647  ;;  %4847 = vrot.lane.b32.xlu1 %v4821_v48, %s6663_s22 }
 0x94c   :  { %v4837_v50 = vmul.f32 %v6648_v49, %v6640_v2  ;;  %v6650_v16 = vpop.eup %6649 }
 0x94d   :  { %v4782_v53 = vmul.f32 %v6650_v16, %v6638_v36 }
 0x94f   :  { %4851 = vrot.lane.b32.xlu1 %v4837_v50, %s6655_s21 }
 0x9b8   :  { %v4844_v54 = vpop.permute.xlu0 %4843 }
 0x9b9   :  { %v4840_v52 = vpop.permute.xlu1 %4839 }
 0x9ba   :  { %v4854_v55 = vsel %vm4771_vm9, %v4782_v53, %v4840_v52 }
 0x9bb   :  { %v4856_v20 = vsel %vm4855_vm10, %v4854_v55, %v4844_v54 }
 0x9bd   :  { %v4848_v57 = vpop.permute.xlu1 %4847 }
 0x9be   :  { %v4858_v58 = vsel %vm4857_vm11, %v4856_v20, %v4848_v57 }
 0x9c1   :  { %v4852_v59 = vpop.permute.xlu1 %4851 }
 0x9c2   :  { %v4859_v62 = vsel %vm2362_vm3, %v4858_v58, %v4852_v59 }
 0x9c3   :  { %4861 = vst.msk [vmem:[%s9411_s8] sm:$0xff] %vm4860_vm12, %v4859_v62 }

</bundles_post_ra>
